<compile_context>
chip_gen: v6e
topology: v6e:2x2x1
jax: 0.10.0
libtpu: 0.0.40
codegen_flags: <defaults>
</compile_context>

<pallas_src>
import jax
import jax.numpy as jnp
from jax import lax
from jax.experimental import pallas as pl
from jax.experimental.pallas import tpu as pltpu

HIDDEN = 32            # LSTM hidden size per direction
D_MODEL = 64           # 2 * HIDDEN
N_HEAD = 2
HEAD_DIM = D_MODEL // N_HEAD
D_FF = 2048            # nn.TransformerEncoderLayer default dim_feedforward
LN_EPS = 1e-5


# --------------------------------------------------------------------------
# Fused kernel: bi-LSTM -> TransformerEncoderLayer (post-norm, relu, eval)
#               -> Linear(64->1) + Sigmoid
# --------------------------------------------------------------------------
def _attncut_kernel(x_ref,
                    wih_f_ref, whh_f_ref, b_f_ref,
                    wih_b_ref, whh_b_ref, b_b_ref,
                    w_in_ref, b_in_ref, w_out_ref, b_out_ref,
                    ln1_g_ref, ln1_b_ref, w1_ref, b1_ref, w2_ref, b2_ref,
                    ln2_g_ref, ln2_b_ref, w_dec_ref, b_dec_ref,
                    out_ref,
                    gxf_ref, gxb_ref, hf_ref, hb_ref):
    S, B, _ = x_ref.shape
    H = HIDDEN
    E = D_MODEL

    # ---------------- 1. bidirectional LSTM (PyTorch gate order i,f,g,o) ----
    x = x_ref[...]                                        # (S, B, 1)
    # Hoisted input-gate contribution for every timestep (bias_ih + bias_hh
    # pre-summed into b_*): one vectorized VPU op per direction.
    gxf_ref[...] = x * wih_f_ref[...] + b_f_ref[...]      # (S, B, 4H)
    gxb_ref[...] = x * wih_b_ref[...] + b_b_ref[...]      # (S, B, 4H)

    whh_f = whh_f_ref[...]                                # (H, 4H)
    whh_b = whh_b_ref[...]

    # Lane mask selecting the g-gate (tanh) quarter of the 4H-wide gate vector.
    lane = lax.broadcasted_iota(jnp.int32, (B, 4 * H), 1)
    is_g = (lane >= 2 * H) & (lane < 3 * H)

    def act(gates):                                       # full-width activations
        return jnp.where(is_g, jnp.tanh(gates), jax.nn.sigmoid(gates))

    def cell(gates, c):
        a = act(gates)
        i = a[:, 0 * H:1 * H]
        f = a[:, 1 * H:2 * H]
        g = a[:, 2 * H:3 * H]
        o = a[:, 3 * H:4 * H]
        c_new = f * c + i * g
        h_new = o * jnp.tanh(c_new)
        return h_new, c_new

    def step(t, carry):
        # forward cell at t and backward cell at S-1-t in the same iteration:
        # two independent (B,H)@(H,4H) matmuls overlap their gate math.
        h_f, c_f, h_b, c_b = carry
        tb = S - 1 - t
        gf = gxf_ref[t] + jnp.dot(h_f, whh_f, preferred_element_type=jnp.float32)
        gb = gxb_ref[tb] + jnp.dot(h_b, whh_b, preferred_element_type=jnp.float32)
        h_f, c_f = cell(gf, c_f)
        h_b, c_b = cell(gb, c_b)
        hf_ref[t] = h_f
        hb_ref[tb] = h_b
        return (h_f, c_f, h_b, c_b)

    z = jnp.zeros((B, H), jnp.float32)
    lax.fori_loop(0, S, step, (z, z, z, z), unroll=True)

    # ---------------- 2. TransformerEncoderLayer ----------------------------
    # layout (N, L, E): N = S (transformer batch axis), L = B (attention axis)
    src = jnp.concatenate([hf_ref[...], hb_ref[...]], axis=-1)   # (S, B, 64)
    rows = S * B
    x2d = src.reshape(rows, E)

    qkv = (jnp.dot(x2d, w_in_ref[...], preferred_element_type=jnp.float32)
           + b_in_ref[...])                                      # (rows, 3E)
    scale = 1.0 / (HEAD_DIM ** 0.5)
    q = qkv[:, 0 * E:1 * E].reshape(S, B, E) * scale             # scale hoisted
    k = qkv[:, 1 * E:2 * E].reshape(S, B, E)
    v = qkv[:, 2 * E:3 * E].reshape(S, B, E)

    heads = []
    for h in range(N_HEAD):                                      # static, N_HEAD=2
        sl = slice(h * HEAD_DIM, (h + 1) * HEAD_DIM)
        qh, kh, vh = q[..., sl], k[..., sl], v[..., sl]          # (S, B, hd)
        s = jnp.einsum('nld,nmd->nlm', qh, kh,
                       preferred_element_type=jnp.float32)       # (S, B, B)
        s = s - jnp.max(s, axis=-1, keepdims=True)
        p = jnp.exp(s)
        p = p * pl.reciprocal(jnp.sum(p, axis=-1, keepdims=True), approx=True)
        heads.append(jnp.einsum('nlm,nmd->nld', p, vh,
                                preferred_element_type=jnp.float32))
    attn = jnp.concatenate(heads, axis=-1).reshape(rows, E)
    attn = (jnp.dot(attn, w_out_ref[...], preferred_element_type=jnp.float32)
            + b_out_ref[...])

    def layer_norm(t, g, b):
        mu = jnp.mean(t, axis=-1, keepdims=True)
        var = jnp.mean((t - mu) ** 2, axis=-1, keepdims=True)
        return (t - mu) * lax.rsqrt(var + LN_EPS) * g + b

    h1 = layer_norm(x2d + attn, ln1_g_ref[...], ln1_b_ref[...])

    # feed-forward 64 -> 2048 -> 64 with ReLU
    hid = jnp.maximum(
        jnp.dot(h1, w1_ref[...], preferred_element_type=jnp.float32) + b1_ref[...], 0.0)
    ff = jnp.dot(hid, w2_ref[...], preferred_element_type=jnp.float32) + b2_ref[...]
    h2 = layer_norm(h1 + ff, ln2_g_ref[...], ln2_b_ref[...])

    # ---------------- 3. decision head: Linear(64 -> 1) + Sigmoid -----------
    logit = (jnp.dot(h2, w_dec_ref[...], preferred_element_type=jnp.float32)
             + b_dec_ref[...])                                   # (rows, 1)
    out_ref[...] = jax.nn.sigmoid(logit).reshape(S, B, 1)


def attncut_forward(x, params):
    B, S, _ = x.shape
    lp, ep = params["lstm"], params["enc"]
    x_sb1 = jnp.transpose(x, (1, 0, 2))                  # (S, B, 1), tiny

    rows = S * B
    flops = (
        2 * 2 * S * B * HIDDEN * 4 * HIDDEN              # LSTM recurrent matmuls
        + 2 * rows * D_MODEL * 3 * D_MODEL               # qkv projection
        + 2 * 2 * N_HEAD * S * B * B * HEAD_DIM          # attention scores + PV
        + 2 * rows * D_MODEL * D_MODEL                   # out projection
        + 2 * 2 * rows * D_MODEL * D_FF                  # FFN
        + 2 * rows * D_MODEL                             # decision head
    )
    transcendentals = (2 * S * B * (2 * 4 * HIDDEN + HIDDEN)
                       + N_HEAD * S * B * B + 3 * rows)
    param_bytes = 4 * sum(int(p.size) for p in jax.tree_util.tree_leaves(params))
    bytes_accessed = param_bytes + 4 * (int(x.size) + rows)

    out_sb1 = pl.pallas_call(
        _attncut_kernel,
        out_shape=jax.ShapeDtypeStruct((S, B, 1), jnp.float32),
        in_specs=[pl.BlockSpec(memory_space=pltpu.MemorySpace.VMEM)] * 21,
        out_specs=pl.BlockSpec(memory_space=pltpu.MemorySpace.VMEM),
        scratch_shapes=[
            pltpu.VMEM((S, B, 4 * HIDDEN), jnp.float32),   # fwd input-gate precompute
            pltpu.VMEM((S, B, 4 * HIDDEN), jnp.float32),   # bwd input-gate precompute
            pltpu.VMEM((S, B, HIDDEN), jnp.float32),       # fwd hidden states
            pltpu.VMEM((S, B, HIDDEN), jnp.float32),       # bwd hidden states
        ],
        compiler_params=pltpu.CompilerParams(vmem_limit_bytes=32 * 1024 * 1024),
        cost_estimate=pl.CostEstimate(flops=flops,
                                      transcendentals=transcendentals,
                                      bytes_accessed=bytes_accessed),
    )(x_sb1,
      lp["wih_f"], lp["whh_f"], lp["b_f"], lp["wih_b"], lp["whh_b"], lp["b_b"],
      ep["w_in"], ep["b_in"], ep["w_out"], ep["b_out"],
      ep["ln1_g"], ep["ln1_b"], ep["w1"], ep["b1"], ep["w2"], ep["b2"],
      ep["ln2_g"], ep["ln2_b"], ep["w_dec"], ep["b_dec"])
    # TODO(synk): for large B*S, row-tile the encoder/FFN with a grid (weights
    # kept resident via index_map) marked "parallel" so v7x's 2 TensorCores and
    # its 64 MiB VMEM budget are used; at these sizes a single program suffices.
    return jnp.transpose(out_sb1, (1, 0, 2))             # (B, S, 1) batch_first


# --------------------------------------------------------------------------
# Deterministic synthetic parameters (shapes follow the PyTorch module)
# --------------------------------------------------------------------------
def init_params(key):
    ks = iter(jax.random.split(key, 32))

    def nrm(shape, fan_in):
        return jax.random.normal(next(ks), shape, jnp.float32) / jnp.sqrt(float(fan_in))

    H, E, F = HIDDEN, D_MODEL, D_FF
    lstm = {}
    for d in ("f", "b"):                           # forward / reverse directions
        lstm[f"wih_{d}"] = nrm((1, 4 * H), 1.0)    # weight_ih_l0.T   (4H,1) -> (1,4H)
        lstm[f"whh_{d}"] = nrm((H, 4 * H), H)      # weight_hh_l0.T   (4H,H) -> (H,4H)
        lstm[f"b_{d}"] = nrm((1, 4 * H), H) + nrm((1, 4 * H), H)   # bias_ih + bias_hh

    enc = {
        "w_in": nrm((E, 3 * E), E),                # in_proj_weight.T
        "b_in": nrm((1, 3 * E), E),
        "w_out": nrm((E, E), E),                   # out_proj.weight.T
        "b_out": nrm((1, E), E),
        "ln1_g": jnp.ones((1, E), jnp.float32),
        "ln1_b": jnp.zeros((1, E), jnp.float32),
        "w1": nrm((E, F), E),                      # linear1.weight.T
        "b1": nrm((1, F), E),
        "w2": nrm((F, E), F),                      # linear2.weight.T
        "b2": nrm((1, E), F),
        "ln2_g": jnp.ones((1, E), jnp.float32),
        "ln2_b": jnp.zeros((1, E), jnp.float32),
        "w_dec": nrm((E, 1), E),                   # decision Linear.weight.T
        "b_dec": jnp.zeros((1, 1), jnp.float32),
    }
    return {"lstm": lstm, "enc": enc}


# --------------------------------------------------------------------------
# Pure-JAX reference (vectorized, independent formulation) for verification
# --------------------------------------------------------------------------
def reference_forward(x, params):
    B, S, _ = x.shape
    H, E = HIDDEN, D_MODEL
    lp, ep = params["lstm"], params["enc"]

    def lstm_dir(x_sb1, wih, whh, b, reverse):
        def step(carry, x_t):
            h, c = carry
            g = x_t * wih + b + h @ whh
            i = jax.nn.sigmoid(g[:, :H])
            f = jax.nn.sigmoid(g[:, H:2 * H])
            gg = jnp.tanh(g[:, 2 * H:3 * H])
            o = jax.nn.sigmoid(g[:, 3 * H:])
            c = f * c + i * gg
            h = o * jnp.tanh(c)
            return (h, c), h
        xs = x_sb1[::-1] if reverse else x_sb1
        h0 = jnp.zeros((x_sb1.shape[1], H), jnp.float32)
        _, hs = lax.scan(step, (h0, h0), xs)
        return hs[::-1] if reverse else hs

    x_sb1 = jnp.transpose(x, (1, 0, 2))
    yf = lstm_dir(x_sb1, lp["wih_f"], lp["whh_f"], lp["b_f"], False)
    yb = lstm_dir(x_sb1, lp["wih_b"], lp["whh_b"], lp["b_b"], True)
    src = jnp.transpose(jnp.concatenate([yf, yb], -1), (1, 0, 2))     # (B, S, 64)

    L, N, _ = src.shape
    x2 = src.reshape(L * N, E)
    qkv = x2 @ ep["w_in"] + ep["b_in"]
    q, k, v = [qkv[:, i * E:(i + 1) * E].reshape(L, N, N_HEAD, HEAD_DIM) for i in range(3)]
    s = jnp.einsum("lnhd,mnhd->nhlm", q / jnp.sqrt(float(HEAD_DIM)), k)
    p = jax.nn.softmax(s, axis=-1)
    o = jnp.einsum("nhlm,mnhd->lnhd", p, v).reshape(L * N, E)
    o = o @ ep["w_out"] + ep["b_out"]

    def ln(t, g, b):
        mu = t.mean(-1, keepdims=True)
        var = ((t - mu) ** 2).mean(-1, keepdims=True)
        return (t - mu) / jnp.sqrt(var + LN_EPS) * g + b

    h1 = ln(x2 + o, ep["ln1_g"], ep["ln1_b"])
    ff = jnp.maximum(h1 @ ep["w1"] + ep["b1"], 0.0) @ ep["w2"] + ep["b2"]
    h2 = ln(h1 + ff, ep["ln2_g"], ep["ln2_b"])
    return jax.nn.sigmoid(h2 @ ep["w_dec"] + ep["b_dec"]).reshape(B, S, 1)


if __name__ == "__main__":
    key = jax.random.PRNGKey(0)
    pkey, xkey = jax.random.split(key)
    params = init_params(pkey)

    B, S = 2, 8
    x = jax.random.normal(xkey, (B, S, 1), jnp.float32)   # (batch, seq, input_size=1)

    out = jax.jit(attncut_forward)(x, params)
    out = jax.block_until_ready(out)

    ref = reference_forward(x, params)
    assert out.shape == (B, S, 1), out.shape
    err = float(jnp.max(jnp.abs(out - ref)))
    assert err < 1e-2, f"max abs err {err}"
    print("KERNEL_OK")
</pallas_src>

<mosaic_0001>
module attributes {stable_mosaic.version = 11 : i64} {
  func.func @_attncut_kernel(%arg0: memref<8x2x1xf32, #tpu.memory_space<vmem>>, %arg1: memref<1x128xf32, #tpu.memory_space<vmem>>, %arg2: memref<32x128xf32, #tpu.memory_space<vmem>>, %arg3: memref<1x128xf32, #tpu.memory_space<vmem>>, %arg4: memref<1x128xf32, #tpu.memory_space<vmem>>, %arg5: memref<32x128xf32, #tpu.memory_space<vmem>>, %arg6: memref<1x128xf32, #tpu.memory_space<vmem>>, %arg7: memref<64x192xf32, #tpu.memory_space<vmem>>, %arg8: memref<1x192xf32, #tpu.memory_space<vmem>>, %arg9: memref<64x64xf32, #tpu.memory_space<vmem>>, %arg10: memref<1x64xf32, #tpu.memory_space<vmem>>, %arg11: memref<1x64xf32, #tpu.memory_space<vmem>>, %arg12: memref<1x64xf32, #tpu.memory_space<vmem>>, %arg13: memref<64x2048xf32, #tpu.memory_space<vmem>>, %arg14: memref<1x2048xf32, #tpu.memory_space<vmem>>, %arg15: memref<2048x64xf32, #tpu.memory_space<vmem>>, %arg16: memref<1x64xf32, #tpu.memory_space<vmem>>, %arg17: memref<1x64xf32, #tpu.memory_space<vmem>>, %arg18: memref<1x64xf32, #tpu.memory_space<vmem>>, %arg19: memref<64x1xf32, #tpu.memory_space<vmem>>, %arg20: memref<1x1xf32, #tpu.memory_space<vmem>>, %arg21: memref<8x2x1xf32, #tpu.memory_space<vmem>>, %arg22: memref<8x2x128xf32, #tpu.memory_space<vmem>>, %arg23: memref<8x2x128xf32, #tpu.memory_space<vmem>>, %arg24: memref<8x2x32xf32, #tpu.memory_space<vmem>>, %arg25: memref<8x2x32xf32, #tpu.memory_space<vmem>>) attributes {dimension_semantics = [], scalar_prefetch = 0 : i64, scratch_operands = 4 : i64, tpu.core_type = #tpu.core_type<tc>} {
    %c0 = arith.constant 0 : index
    %c0_0 = arith.constant 0 : index
    %c0_1 = arith.constant 0 : index
    %0 = vector.load %arg0[%c0, %c0_0, %c0_1] : memref<8x2x1xf32, #tpu.memory_space<vmem>>, vector<8x2x1xf32>
    %c0_2 = arith.constant 0 : index
    %c0_3 = arith.constant 0 : index
    %1 = vector.load %arg1[%c0_2, %c0_3] : memref<1x128xf32, #tpu.memory_space<vmem>>, vector<1x128xf32>
    %2 = vector.shape_cast %1 : vector<1x128xf32> to vector<1x1x128xf32>
    %3 = vector.broadcast %0 : vector<8x2x1xf32> to vector<8x2x128xf32>
    %4 = vector.broadcast %2 : vector<1x1x128xf32> to vector<8x2x128xf32>
    %5 = arith.mulf %3, %4 : vector<8x2x128xf32>
    %c0_4 = arith.constant 0 : index
    %c0_5 = arith.constant 0 : index
    %6 = vector.load %arg3[%c0_4, %c0_5] : memref<1x128xf32, #tpu.memory_space<vmem>>, vector<1x128xf32>
    %7 = vector.shape_cast %6 : vector<1x128xf32> to vector<1x1x128xf32>
    %8 = vector.broadcast %7 : vector<1x1x128xf32> to vector<8x2x128xf32>
    %9 = arith.addf %5, %8 : vector<8x2x128xf32>
    %c0_6 = arith.constant 0 : index
    %c0_7 = arith.constant 0 : index
    %c0_8 = arith.constant 0 : index
    %10 = vector.load %arg22[%c0_6, %c0_7, %c0_8] : memref<8x2x128xf32, #tpu.memory_space<vmem>>, vector<8x2x128xf32>
    tpu.vector_store %arg22[%c0_6, %c0_7, %c0_8], %9 {strides = array<i32>} : memref<8x2x128xf32, #tpu.memory_space<vmem>>, vector<8x2x128xf32>,
    %c0_9 = arith.constant 0 : index
    %c0_10 = arith.constant 0 : index
    %11 = vector.load %arg4[%c0_9, %c0_10] : memref<1x128xf32, #tpu.memory_space<vmem>>, vector<1x128xf32>
    %12 = vector.shape_cast %11 : vector<1x128xf32> to vector<1x1x128xf32>
    %13 = vector.broadcast %0 : vector<8x2x1xf32> to vector<8x2x128xf32>
    %14 = vector.broadcast %12 : vector<1x1x128xf32> to vector<8x2x128xf32>
    %15 = arith.mulf %13, %14 : vector<8x2x128xf32>
    %c0_11 = arith.constant 0 : index
    %c0_12 = arith.constant 0 : index
    %16 = vector.load %arg6[%c0_11, %c0_12] : memref<1x128xf32, #tpu.memory_space<vmem>>, vector<1x128xf32>
    %17 = vector.shape_cast %16 : vector<1x128xf32> to vector<1x1x128xf32>
    %18 = vector.broadcast %17 : vector<1x1x128xf32> to vector<8x2x128xf32>
    %19 = arith.addf %15, %18 : vector<8x2x128xf32>
    %c0_13 = arith.constant 0 : index
    %c0_14 = arith.constant 0 : index
    %c0_15 = arith.constant 0 : index
    %20 = vector.load %arg23[%c0_13, %c0_14, %c0_15] : memref<8x2x128xf32, #tpu.memory_space<vmem>>, vector<8x2x128xf32>
    tpu.vector_store %arg23[%c0_13, %c0_14, %c0_15], %19 {strides = array<i32>} : memref<8x2x128xf32, #tpu.memory_space<vmem>>, vector<8x2x128xf32>,
    %c0_16 = arith.constant 0 : index
    %c0_17 = arith.constant 0 : index
    %21 = vector.load %arg2[%c0_16, %c0_17] : memref<32x128xf32, #tpu.memory_space<vmem>>, vector<32x128xf32>
    %c0_18 = arith.constant 0 : index
    %c0_19 = arith.constant 0 : index
    %22 = vector.load %arg5[%c0_18, %c0_19] : memref<32x128xf32, #tpu.memory_space<vmem>>, vector<32x128xf32>
    %23 = tpu.iota {dimensions = array<i32: 1>} : vector<2x128xi32>
    %c64_i32 = arith.constant 64 : i32
    %24 = vector.broadcast %c64_i32 : i32 to vector<2x128xi32>
    %25 = arith.cmpi sge, %23, %24 : vector<2x128xi32>
    %c96_i32 = arith.constant 96 : i32
    %26 = vector.broadcast %c96_i32 : i32 to vector<2x128xi32>
    %27 = arith.cmpi slt, %23, %26 : vector<2x128xi32>
    %28 = arith.andi %25, %27 : vector<2x128xi1>
    %cst = arith.constant 0.000000e+00 : f32
    %29 = vector.broadcast %cst : f32 to vector<2x32xf32>
    %c0_i32 = arith.constant 0 : i32
    %c7_i32 = arith.constant 7 : i32
    %30 = arith.subi %c7_i32, %c0_i32 : i32
    %31 = arith.index_cast %c0_i32 : i32 to index
    %c0_20 = arith.constant 0 : index
    %c0_21 = arith.constant 0 : index
    %32 = vector.load %arg22[%31, %c0_20, %c0_21] : memref<8x2x128xf32, #tpu.memory_space<vmem>>, vector<1x2x128xf32>
    %33 = vector.shape_cast %32 : vector<1x2x128xf32> to vector<2x128xf32>
    %cst_22 = arith.constant dense<0.000000e+00> : vector<2x128xf32>
    %34 = tpu.matmul %29, %21, %cst_22 {dimension_numbers = #tpu.dot_dimension_numbers<[1], [0], [0], [1], [0, 0, 1, 1], [], []>} : vector<2x32xf32>, vector<32x128xf32>, vector<2x128xf32> -> vector<2x128xf32>
    %35 = arith.addf %33, %34 : vector<2x128xf32>
    %36 = arith.index_cast %30 : i32 to index
    %c0_23 = arith.constant 0 : index
    %c0_24 = arith.constant 0 : index
    %37 = vector.load %arg23[%36, %c0_23, %c0_24] : memref<8x2x128xf32, #tpu.memory_space<vmem>>, vector<1x2x128xf32>
    %38 = vector.shape_cast %37 : vector<1x2x128xf32> to vector<2x128xf32>
    %cst_25 = arith.constant dense<0.000000e+00> : vector<2x128xf32>
    %39 = tpu.matmul %29, %22, %cst_25 {dimension_numbers = #tpu.dot_dimension_numbers<[1], [0], [0], [1], [0, 0, 1, 1], [], []>} : vector<2x32xf32>, vector<32x128xf32>, vector<2x128xf32> -> vector<2x128xf32>
    %40 = arith.addf %38, %39 : vector<2x128xf32>
    %41 = math.tanh %35 : vector<2x128xf32>
    %42 = arith.negf %35 : vector<2x128xf32>
    %43 = math.exp %42 : vector<2x128xf32>
    %cst_26 = arith.constant 1.000000e+00 : f32
    %44 = vector.broadcast %cst_26 : f32 to vector<2x128xf32>
    %45 = arith.addf %44, %43 : vector<2x128xf32>
    %46 = arith.divf %44, %45 : vector<2x128xf32>
    %47 = arith.select %28, %41, %46 : vector<2x128xi1>, vector<2x128xf32>
    %48 = vector.extract_strided_slice %47 {offsets = [0, 0], sizes = [2, 32], strides = [1, 1]} : vector<2x128xf32> to vector<2x32xf32>
    %49 = vector.extract_strided_slice %47 {offsets = [0, 32], sizes = [2, 32], strides = [1, 1]} : vector<2x128xf32> to vector<2x32xf32>
    %50 = vector.extract_strided_slice %47 {offsets = [0, 64], sizes = [2, 32], strides = [1, 1]} : vector<2x128xf32> to vector<2x32xf32>
    %51 = vector.extract_strided_slice %47 {offsets = [0, 96], sizes = [2, 32], strides = [1, 1]} : vector<2x128xf32> to vector<2x32xf32>
    %52 = arith.mulf %49, %29 : vector<2x32xf32>
    %53 = arith.mulf %48, %50 : vector<2x32xf32>
    %54 = arith.addf %52, %53 : vector<2x32xf32>
    %55 = math.tanh %54 : vector<2x32xf32>
    %56 = arith.mulf %51, %55 : vector<2x32xf32>
    %57 = math.tanh %40 : vector<2x128xf32>
    %58 = arith.negf %40 : vector<2x128xf32>
    %59 = math.exp %58 : vector<2x128xf32>
    %cst_27 = arith.constant 1.000000e+00 : f32
    %60 = vector.broadcast %cst_27 : f32 to vector<2x128xf32>
    %61 = arith.addf %60, %59 : vector<2x128xf32>
    %62 = arith.divf %60, %61 : vector<2x128xf32>
    %63 = arith.select %28, %57, %62 : vector<2x128xi1>, vector<2x128xf32>
    %64 = vector.extract_strided_slice %63 {offsets = [0, 0], sizes = [2, 32], strides = [1, 1]} : vector<2x128xf32> to vector<2x32xf32>
    %65 = vector.extract_strided_slice %63 {offsets = [0, 32], sizes = [2, 32], strides = [1, 1]} : vector<2x128xf32> to vector<2x32xf32>
    %66 = vector.extract_strided_slice %63 {offsets = [0, 64], sizes = [2, 32], strides = [1, 1]} : vector<2x128xf32> to vector<2x32xf32>
    %67 = vector.extract_strided_slice %63 {offsets = [0, 96], sizes = [2, 32], strides = [1, 1]} : vector<2x128xf32> to vector<2x32xf32>
    %68 = arith.mulf %65, %29 : vector<2x32xf32>
    %69 = arith.mulf %64, %66 : vector<2x32xf32>
    %70 = arith.addf %68, %69 : vector<2x32xf32>
    %71 = math.tanh %70 : vector<2x32xf32>
    %72 = arith.mulf %67, %71 : vector<2x32xf32>
    %73 = arith.index_cast %c0_i32 : i32 to index
    %c0_28 = arith.constant 0 : index
    %c0_29 = arith.constant 0 : index
    %74 = vector.load %arg24[%73, %c0_28, %c0_29] : memref<8x2x32xf32, #tpu.memory_space<vmem>>, vector<1x2x32xf32>
    %75 = vector.shape_cast %74 : vector<1x2x32xf32> to vector<2x32xf32>
    %76 = vector.shape_cast %56 : vector<2x32xf32> to vector<1x2x32xf32>
    tpu.vector_store %arg24[%73, %c0_28, %c0_29], %76 {strides = array<i32>} : memref<8x2x32xf32, #tpu.memory_space<vmem>>, vector<1x2x32xf32>,
    %77 = arith.index_cast %30 : i32 to index
    %c0_30 = arith.constant 0 : index
    %c0_31 = arith.constant 0 : index
    %78 = vector.load %arg25[%77, %c0_30, %c0_31] : memref<8x2x32xf32, #tpu.memory_space<vmem>>, vector<1x2x32xf32>
    %79 = vector.shape_cast %78 : vector<1x2x32xf32> to vector<2x32xf32>
    %80 = vector.shape_cast %72 : vector<2x32xf32> to vector<1x2x32xf32>
    tpu.vector_store %arg25[%77, %c0_30, %c0_31], %80 {strides = array<i32>} : memref<8x2x32xf32, #tpu.memory_space<vmem>>, vector<1x2x32xf32>,
    %c1_i32 = arith.constant 1 : i32
    %c7_i32_32 = arith.constant 7 : i32
    %81 = arith.subi %c7_i32_32, %c1_i32 : i32
    %82 = arith.index_cast %c1_i32 : i32 to index
    %c0_33 = arith.constant 0 : index
    %c0_34 = arith.constant 0 : index
    %83 = vector.load %arg22[%82, %c0_33, %c0_34] : memref<8x2x128xf32, #tpu.memory_space<vmem>>, vector<1x2x128xf32>
    %84 = vector.shape_cast %83 : vector<1x2x128xf32> to vector<2x128xf32>
    %cst_35 = arith.constant dense<0.000000e+00> : vector<2x128xf32>
    %85 = tpu.matmul %56, %21, %cst_35 {dimension_numbers = #tpu.dot_dimension_numbers<[1], [0], [0], [1], [0, 0, 1, 1], [], []>} : vector<2x32xf32>, vector<32x128xf32>, vector<2x128xf32> -> vector<2x128xf32>
    %86 = arith.addf %84, %85 : vector<2x128xf32>
    %87 = arith.index_cast %81 : i32 to index
    %c0_36 = arith.constant 0 : index
    %c0_37 = arith.constant 0 : index
    %88 = vector.load %arg23[%87, %c0_36, %c0_37] : memref<8x2x128xf32, #tpu.memory_space<vmem>>, vector<1x2x128xf32>
    %89 = vector.shape_cast %88 : vector<1x2x128xf32> to vector<2x128xf32>
    %cst_38 = arith.constant dense<0.000000e+00> : vector<2x128xf32>
    %90 = tpu.matmul %72, %22, %cst_38 {dimension_numbers = #tpu.dot_dimension_numbers<[1], [0], [0], [1], [0, 0, 1, 1], [], []>} : vector<2x32xf32>, vector<32x128xf32>, vector<2x128xf32> -> vector<2x128xf32>
    %91 = arith.addf %89, %90 : vector<2x128xf32>
    %92 = math.tanh %86 : vector<2x128xf32>
    %93 = arith.negf %86 : vector<2x128xf32>
    %94 = math.exp %93 : vector<2x128xf32>
    %cst_39 = arith.constant 1.000000e+00 : f32
    %95 = vector.broadcast %cst_39 : f32 to vector<2x128xf32>
    %96 = arith.addf %95, %94 : vector<2x128xf32>
    %97 = arith.divf %95, %96 : vector<2x128xf32>
    %98 = arith.select %28, %92, %97 : vector<2x128xi1>, vector<2x128xf32>
    %99 = vector.extract_strided_slice %98 {offsets = [0, 0], sizes = [2, 32], strides = [1, 1]} : vector<2x128xf32> to vector<2x32xf32>
    %100 = vector.extract_strided_slice %98 {offsets = [0, 32], sizes = [2, 32], strides = [1, 1]} : vector<2x128xf32> to vector<2x32xf32>
    %101 = vector.extract_strided_slice %98 {offsets = [0, 64], sizes = [2, 32], strides = [1, 1]} : vector<2x128xf32> to vector<2x32xf32>
    %102 = vector.extract_strided_slice %98 {offsets = [0, 96], sizes = [2, 32], strides = [1, 1]} : vector<2x128xf32> to vector<2x32xf32>
    %103 = arith.mulf %100, %54 : vector<2x32xf32>
    %104 = arith.mulf %99, %101 : vector<2x32xf32>
    %105 = arith.addf %103, %104 : vector<2x32xf32>
    %106 = math.tanh %105 : vector<2x32xf32>
    %107 = arith.mulf %102, %106 : vector<2x32xf32>
    %108 = math.tanh %91 : vector<2x128xf32>
    %109 = arith.negf %91 : vector<2x128xf32>
    %110 = math.exp %109 : vector<2x128xf32>
    %cst_40 = arith.constant 1.000000e+00 : f32
    %111 = vector.broadcast %cst_40 : f32 to vector<2x128xf32>
    %112 = arith.addf %111, %110 : vector<2x128xf32>
    %113 = arith.divf %111, %112 : vector<2x128xf32>
    %114 = arith.select %28, %108, %113 : vector<2x128xi1>, vector<2x128xf32>
    %115 = vector.extract_strided_slice %114 {offsets = [0, 0], sizes = [2, 32], strides = [1, 1]} : vector<2x128xf32> to vector<2x32xf32>
    %116 = vector.extract_strided_slice %114 {offsets = [0, 32], sizes = [2, 32], strides = [1, 1]} : vector<2x128xf32> to vector<2x32xf32>
    %117 = vector.extract_strided_slice %114 {offsets = [0, 64], sizes = [2, 32], strides = [1, 1]} : vector<2x128xf32> to vector<2x32xf32>
    %118 = vector.extract_strided_slice %114 {offsets = [0, 96], sizes = [2, 32], strides = [1, 1]} : vector<2x128xf32> to vector<2x32xf32>
    %119 = arith.mulf %116, %70 : vector<2x32xf32>
    %120 = arith.mulf %115, %117 : vector<2x32xf32>
    %121 = arith.addf %119, %120 : vector<2x32xf32>
    %122 = math.tanh %121 : vector<2x32xf32>
    %123 = arith.mulf %118, %122 : vector<2x32xf32>
    %124 = arith.index_cast %c1_i32 : i32 to index
    %c0_41 = arith.constant 0 : index
    %c0_42 = arith.constant 0 : index
    %125 = vector.load %arg24[%124, %c0_41, %c0_42] : memref<8x2x32xf32, #tpu.memory_space<vmem>>, vector<1x2x32xf32>
    %126 = vector.shape_cast %125 : vector<1x2x32xf32> to vector<2x32xf32>
    %127 = vector.shape_cast %107 : vector<2x32xf32> to vector<1x2x32xf32>
    tpu.vector_store %arg24[%124, %c0_41, %c0_42], %127 {strides = array<i32>} : memref<8x2x32xf32, #tpu.memory_space<vmem>>, vector<1x2x32xf32>,
    %128 = arith.index_cast %81 : i32 to index
    %c0_43 = arith.constant 0 : index
    %c0_44 = arith.constant 0 : index
    %129 = vector.load %arg25[%128, %c0_43, %c0_44] : memref<8x2x32xf32, #tpu.memory_space<vmem>>, vector<1x2x32xf32>
    %130 = vector.shape_cast %129 : vector<1x2x32xf32> to vector<2x32xf32>
    %131 = vector.shape_cast %123 : vector<2x32xf32> to vector<1x2x32xf32>
    tpu.vector_store %arg25[%128, %c0_43, %c0_44], %131 {strides = array<i32>} : memref<8x2x32xf32, #tpu.memory_space<vmem>>, vector<1x2x32xf32>,
    %c2_i32 = arith.constant 2 : i32
    %c7_i32_45 = arith.constant 7 : i32
    %132 = arith.subi %c7_i32_45, %c2_i32 : i32
    %133 = arith.index_cast %c2_i32 : i32 to index
    %c0_46 = arith.constant 0 : index
    %c0_47 = arith.constant 0 : index
    %134 = vector.load %arg22[%133, %c0_46, %c0_47] : memref<8x2x128xf32, #tpu.memory_space<vmem>>, vector<1x2x128xf32>
    %135 = vector.shape_cast %134 : vector<1x2x128xf32> to vector<2x128xf32>
    %cst_48 = arith.constant dense<0.000000e+00> : vector<2x128xf32>
    %136 = tpu.matmul %107, %21, %cst_48 {dimension_numbers = #tpu.dot_dimension_numbers<[1], [0], [0], [1], [0, 0, 1, 1], [], []>} : vector<2x32xf32>, vector<32x128xf32>, vector<2x128xf32> -> vector<2x128xf32>
    %137 = arith.addf %135, %136 : vector<2x128xf32>
    %138 = arith.index_cast %132 : i32 to index
    %c0_49 = arith.constant 0 : index
    %c0_50 = arith.constant 0 : index
    %139 = vector.load %arg23[%138, %c0_49, %c0_50] : memref<8x2x128xf32, #tpu.memory_space<vmem>>, vector<1x2x128xf32>
    %140 = vector.shape_cast %139 : vector<1x2x128xf32> to vector<2x128xf32>
    %cst_51 = arith.constant dense<0.000000e+00> : vector<2x128xf32>
    %141 = tpu.matmul %123, %22, %cst_51 {dimension_numbers = #tpu.dot_dimension_numbers<[1], [0], [0], [1], [0, 0, 1, 1], [], []>} : vector<2x32xf32>, vector<32x128xf32>, vector<2x128xf32> -> vector<2x128xf32>
    %142 = arith.addf %140, %141 : vector<2x128xf32>
    %143 = math.tanh %137 : vector<2x128xf32>
    %144 = arith.negf %137 : vector<2x128xf32>
    %145 = math.exp %144 : vector<2x128xf32>
    %cst_52 = arith.constant 1.000000e+00 : f32
    %146 = vector.broadcast %cst_52 : f32 to vector<2x128xf32>
    %147 = arith.addf %146, %145 : vector<2x128xf32>
    %148 = arith.divf %146, %147 : vector<2x128xf32>
    %149 = arith.select %28, %143, %148 : vector<2x128xi1>, vector<2x128xf32>
    %150 = vector.extract_strided_slice %149 {offsets = [0, 0], sizes = [2, 32], strides = [1, 1]} : vector<2x128xf32> to vector<2x32xf32>
    %151 = vector.extract_strided_slice %149 {offsets = [0, 32], sizes = [2, 32], strides = [1, 1]} : vector<2x128xf32> to vector<2x32xf32>
    %152 = vector.extract_strided_slice %149 {offsets = [0, 64], sizes = [2, 32], strides = [1, 1]} : vector<2x128xf32> to vector<2x32xf32>
    %153 = vector.extract_strided_slice %149 {offsets = [0, 96], sizes = [2, 32], strides = [1, 1]} : vector<2x128xf32> to vector<2x32xf32>
    %154 = arith.mulf %151, %105 : vector<2x32xf32>
    %155 = arith.mulf %150, %152 : vector<2x32xf32>
    %156 = arith.addf %154, %155 : vector<2x32xf32>
    %157 = math.tanh %156 : vector<2x32xf32>
    %158 = arith.mulf %153, %157 : vector<2x32xf32>
    %159 = math.tanh %142 : vector<2x128xf32>
    %160 = arith.negf %142 : vector<2x128xf32>
    %161 = math.exp %160 : vector<2x128xf32>
    %cst_53 = arith.constant 1.000000e+00 : f32
    %162 = vector.broadcast %cst_53 : f32 to vector<2x128xf32>
    %163 = arith.addf %162, %161 : vector<2x128xf32>
    %164 = arith.divf %162, %163 : vector<2x128xf32>
    %165 = arith.select %28, %159, %164 : vector<2x128xi1>, vector<2x128xf32>
    %166 = vector.extract_strided_slice %165 {offsets = [0, 0], sizes = [2, 32], strides = [1, 1]} : vector<2x128xf32> to vector<2x32xf32>
    %167 = vector.extract_strided_slice %165 {offsets = [0, 32], sizes = [2, 32], strides = [1, 1]} : vector<2x128xf32> to vector<2x32xf32>
    %168 = vector.extract_strided_slice %165 {offsets = [0, 64], sizes = [2, 32], strides = [1, 1]} : vector<2x128xf32> to vector<2x32xf32>
    %169 = vector.extract_strided_slice %165 {offsets = [0, 96], sizes = [2, 32], strides = [1, 1]} : vector<2x128xf32> to vector<2x32xf32>
    %170 = arith.mulf %167, %121 : vector<2x32xf32>
    %171 = arith.mulf %166, %168 : vector<2x32xf32>
    %172 = arith.addf %170, %171 : vector<2x32xf32>
    %173 = math.tanh %172 : vector<2x32xf32>
    %174 = arith.mulf %169, %173 : vector<2x32xf32>
    %175 = arith.index_cast %c2_i32 : i32 to index
    %c0_54 = arith.constant 0 : index
    %c0_55 = arith.constant 0 : index
    %176 = vector.load %arg24[%175, %c0_54, %c0_55] : memref<8x2x32xf32, #tpu.memory_space<vmem>>, vector<1x2x32xf32>
    %177 = vector.shape_cast %176 : vector<1x2x32xf32> to vector<2x32xf32>
    %178 = vector.shape_cast %158 : vector<2x32xf32> to vector<1x2x32xf32>
    tpu.vector_store %arg24[%175, %c0_54, %c0_55], %178 {strides = array<i32>} : memref<8x2x32xf32, #tpu.memory_space<vmem>>, vector<1x2x32xf32>,
    %179 = arith.index_cast %132 : i32 to index
    %c0_56 = arith.constant 0 : index
    %c0_57 = arith.constant 0 : index
    %180 = vector.load %arg25[%179, %c0_56, %c0_57] : memref<8x2x32xf32, #tpu.memory_space<vmem>>, vector<1x2x32xf32>
    %181 = vector.shape_cast %180 : vector<1x2x32xf32> to vector<2x32xf32>
    %182 = vector.shape_cast %174 : vector<2x32xf32> to vector<1x2x32xf32>
    tpu.vector_store %arg25[%179, %c0_56, %c0_57], %182 {strides = array<i32>} : memref<8x2x32xf32, #tpu.memory_space<vmem>>, vector<1x2x32xf32>,
    %c3_i32 = arith.constant 3 : i32
    %c7_i32_58 = arith.constant 7 : i32
    %183 = arith.subi %c7_i32_58, %c3_i32 : i32
    %184 = arith.index_cast %c3_i32 : i32 to index
    %c0_59 = arith.constant 0 : index
    %c0_60 = arith.constant 0 : index
    %185 = vector.load %arg22[%184, %c0_59, %c0_60] : memref<8x2x128xf32, #tpu.memory_space<vmem>>, vector<1x2x128xf32>
    %186 = vector.shape_cast %185 : vector<1x2x128xf32> to vector<2x128xf32>
    %cst_61 = arith.constant dense<0.000000e+00> : vector<2x128xf32>
    %187 = tpu.matmul %158, %21, %cst_61 {dimension_numbers = #tpu.dot_dimension_numbers<[1], [0], [0], [1], [0, 0, 1, 1], [], []>} : vector<2x32xf32>, vector<32x128xf32>, vector<2x128xf32> -> vector<2x128xf32>
    %188 = arith.addf %186, %187 : vector<2x128xf32>
    %189 = arith.index_cast %183 : i32 to index
    %c0_62 = arith.constant 0 : index
    %c0_63 = arith.constant 0 : index
    %190 = vector.load %arg23[%189, %c0_62, %c0_63] : memref<8x2x128xf32, #tpu.memory_space<vmem>>, vector<1x2x128xf32>
    %191 = vector.shape_cast %190 : vector<1x2x128xf32> to vector<2x128xf32>
    %cst_64 = arith.constant dense<0.000000e+00> : vector<2x128xf32>
    %192 = tpu.matmul %174, %22, %cst_64 {dimension_numbers = #tpu.dot_dimension_numbers<[1], [0], [0], [1], [0, 0, 1, 1], [], []>} : vector<2x32xf32>, vector<32x128xf32>, vector<2x128xf32> -> vector<2x128xf32>
    %193 = arith.addf %191, %192 : vector<2x128xf32>
    %194 = math.tanh %188 : vector<2x128xf32>
    %195 = arith.negf %188 : vector<2x128xf32>
    %196 = math.exp %195 : vector<2x128xf32>
    %cst_65 = arith.constant 1.000000e+00 : f32
    %197 = vector.broadcast %cst_65 : f32 to vector<2x128xf32>
    %198 = arith.addf %197, %196 : vector<2x128xf32>
    %199 = arith.divf %197, %198 : vector<2x128xf32>
    %200 = arith.select %28, %194, %199 : vector<2x128xi1>, vector<2x128xf32>
    %201 = vector.extract_strided_slice %200 {offsets = [0, 0], sizes = [2, 32], strides = [1, 1]} : vector<2x128xf32> to vector<2x32xf32>
    %202 = vector.extract_strided_slice %200 {offsets = [0, 32], sizes = [2, 32], strides = [1, 1]} : vector<2x128xf32> to vector<2x32xf32>
    %203 = vector.extract_strided_slice %200 {offsets = [0, 64], sizes = [2, 32], strides = [1, 1]} : vector<2x128xf32> to vector<2x32xf32>
    %204 = vector.extract_strided_slice %200 {offsets = [0, 96], sizes = [2, 32], strides = [1, 1]} : vector<2x128xf32> to vector<2x32xf32>
    %205 = arith.mulf %202, %156 : vector<2x32xf32>
    %206 = arith.mulf %201, %203 : vector<2x32xf32>
    %207 = arith.addf %205, %206 : vector<2x32xf32>
    %208 = math.tanh %207 : vector<2x32xf32>
    %209 = arith.mulf %204, %208 : vector<2x32xf32>
    %210 = math.tanh %193 : vector<2x128xf32>
    %211 = arith.negf %193 : vector<2x128xf32>
    %212 = math.exp %211 : vector<2x128xf32>
    %cst_66 = arith.constant 1.000000e+00 : f32
    %213 = vector.broadcast %cst_66 : f32 to vector<2x128xf32>
    %214 = arith.addf %213, %212 : vector<2x128xf32>
    %215 = arith.divf %213, %214 : vector<2x128xf32>
    %216 = arith.select %28, %210, %215 : vector<2x128xi1>, vector<2x128xf32>
    %217 = vector.extract_strided_slice %216 {offsets = [0, 0], sizes = [2, 32], strides = [1, 1]} : vector<2x128xf32> to vector<2x32xf32>
    %218 = vector.extract_strided_slice %216 {offsets = [0, 32], sizes = [2, 32], strides = [1, 1]} : vector<2x128xf32> to vector<2x32xf32>
    %219 = vector.extract_strided_slice %216 {offsets = [0, 64], sizes = [2, 32], strides = [1, 1]} : vector<2x128xf32> to vector<2x32xf32>
    %220 = vector.extract_strided_slice %216 {offsets = [0, 96], sizes = [2, 32], strides = [1, 1]} : vector<2x128xf32> to vector<2x32xf32>
    %221 = arith.mulf %218, %172 : vector<2x32xf32>
    %222 = arith.mulf %217, %219 : vector<2x32xf32>
    %223 = arith.addf %221, %222 : vector<2x32xf32>
    %224 = math.tanh %223 : vector<2x32xf32>
    %225 = arith.mulf %220, %224 : vector<2x32xf32>
    %226 = arith.index_cast %c3_i32 : i32 to index
    %c0_67 = arith.constant 0 : index
    %c0_68 = arith.constant 0 : index
    %227 = vector.load %arg24[%226, %c0_67, %c0_68] : memref<8x2x32xf32, #tpu.memory_space<vmem>>, vector<1x2x32xf32>
    %228 = vector.shape_cast %227 : vector<1x2x32xf32> to vector<2x32xf32>
    %229 = vector.shape_cast %209 : vector<2x32xf32> to vector<1x2x32xf32>
    tpu.vector_store %arg24[%226, %c0_67, %c0_68], %229 {strides = array<i32>} : memref<8x2x32xf32, #tpu.memory_space<vmem>>, vector<1x2x32xf32>,
    %230 = arith.index_cast %183 : i32 to index
    %c0_69 = arith.constant 0 : index
    %c0_70 = arith.constant 0 : index
    %231 = vector.load %arg25[%230, %c0_69, %c0_70] : memref<8x2x32xf32, #tpu.memory_space<vmem>>, vector<1x2x32xf32>
    %232 = vector.shape_cast %231 : vector<1x2x32xf32> to vector<2x32xf32>
    %233 = vector.shape_cast %225 : vector<2x32xf32> to vector<1x2x32xf32>
    tpu.vector_store %arg25[%230, %c0_69, %c0_70], %233 {strides = array<i32>} : memref<8x2x32xf32, #tpu.memory_space<vmem>>, vector<1x2x32xf32>,
    %c4_i32 = arith.constant 4 : i32
    %c7_i32_71 = arith.constant 7 : i32
    %234 = arith.subi %c7_i32_71, %c4_i32 : i32
    %235 = arith.index_cast %c4_i32 : i32 to index
    %c0_72 = arith.constant 0 : index
    %c0_73 = arith.constant 0 : index
    %236 = vector.load %arg22[%235, %c0_72, %c0_73] : memref<8x2x128xf32, #tpu.memory_space<vmem>>, vector<1x2x128xf32>
    %237 = vector.shape_cast %236 : vector<1x2x128xf32> to vector<2x128xf32>
    %cst_74 = arith.constant dense<0.000000e+00> : vector<2x128xf32>
    %238 = tpu.matmul %209, %21, %cst_74 {dimension_numbers = #tpu.dot_dimension_numbers<[1], [0], [0], [1], [0, 0, 1, 1], [], []>} : vector<2x32xf32>, vector<32x128xf32>, vector<2x128xf32> -> vector<2x128xf32>
    %239 = arith.addf %237, %238 : vector<2x128xf32>
    %240 = arith.index_cast %234 : i32 to index
    %c0_75 = arith.constant 0 : index
    %c0_76 = arith.constant 0 : index
    %241 = vector.load %arg23[%240, %c0_75, %c0_76] : memref<8x2x128xf32, #tpu.memory_space<vmem>>, vector<1x2x128xf32>
    %242 = vector.shape_cast %241 : vector<1x2x128xf32> to vector<2x128xf32>
    %cst_77 = arith.constant dense<0.000000e+00> : vector<2x128xf32>
    %243 = tpu.matmul %225, %22, %cst_77 {dimension_numbers = #tpu.dot_dimension_numbers<[1], [0], [0], [1], [0, 0, 1, 1], [], []>} : vector<2x32xf32>, vector<32x128xf32>, vector<2x128xf32> -> vector<2x128xf32>
    %244 = arith.addf %242, %243 : vector<2x128xf32>
    %245 = math.tanh %239 : vector<2x128xf32>
    %246 = arith.negf %239 : vector<2x128xf32>
    %247 = math.exp %246 : vector<2x128xf32>
    %cst_78 = arith.constant 1.000000e+00 : f32
    %248 = vector.broadcast %cst_78 : f32 to vector<2x128xf32>
    %249 = arith.addf %248, %247 : vector<2x128xf32>
    %250 = arith.divf %248, %249 : vector<2x128xf32>
    %251 = arith.select %28, %245, %250 : vector<2x128xi1>, vector<2x128xf32>
    %252 = vector.extract_strided_slice %251 {offsets = [0, 0], sizes = [2, 32], strides = [1, 1]} : vector<2x128xf32> to vector<2x32xf32>
    %253 = vector.extract_strided_slice %251 {offsets = [0, 32], sizes = [2, 32], strides = [1, 1]} : vector<2x128xf32> to vector<2x32xf32>
    %254 = vector.extract_strided_slice %251 {offsets = [0, 64], sizes = [2, 32], strides = [1, 1]} : vector<2x128xf32> to vector<2x32xf32>
    %255 = vector.extract_strided_slice %251 {offsets = [0, 96], sizes = [2, 32], strides = [1, 1]} : vector<2x128xf32> to vector<2x32xf32>
    %256 = arith.mulf %253, %207 : vector<2x32xf32>
    %257 = arith.mulf %252, %254 : vector<2x32xf32>
    %258 = arith.addf %256, %257 : vector<2x32xf32>
    %259 = math.tanh %258 : vector<2x32xf32>
    %260 = arith.mulf %255, %259 : vector<2x32xf32>
    %261 = math.tanh %244 : vector<2x128xf32>
    %262 = arith.negf %244 : vector<2x128xf32>
    %263 = math.exp %262 : vector<2x128xf32>
    %cst_79 = arith.constant 1.000000e+00 : f32
    %264 = vector.broadcast %cst_79 : f32 to vector<2x128xf32>
    %265 = arith.addf %264, %263 : vector<2x128xf32>
    %266 = arith.divf %264, %265 : vector<2x128xf32>
    %267 = arith.select %28, %261, %266 : vector<2x128xi1>, vector<2x128xf32>
    %268 = vector.extract_strided_slice %267 {offsets = [0, 0], sizes = [2, 32], strides = [1, 1]} : vector<2x128xf32> to vector<2x32xf32>
    %269 = vector.extract_strided_slice %267 {offsets = [0, 32], sizes = [2, 32], strides = [1, 1]} : vector<2x128xf32> to vector<2x32xf32>
    %270 = vector.extract_strided_slice %267 {offsets = [0, 64], sizes = [2, 32], strides = [1, 1]} : vector<2x128xf32> to vector<2x32xf32>
    %271 = vector.extract_strided_slice %267 {offsets = [0, 96], sizes = [2, 32], strides = [1, 1]} : vector<2x128xf32> to vector<2x32xf32>
    %272 = arith.mulf %269, %223 : vector<2x32xf32>
    %273 = arith.mulf %268, %270 : vector<2x32xf32>
    %274 = arith.addf %272, %273 : vector<2x32xf32>
    %275 = math.tanh %274 : vector<2x32xf32>
    %276 = arith.mulf %271, %275 : vector<2x32xf32>
    %277 = arith.index_cast %c4_i32 : i32 to index
    %c0_80 = arith.constant 0 : index
    %c0_81 = arith.constant 0 : index
    %278 = vector.load %arg24[%277, %c0_80, %c0_81] : memref<8x2x32xf32, #tpu.memory_space<vmem>>, vector<1x2x32xf32>
    %279 = vector.shape_cast %278 : vector<1x2x32xf32> to vector<2x32xf32>
    %280 = vector.shape_cast %260 : vector<2x32xf32> to vector<1x2x32xf32>
    tpu.vector_store %arg24[%277, %c0_80, %c0_81], %280 {strides = array<i32>} : memref<8x2x32xf32, #tpu.memory_space<vmem>>, vector<1x2x32xf32>,
    %281 = arith.index_cast %234 : i32 to index
    %c0_82 = arith.constant 0 : index
    %c0_83 = arith.constant 0 : index
    %282 = vector.load %arg25[%281, %c0_82, %c0_83] : memref<8x2x32xf32, #tpu.memory_space<vmem>>, vector<1x2x32xf32>
    %283 = vector.shape_cast %282 : vector<1x2x32xf32> to vector<2x32xf32>
    %284 = vector.shape_cast %276 : vector<2x32xf32> to vector<1x2x32xf32>
    tpu.vector_store %arg25[%281, %c0_82, %c0_83], %284 {strides = array<i32>} : memref<8x2x32xf32, #tpu.memory_space<vmem>>, vector<1x2x32xf32>,
    %c5_i32 = arith.constant 5 : i32
    %c7_i32_84 = arith.constant 7 : i32
    %285 = arith.subi %c7_i32_84, %c5_i32 : i32
    %286 = arith.index_cast %c5_i32 : i32 to index
    %c0_85 = arith.constant 0 : index
    %c0_86 = arith.constant 0 : index
    %287 = vector.load %arg22[%286, %c0_85, %c0_86] : memref<8x2x128xf32, #tpu.memory_space<vmem>>, vector<1x2x128xf32>
    %288 = vector.shape_cast %287 : vector<1x2x128xf32> to vector<2x128xf32>
    %cst_87 = arith.constant dense<0.000000e+00> : vector<2x128xf32>
    %289 = tpu.matmul %260, %21, %cst_87 {dimension_numbers = #tpu.dot_dimension_numbers<[1], [0], [0], [1], [0, 0, 1, 1], [], []>} : vector<2x32xf32>, vector<32x128xf32>, vector<2x128xf32> -> vector<2x128xf32>
    %290 = arith.addf %288, %289 : vector<2x128xf32>
    %291 = arith.index_cast %285 : i32 to index
    %c0_88 = arith.constant 0 : index
    %c0_89 = arith.constant 0 : index
    %292 = vector.load %arg23[%291, %c0_88, %c0_89] : memref<8x2x128xf32, #tpu.memory_space<vmem>>, vector<1x2x128xf32>
    %293 = vector.shape_cast %292 : vector<1x2x128xf32> to vector<2x128xf32>
    %cst_90 = arith.constant dense<0.000000e+00> : vector<2x128xf32>
    %294 = tpu.matmul %276, %22, %cst_90 {dimension_numbers = #tpu.dot_dimension_numbers<[1], [0], [0], [1], [0, 0, 1, 1], [], []>} : vector<2x32xf32>, vector<32x128xf32>, vector<2x128xf32> -> vector<2x128xf32>
    %295 = arith.addf %293, %294 : vector<2x128xf32>
    %296 = math.tanh %290 : vector<2x128xf32>
    %297 = arith.negf %290 : vector<2x128xf32>
    %298 = math.exp %297 : vector<2x128xf32>
    %cst_91 = arith.constant 1.000000e+00 : f32
    %299 = vector.broadcast %cst_91 : f32 to vector<2x128xf32>
    %300 = arith.addf %299, %298 : vector<2x128xf32>
    %301 = arith.divf %299, %300 : vector<2x128xf32>
    %302 = arith.select %28, %296, %301 : vector<2x128xi1>, vector<2x128xf32>
    %303 = vector.extract_strided_slice %302 {offsets = [0, 0], sizes = [2, 32], strides = [1, 1]} : vector<2x128xf32> to vector<2x32xf32>
    %304 = vector.extract_strided_slice %302 {offsets = [0, 32], sizes = [2, 32], strides = [1, 1]} : vector<2x128xf32> to vector<2x32xf32>
    %305 = vector.extract_strided_slice %302 {offsets = [0, 64], sizes = [2, 32], strides = [1, 1]} : vector<2x128xf32> to vector<2x32xf32>
    %306 = vector.extract_strided_slice %302 {offsets = [0, 96], sizes = [2, 32], strides = [1, 1]} : vector<2x128xf32> to vector<2x32xf32>
    %307 = arith.mulf %304, %258 : vector<2x32xf32>
    %308 = arith.mulf %303, %305 : vector<2x32xf32>
    %309 = arith.addf %307, %308 : vector<2x32xf32>
    %310 = math.tanh %309 : vector<2x32xf32>
    %311 = arith.mulf %306, %310 : vector<2x32xf32>
    %312 = math.tanh %295 : vector<2x128xf32>
    %313 = arith.negf %295 : vector<2x128xf32>
    %314 = math.exp %313 : vector<2x128xf32>
    %cst_92 = arith.constant 1.000000e+00 : f32
    %315 = vector.broadcast %cst_92 : f32 to vector<2x128xf32>
    %316 = arith.addf %315, %314 : vector<2x128xf32>
    %317 = arith.divf %315, %316 : vector<2x128xf32>
    %318 = arith.select %28, %312, %317 : vector<2x128xi1>, vector<2x128xf32>
    %319 = vector.extract_strided_slice %318 {offsets = [0, 0], sizes = [2, 32], strides = [1, 1]} : vector<2x128xf32> to vector<2x32xf32>
    %320 = vector.extract_strided_slice %318 {offsets = [0, 32], sizes = [2, 32], strides = [1, 1]} : vector<2x128xf32> to vector<2x32xf32>
    %321 = vector.extract_strided_slice %318 {offsets = [0, 64], sizes = [2, 32], strides = [1, 1]} : vector<2x128xf32> to vector<2x32xf32>
    %322 = vector.extract_strided_slice %318 {offsets = [0, 96], sizes = [2, 32], strides = [1, 1]} : vector<2x128xf32> to vector<2x32xf32>
    %323 = arith.mulf %320, %274 : vector<2x32xf32>
    %324 = arith.mulf %319, %321 : vector<2x32xf32>
    %325 = arith.addf %323, %324 : vector<2x32xf32>
    %326 = math.tanh %325 : vector<2x32xf32>
    %327 = arith.mulf %322, %326 : vector<2x32xf32>
    %328 = arith.index_cast %c5_i32 : i32 to index
    %c0_93 = arith.constant 0 : index
    %c0_94 = arith.constant 0 : index
    %329 = vector.load %arg24[%328, %c0_93, %c0_94] : memref<8x2x32xf32, #tpu.memory_space<vmem>>, vector<1x2x32xf32>
    %330 = vector.shape_cast %329 : vector<1x2x32xf32> to vector<2x32xf32>
    %331 = vector.shape_cast %311 : vector<2x32xf32> to vector<1x2x32xf32>
    tpu.vector_store %arg24[%328, %c0_93, %c0_94], %331 {strides = array<i32>} : memref<8x2x32xf32, #tpu.memory_space<vmem>>, vector<1x2x32xf32>,
    %332 = arith.index_cast %285 : i32 to index
    %c0_95 = arith.constant 0 : index
    %c0_96 = arith.constant 0 : index
    %333 = vector.load %arg25[%332, %c0_95, %c0_96] : memref<8x2x32xf32, #tpu.memory_space<vmem>>, vector<1x2x32xf32>
    %334 = vector.shape_cast %333 : vector<1x2x32xf32> to vector<2x32xf32>
    %335 = vector.shape_cast %327 : vector<2x32xf32> to vector<1x2x32xf32>
    tpu.vector_store %arg25[%332, %c0_95, %c0_96], %335 {strides = array<i32>} : memref<8x2x32xf32, #tpu.memory_space<vmem>>, vector<1x2x32xf32>,
    %c6_i32 = arith.constant 6 : i32
    %c7_i32_97 = arith.constant 7 : i32
    %336 = arith.subi %c7_i32_97, %c6_i32 : i32
    %337 = arith.index_cast %c6_i32 : i32 to index
    %c0_98 = arith.constant 0 : index
    %c0_99 = arith.constant 0 : index
    %338 = vector.load %arg22[%337, %c0_98, %c0_99] : memref<8x2x128xf32, #tpu.memory_space<vmem>>, vector<1x2x128xf32>
    %339 = vector.shape_cast %338 : vector<1x2x128xf32> to vector<2x128xf32>
    %cst_100 = arith.constant dense<0.000000e+00> : vector<2x128xf32>
    %340 = tpu.matmul %311, %21, %cst_100 {dimension_numbers = #tpu.dot_dimension_numbers<[1], [0], [0], [1], [0, 0, 1, 1], [], []>} : vector<2x32xf32>, vector<32x128xf32>, vector<2x128xf32> -> vector<2x128xf32>
    %341 = arith.addf %339, %340 : vector<2x128xf32>
    %342 = arith.index_cast %336 : i32 to index
    %c0_101 = arith.constant 0 : index
    %c0_102 = arith.constant 0 : index
    %343 = vector.load %arg23[%342, %c0_101, %c0_102] : memref<8x2x128xf32, #tpu.memory_space<vmem>>, vector<1x2x128xf32>
    %344 = vector.shape_cast %343 : vector<1x2x128xf32> to vector<2x128xf32>
    %cst_103 = arith.constant dense<0.000000e+00> : vector<2x128xf32>
    %345 = tpu.matmul %327, %22, %cst_103 {dimension_numbers = #tpu.dot_dimension_numbers<[1], [0], [0], [1], [0, 0, 1, 1], [], []>} : vector<2x32xf32>, vector<32x128xf32>, vector<2x128xf32> -> vector<2x128xf32>
    %346 = arith.addf %344, %345 : vector<2x128xf32>
    %347 = math.tanh %341 : vector<2x128xf32>
    %348 = arith.negf %341 : vector<2x128xf32>
    %349 = math.exp %348 : vector<2x128xf32>
    %cst_104 = arith.constant 1.000000e+00 : f32
    %350 = vector.broadcast %cst_104 : f32 to vector<2x128xf32>
    %351 = arith.addf %350, %349 : vector<2x128xf32>
    %352 = arith.divf %350, %351 : vector<2x128xf32>
    %353 = arith.select %28, %347, %352 : vector<2x128xi1>, vector<2x128xf32>
    %354 = vector.extract_strided_slice %353 {offsets = [0, 0], sizes = [2, 32], strides = [1, 1]} : vector<2x128xf32> to vector<2x32xf32>
    %355 = vector.extract_strided_slice %353 {offsets = [0, 32], sizes = [2, 32], strides = [1, 1]} : vector<2x128xf32> to vector<2x32xf32>
    %356 = vector.extract_strided_slice %353 {offsets = [0, 64], sizes = [2, 32], strides = [1, 1]} : vector<2x128xf32> to vector<2x32xf32>
    %357 = vector.extract_strided_slice %353 {offsets = [0, 96], sizes = [2, 32], strides = [1, 1]} : vector<2x128xf32> to vector<2x32xf32>
    %358 = arith.mulf %355, %309 : vector<2x32xf32>
    %359 = arith.mulf %354, %356 : vector<2x32xf32>
    %360 = arith.addf %358, %359 : vector<2x32xf32>
    %361 = math.tanh %360 : vector<2x32xf32>
    %362 = arith.mulf %357, %361 : vector<2x32xf32>
    %363 = math.tanh %346 : vector<2x128xf32>
    %364 = arith.negf %346 : vector<2x128xf32>
    %365 = math.exp %364 : vector<2x128xf32>
    %cst_105 = arith.constant 1.000000e+00 : f32
    %366 = vector.broadcast %cst_105 : f32 to vector<2x128xf32>
    %367 = arith.addf %366, %365 : vector<2x128xf32>
    %368 = arith.divf %366, %367 : vector<2x128xf32>
    %369 = arith.select %28, %363, %368 : vector<2x128xi1>, vector<2x128xf32>
    %370 = vector.extract_strided_slice %369 {offsets = [0, 0], sizes = [2, 32], strides = [1, 1]} : vector<2x128xf32> to vector<2x32xf32>
    %371 = vector.extract_strided_slice %369 {offsets = [0, 32], sizes = [2, 32], strides = [1, 1]} : vector<2x128xf32> to vector<2x32xf32>
    %372 = vector.extract_strided_slice %369 {offsets = [0, 64], sizes = [2, 32], strides = [1, 1]} : vector<2x128xf32> to vector<2x32xf32>
    %373 = vector.extract_strided_slice %369 {offsets = [0, 96], sizes = [2, 32], strides = [1, 1]} : vector<2x128xf32> to vector<2x32xf32>
    %374 = arith.mulf %371, %325 : vector<2x32xf32>
    %375 = arith.mulf %370, %372 : vector<2x32xf32>
    %376 = arith.addf %374, %375 : vector<2x32xf32>
    %377 = math.tanh %376 : vector<2x32xf32>
    %378 = arith.mulf %373, %377 : vector<2x32xf32>
    %379 = arith.index_cast %c6_i32 : i32 to index
    %c0_106 = arith.constant 0 : index
    %c0_107 = arith.constant 0 : index
    %380 = vector.load %arg24[%379, %c0_106, %c0_107] : memref<8x2x32xf32, #tpu.memory_space<vmem>>, vector<1x2x32xf32>
    %381 = vector.shape_cast %380 : vector<1x2x32xf32> to vector<2x32xf32>
    %382 = vector.shape_cast %362 : vector<2x32xf32> to vector<1x2x32xf32>
    tpu.vector_store %arg24[%379, %c0_106, %c0_107], %382 {strides = array<i32>} : memref<8x2x32xf32, #tpu.memory_space<vmem>>, vector<1x2x32xf32>,
    %383 = arith.index_cast %336 : i32 to index
    %c0_108 = arith.constant 0 : index
    %c0_109 = arith.constant 0 : index
    %384 = vector.load %arg25[%383, %c0_108, %c0_109] : memref<8x2x32xf32, #tpu.memory_space<vmem>>, vector<1x2x32xf32>
    %385 = vector.shape_cast %384 : vector<1x2x32xf32> to vector<2x32xf32>
    %386 = vector.shape_cast %378 : vector<2x32xf32> to vector<1x2x32xf32>
    tpu.vector_store %arg25[%383, %c0_108, %c0_109], %386 {strides = array<i32>} : memref<8x2x32xf32, #tpu.memory_space<vmem>>, vector<1x2x32xf32>,
    %c7_i32_110 = arith.constant 7 : i32
    %c7_i32_111 = arith.constant 7 : i32
    %387 = arith.subi %c7_i32_111, %c7_i32_110 : i32
    %388 = arith.index_cast %c7_i32_110 : i32 to index
    %c0_112 = arith.constant 0 : index
    %c0_113 = arith.constant 0 : index
    %389 = vector.load %arg22[%388, %c0_112, %c0_113] : memref<8x2x128xf32, #tpu.memory_space<vmem>>, vector<1x2x128xf32>
    %390 = vector.shape_cast %389 : vector<1x2x128xf32> to vector<2x128xf32>
    %cst_114 = arith.constant dense<0.000000e+00> : vector<2x128xf32>
    %391 = tpu.matmul %362, %21, %cst_114 {dimension_numbers = #tpu.dot_dimension_numbers<[1], [0], [0], [1], [0, 0, 1, 1], [], []>} : vector<2x32xf32>, vector<32x128xf32>, vector<2x128xf32> -> vector<2x128xf32>
    %392 = arith.addf %390, %391 : vector<2x128xf32>
    %393 = arith.index_cast %387 : i32 to index
    %c0_115 = arith.constant 0 : index
    %c0_116 = arith.constant 0 : index
    %394 = vector.load %arg23[%393, %c0_115, %c0_116] : memref<8x2x128xf32, #tpu.memory_space<vmem>>, vector<1x2x128xf32>
    %395 = vector.shape_cast %394 : vector<1x2x128xf32> to vector<2x128xf32>
    %cst_117 = arith.constant dense<0.000000e+00> : vector<2x128xf32>
    %396 = tpu.matmul %378, %22, %cst_117 {dimension_numbers = #tpu.dot_dimension_numbers<[1], [0], [0], [1], [0, 0, 1, 1], [], []>} : vector<2x32xf32>, vector<32x128xf32>, vector<2x128xf32> -> vector<2x128xf32>
    %397 = arith.addf %395, %396 : vector<2x128xf32>
    %398 = math.tanh %392 : vector<2x128xf32>
    %399 = arith.negf %392 : vector<2x128xf32>
    %400 = math.exp %399 : vector<2x128xf32>
    %cst_118 = arith.constant 1.000000e+00 : f32
    %401 = vector.broadcast %cst_118 : f32 to vector<2x128xf32>
    %402 = arith.addf %401, %400 : vector<2x128xf32>
    %403 = arith.divf %401, %402 : vector<2x128xf32>
    %404 = arith.select %28, %398, %403 : vector<2x128xi1>, vector<2x128xf32>
    %405 = vector.extract_strided_slice %404 {offsets = [0, 0], sizes = [2, 32], strides = [1, 1]} : vector<2x128xf32> to vector<2x32xf32>
    %406 = vector.extract_strided_slice %404 {offsets = [0, 32], sizes = [2, 32], strides = [1, 1]} : vector<2x128xf32> to vector<2x32xf32>
    %407 = vector.extract_strided_slice %404 {offsets = [0, 64], sizes = [2, 32], strides = [1, 1]} : vector<2x128xf32> to vector<2x32xf32>
    %408 = vector.extract_strided_slice %404 {offsets = [0, 96], sizes = [2, 32], strides = [1, 1]} : vector<2x128xf32> to vector<2x32xf32>
    %409 = arith.mulf %406, %360 : vector<2x32xf32>
    %410 = arith.mulf %405, %407 : vector<2x32xf32>
    %411 = arith.addf %409, %410 : vector<2x32xf32>
    %412 = math.tanh %411 : vector<2x32xf32>
    %413 = arith.mulf %408, %412 : vector<2x32xf32>
    %414 = math.tanh %397 : vector<2x128xf32>
    %415 = arith.negf %397 : vector<2x128xf32>
    %416 = math.exp %415 : vector<2x128xf32>
    %cst_119 = arith.constant 1.000000e+00 : f32
    %417 = vector.broadcast %cst_119 : f32 to vector<2x128xf32>
    %418 = arith.addf %417, %416 : vector<2x128xf32>
    %419 = arith.divf %417, %418 : vector<2x128xf32>
    %420 = arith.select %28, %414, %419 : vector<2x128xi1>, vector<2x128xf32>
    %421 = vector.extract_strided_slice %420 {offsets = [0, 0], sizes = [2, 32], strides = [1, 1]} : vector<2x128xf32> to vector<2x32xf32>
    %422 = vector.extract_strided_slice %420 {offsets = [0, 32], sizes = [2, 32], strides = [1, 1]} : vector<2x128xf32> to vector<2x32xf32>
    %423 = vector.extract_strided_slice %420 {offsets = [0, 64], sizes = [2, 32], strides = [1, 1]} : vector<2x128xf32> to vector<2x32xf32>
    %424 = vector.extract_strided_slice %420 {offsets = [0, 96], sizes = [2, 32], strides = [1, 1]} : vector<2x128xf32> to vector<2x32xf32>
    %425 = arith.mulf %422, %376 : vector<2x32xf32>
    %426 = arith.mulf %421, %423 : vector<2x32xf32>
    %427 = arith.addf %425, %426 : vector<2x32xf32>
    %428 = math.tanh %427 : vector<2x32xf32>
    %429 = arith.mulf %424, %428 : vector<2x32xf32>
    %430 = arith.index_cast %c7_i32_110 : i32 to index
    %c0_120 = arith.constant 0 : index
    %c0_121 = arith.constant 0 : index
    %431 = vector.load %arg24[%430, %c0_120, %c0_121] : memref<8x2x32xf32, #tpu.memory_space<vmem>>, vector<1x2x32xf32>
    %432 = vector.shape_cast %431 : vector<1x2x32xf32> to vector<2x32xf32>
    %433 = vector.shape_cast %413 : vector<2x32xf32> to vector<1x2x32xf32>
    tpu.vector_store %arg24[%430, %c0_120, %c0_121], %433 {strides = array<i32>} : memref<8x2x32xf32, #tpu.memory_space<vmem>>, vector<1x2x32xf32>,
    %434 = arith.index_cast %387 : i32 to index
    %c0_122 = arith.constant 0 : index
    %c0_123 = arith.constant 0 : index
    %435 = vector.load %arg25[%434, %c0_122, %c0_123] : memref<8x2x32xf32, #tpu.memory_space<vmem>>, vector<1x2x32xf32>
    %436 = vector.shape_cast %435 : vector<1x2x32xf32> to vector<2x32xf32>
    %437 = vector.shape_cast %429 : vector<2x32xf32> to vector<1x2x32xf32>
    tpu.vector_store %arg25[%434, %c0_122, %c0_123], %437 {strides = array<i32>} : memref<8x2x32xf32, #tpu.memory_space<vmem>>, vector<1x2x32xf32>,
    %c8_i32 = arith.constant 8 : i32
    %c0_124 = arith.constant 0 : index
    %c0_125 = arith.constant 0 : index
    %c0_126 = arith.constant 0 : index
    %438 = vector.load %arg24[%c0_124, %c0_125, %c0_126] : memref<8x2x32xf32, #tpu.memory_space<vmem>>, vector<8x2x32xf32>
    %c0_127 = arith.constant 0 : index
    %c0_128 = arith.constant 0 : index
    %c0_129 = arith.constant 0 : index
    %439 = vector.load %arg25[%c0_127, %c0_128, %c0_129] : memref<8x2x32xf32, #tpu.memory_space<vmem>>, vector<8x2x32xf32>
    %440 = tpu.concatenate %438, %439 in 2 : vector<8x2x32xf32>, vector<8x2x32xf32> -> vector<8x2x64xf32>
    %441 = vector.shape_cast %440 : vector<8x2x64xf32> to vector<16x64xf32>
    %c0_130 = arith.constant 0 : index
    %c0_131 = arith.constant 0 : index
    %442 = vector.load %arg7[%c0_130, %c0_131] : memref<64x192xf32, #tpu.memory_space<vmem>>, vector<64x192xf32>
    %cst_132 = arith.constant dense<0.000000e+00> : vector<16x192xf32>
    %443 = tpu.matmul %441, %442, %cst_132 {dimension_numbers = #tpu.dot_dimension_numbers<[1], [0], [0], [1], [0, 0, 1, 1], [], []>} : vector<16x64xf32>, vector<64x192xf32>, vector<16x192xf32> -> vector<16x192xf32>
    %c0_133 = arith.constant 0 : index
    %c0_134 = arith.constant 0 : index
    %444 = vector.load %arg8[%c0_133, %c0_134] : memref<1x192xf32, #tpu.memory_space<vmem>>, vector<1x192xf32>
    %445 = vector.broadcast %444 : vector<1x192xf32> to vector<16x192xf32>
    %446 = arith.addf %443, %445 : vector<16x192xf32>
    %447 = vector.extract_strided_slice %446 {offsets = [0, 0], sizes = [16, 64], strides = [1, 1]} : vector<16x192xf32> to vector<16x64xf32>
    %448 = vector.shape_cast %447 : vector<16x64xf32> to vector<8x2x64xf32>
    %cst_135 = arith.constant 0.176776692 : f32
    %449 = vector.broadcast %cst_135 : f32 to vector<8x2x64xf32>
    %450 = arith.mulf %448, %449 : vector<8x2x64xf32>
    %451 = vector.extract_strided_slice %446 {offsets = [0, 64], sizes = [16, 64], strides = [1, 1]} : vector<16x192xf32> to vector<16x64xf32>
    %452 = vector.shape_cast %451 : vector<16x64xf32> to vector<8x2x64xf32>
    %453 = vector.extract_strided_slice %446 {offsets = [0, 128], sizes = [16, 64], strides = [1, 1]} : vector<16x192xf32> to vector<16x64xf32>
    %454 = vector.shape_cast %453 : vector<16x64xf32> to vector<8x2x64xf32>
    %455 = vector.extract_strided_slice %450 {offsets = [0, 0, 0], sizes = [8, 2, 32], strides = [1, 1, 1]} : vector<8x2x64xf32> to vector<8x2x32xf32>
    %456 = vector.extract_strided_slice %452 {offsets = [0, 0, 0], sizes = [8, 2, 32], strides = [1, 1, 1]} : vector<8x2x64xf32> to vector<8x2x32xf32>
    %457 = vector.extract_strided_slice %454 {offsets = [0, 0, 0], sizes = [8, 2, 32], strides = [1, 1, 1]} : vector<8x2x64xf32> to vector<8x2x32xf32>
    "tpu.trace_start"() <{level = 10 : i32, message = "nld,nmd->nlm"}> : () -> ()
    %cst_136 = arith.constant dense<0.000000e+00> : vector<8x2x2xf32>
    %458 = tpu.matmul %455, %456, %cst_136 {dimension_numbers = #tpu.dot_dimension_numbers<[2], [2], [1], [1], [0, 0, 0, 1, 1, 1], [0], [0]>} : vector<8x2x32xf32>, vector<8x2x32xf32>, vector<8x2x2xf32> -> vector<8x2x2xf32>
    "tpu.trace_stop"() : () -> ()
    %cst_137 = arith.constant dense<0xFF800000> : vector<8x2xf32>
    %459 = vector.multi_reduction <maximumf>, %458, %cst_137 [2] : vector<8x2x2xf32> to vector<8x2xf32>
    %460 = vector.shape_cast %459 : vector<8x2xf32> to vector<8x2x1xf32>
    %461 = vector.broadcast %460 : vector<8x2x1xf32> to vector<8x2x2xf32>
    %462 = arith.subf %458, %461 : vector<8x2x2xf32>
    %463 = math.exp %462 : vector<8x2x2xf32>
    %cst_138 = arith.constant dense<0.000000e+00> : vector<8x2xf32>
    %464 = vector.multi_reduction <add>, %463, %cst_138 [2] : vector<8x2x2xf32> to vector<8x2xf32>
    %465 = vector.shape_cast %464 : vector<8x2xf32> to vector<8x2x1xf32>
    %466 = tpu.reciprocal %465 {approx = true} : vector<8x2x1xf32> -> vector<8x2x1xf32>
    %467 = vector.broadcast %466 : vector<8x2x1xf32> to vector<8x2x2xf32>
    %468 = arith.mulf %463, %467 : vector<8x2x2xf32>
    "tpu.trace_start"() <{level = 10 : i32, message = "nlm,nmd->nld"}> : () -> ()
    %cst_139 = arith.constant dense<0.000000e+00> : vector<8x2x32xf32>
    %469 = tpu.matmul %468, %457, %cst_139 {dimension_numbers = #tpu.dot_dimension_numbers<[2], [1], [1], [2], [0, 0, 0, 1, 1, 2], [0], [0]>} : vector<8x2x2xf32>, vector<8x2x32xf32>, vector<8x2x32xf32> -> vector<8x2x32xf32>
    "tpu.trace_stop"() : () -> ()
    %470 = vector.extract_strided_slice %450 {offsets = [0, 0, 32], sizes = [8, 2, 32], strides = [1, 1, 1]} : vector<8x2x64xf32> to vector<8x2x32xf32>
    %471 = vector.extract_strided_slice %452 {offsets = [0, 0, 32], sizes = [8, 2, 32], strides = [1, 1, 1]} : vector<8x2x64xf32> to vector<8x2x32xf32>
    %472 = vector.extract_strided_slice %454 {offsets = [0, 0, 32], sizes = [8, 2, 32], strides = [1, 1, 1]} : vector<8x2x64xf32> to vector<8x2x32xf32>
    "tpu.trace_start"() <{level = 10 : i32, message = "nld,nmd->nlm"}> : () -> ()
    %cst_140 = arith.constant dense<0.000000e+00> : vector<8x2x2xf32>
    %473 = tpu.matmul %470, %471, %cst_140 {dimension_numbers = #tpu.dot_dimension_numbers<[2], [2], [1], [1], [0, 0, 0, 1, 1, 1], [0], [0]>} : vector<8x2x32xf32>, vector<8x2x32xf32>, vector<8x2x2xf32> -> vector<8x2x2xf32>
    "tpu.trace_stop"() : () -> ()
    %cst_141 = arith.constant dense<0xFF800000> : vector<8x2xf32>
    %474 = vector.multi_reduction <maximumf>, %473, %cst_141 [2] : vector<8x2x2xf32> to vector<8x2xf32>
    %475 = vector.shape_cast %474 : vector<8x2xf32> to vector<8x2x1xf32>
    %476 = vector.broadcast %475 : vector<8x2x1xf32> to vector<8x2x2xf32>
    %477 = arith.subf %473, %476 : vector<8x2x2xf32>
    %478 = math.exp %477 : vector<8x2x2xf32>
    %cst_142 = arith.constant dense<0.000000e+00> : vector<8x2xf32>
    %479 = vector.multi_reduction <add>, %478, %cst_142 [2] : vector<8x2x2xf32> to vector<8x2xf32>
    %480 = vector.shape_cast %479 : vector<8x2xf32> to vector<8x2x1xf32>
    %481 = tpu.reciprocal %480 {approx = true} : vector<8x2x1xf32> -> vector<8x2x1xf32>
    %482 = vector.broadcast %481 : vector<8x2x1xf32> to vector<8x2x2xf32>
    %483 = arith.mulf %478, %482 : vector<8x2x2xf32>
    "tpu.trace_start"() <{level = 10 : i32, message = "nlm,nmd->nld"}> : () -> ()
    %cst_143 = arith.constant dense<0.000000e+00> : vector<8x2x32xf32>
    %484 = tpu.matmul %483, %472, %cst_143 {dimension_numbers = #tpu.dot_dimension_numbers<[2], [1], [1], [2], [0, 0, 0, 1, 1, 2], [0], [0]>} : vector<8x2x2xf32>, vector<8x2x32xf32>, vector<8x2x32xf32> -> vector<8x2x32xf32>
    "tpu.trace_stop"() : () -> ()
    %485 = tpu.concatenate %469, %484 in 2 : vector<8x2x32xf32>, vector<8x2x32xf32> -> vector<8x2x64xf32>
    %486 = vector.shape_cast %485 : vector<8x2x64xf32> to vector<16x64xf32>
    %c0_144 = arith.constant 0 : index
    %c0_145 = arith.constant 0 : index
    %487 = vector.load %arg9[%c0_144, %c0_145] : memref<64x64xf32, #tpu.memory_space<vmem>>, vector<64x64xf32>
    %cst_146 = arith.constant dense<0.000000e+00> : vector<16x64xf32>
    %488 = tpu.matmul %486, %487, %cst_146 {dimension_numbers = #tpu.dot_dimension_numbers<[1], [0], [0], [1], [0, 0, 1, 1], [], []>} : vector<16x64xf32>, vector<64x64xf32>, vector<16x64xf32> -> vector<16x64xf32>
    %c0_147 = arith.constant 0 : index
    %c0_148 = arith.constant 0 : index
    %489 = vector.load %arg10[%c0_147, %c0_148] : memref<1x64xf32, #tpu.memory_space<vmem>>, vector<1x64xf32>
    %490 = vector.broadcast %489 : vector<1x64xf32> to vector<16x64xf32>
    %491 = arith.addf %488, %490 : vector<16x64xf32>
    %492 = arith.addf %441, %491 : vector<16x64xf32>
    %c0_149 = arith.constant 0 : index
    %c0_150 = arith.constant 0 : index
    %493 = vector.load %arg11[%c0_149, %c0_150] : memref<1x64xf32, #tpu.memory_space<vmem>>, vector<1x64xf32>
    %c0_151 = arith.constant 0 : index
    %c0_152 = arith.constant 0 : index
    %494 = vector.load %arg12[%c0_151, %c0_152] : memref<1x64xf32, #tpu.memory_space<vmem>>, vector<1x64xf32>
    %cst_153 = arith.constant dense<0.000000e+00> : vector<16xf32>
    %495 = vector.multi_reduction <add>, %492, %cst_153 [1] : vector<16x64xf32> to vector<16xf32>
    %496 = vector.shape_cast %495 : vector<16xf32> to vector<16x1xf32>
    %cst_154 = arith.constant 6.400000e+01 : f32
    %497 = vector.broadcast %cst_154 : f32 to vector<16x1xf32>
    %498 = arith.divf %496, %497 : vector<16x1xf32>
    %499 = vector.broadcast %498 : vector<16x1xf32> to vector<16x64xf32>
    %500 = arith.subf %492, %499 : vector<16x64xf32>
    %501 = arith.mulf %500, %500 : vector<16x64xf32>
    %cst_155 = arith.constant dense<0.000000e+00> : vector<16xf32>
    %502 = vector.multi_reduction <add>, %501, %cst_155 [1] : vector<16x64xf32> to vector<16xf32>
    %503 = vector.shape_cast %502 : vector<16xf32> to vector<16x1xf32>
    %cst_156 = arith.constant 6.400000e+01 : f32
    %504 = vector.broadcast %cst_156 : f32 to vector<16x1xf32>
    %505 = arith.divf %503, %504 : vector<16x1xf32>
    %506 = vector.broadcast %498 : vector<16x1xf32> to vector<16x64xf32>
    %507 = arith.subf %492, %506 : vector<16x64xf32>
    %cst_157 = arith.constant 9.99999974E-6 : f32
    %508 = vector.broadcast %cst_157 : f32 to vector<16x1xf32>
    %509 = arith.addf %505, %508 : vector<16x1xf32>
    %510 = math.rsqrt %509 : vector<16x1xf32>
    %511 = vector.broadcast %510 : vector<16x1xf32> to vector<16x64xf32>
    %512 = arith.mulf %507, %511 : vector<16x64xf32>
    %513 = vector.broadcast %493 : vector<1x64xf32> to vector<16x64xf32>
    %514 = arith.mulf %512, %513 : vector<16x64xf32>
    %515 = vector.broadcast %494 : vector<1x64xf32> to vector<16x64xf32>
    %516 = arith.addf %514, %515 : vector<16x64xf32>
    %c0_158 = arith.constant 0 : index
    %c0_159 = arith.constant 0 : index
    %517 = vector.load %arg13[%c0_158, %c0_159] : memref<64x2048xf32, #tpu.memory_space<vmem>>, vector<64x2048xf32>
    %cst_160 = arith.constant dense<0.000000e+00> : vector<16x2048xf32>
    %518 = tpu.matmul %516, %517, %cst_160 {dimension_numbers = #tpu.dot_dimension_numbers<[1], [0], [0], [1], [0, 0, 1, 1], [], []>} : vector<16x64xf32>, vector<64x2048xf32>, vector<16x2048xf32> -> vector<16x2048xf32>
    %c0_161 = arith.constant 0 : index
    %c0_162 = arith.constant 0 : index
    %519 = vector.load %arg14[%c0_161, %c0_162] : memref<1x2048xf32, #tpu.memory_space<vmem>>, vector<1x2048xf32>
    %520 = vector.broadcast %519 : vector<1x2048xf32> to vector<16x2048xf32>
    %521 = arith.addf %518, %520 : vector<16x2048xf32>
    %cst_163 = arith.constant 0.000000e+00 : f32
    %522 = vector.broadcast %cst_163 : f32 to vector<16x2048xf32>
    %523 = arith.maximumf %521, %522 : vector<16x2048xf32>
    %c0_164 = arith.constant 0 : index
    %c0_165 = arith.constant 0 : index
    %524 = vector.load %arg15[%c0_164, %c0_165] : memref<2048x64xf32, #tpu.memory_space<vmem>>, vector<2048x64xf32>
    %cst_166 = arith.constant dense<0.000000e+00> : vector<16x64xf32>
    %525 = tpu.matmul %523, %524, %cst_166 {dimension_numbers = #tpu.dot_dimension_numbers<[1], [0], [0], [1], [0, 0, 1, 1], [], []>} : vector<16x2048xf32>, vector<2048x64xf32>, vector<16x64xf32> -> vector<16x64xf32>
    %c0_167 = arith.constant 0 : index
    %c0_168 = arith.constant 0 : index
    %526 = vector.load %arg16[%c0_167, %c0_168] : memref<1x64xf32, #tpu.memory_space<vmem>>, vector<1x64xf32>
    %527 = vector.broadcast %526 : vector<1x64xf32> to vector<16x64xf32>
    %528 = arith.addf %525, %527 : vector<16x64xf32>
    %529 = arith.addf %516, %528 : vector<16x64xf32>
    %c0_169 = arith.constant 0 : index
    %c0_170 = arith.constant 0 : index
    %530 = vector.load %arg17[%c0_169, %c0_170] : memref<1x64xf32, #tpu.memory_space<vmem>>, vector<1x64xf32>
    %c0_171 = arith.constant 0 : index
    %c0_172 = arith.constant 0 : index
    %531 = vector.load %arg18[%c0_171, %c0_172] : memref<1x64xf32, #tpu.memory_space<vmem>>, vector<1x64xf32>
    %cst_173 = arith.constant dense<0.000000e+00> : vector<16xf32>
    %532 = vector.multi_reduction <add>, %529, %cst_173 [1] : vector<16x64xf32> to vector<16xf32>
    %533 = vector.shape_cast %532 : vector<16xf32> to vector<16x1xf32>
    %cst_174 = arith.constant 6.400000e+01 : f32
    %534 = vector.broadcast %cst_174 : f32 to vector<16x1xf32>
    %535 = arith.divf %533, %534 : vector<16x1xf32>
    %536 = vector.broadcast %535 : vector<16x1xf32> to vector<16x64xf32>
    %537 = arith.subf %529, %536 : vector<16x64xf32>
    %538 = arith.mulf %537, %537 : vector<16x64xf32>
    %cst_175 = arith.constant dense<0.000000e+00> : vector<16xf32>
    %539 = vector.multi_reduction <add>, %538, %cst_175 [1] : vector<16x64xf32> to vector<16xf32>
    %540 = vector.shape_cast %539 : vector<16xf32> to vector<16x1xf32>
    %cst_176 = arith.constant 6.400000e+01 : f32
    %541 = vector.broadcast %cst_176 : f32 to vector<16x1xf32>
    %542 = arith.divf %540, %541 : vector<16x1xf32>
    %543 = vector.broadcast %535 : vector<16x1xf32> to vector<16x64xf32>
    %544 = arith.subf %529, %543 : vector<16x64xf32>
    %cst_177 = arith.constant 9.99999974E-6 : f32
    %545 = vector.broadcast %cst_177 : f32 to vector<16x1xf32>
    %546 = arith.addf %542, %545 : vector<16x1xf32>
    %547 = math.rsqrt %546 : vector<16x1xf32>
    %548 = vector.broadcast %547 : vector<16x1xf32> to vector<16x64xf32>
    %549 = arith.mulf %544, %548 : vector<16x64xf32>
    %550 = vector.broadcast %530 : vector<1x64xf32> to vector<16x64xf32>
    %551 = arith.mulf %549, %550 : vector<16x64xf32>
    %552 = vector.broadcast %531 : vector<1x64xf32> to vector<16x64xf32>
    %553 = arith.addf %551, %552 : vector<16x64xf32>
    %c0_178 = arith.constant 0 : index
    %c0_179 = arith.constant 0 : index
    %554 = vector.load %arg19[%c0_178, %c0_179] : memref<64x1xf32, #tpu.memory_space<vmem>>, vector<64x1xf32>
    %cst_180 = arith.constant dense<0.000000e+00> : vector<16x1xf32>
    %555 = tpu.matmul %553, %554, %cst_180 {dimension_numbers = #tpu.dot_dimension_numbers<[1], [0], [0], [1], [0, 0, 1, 1], [], []>} : vector<16x64xf32>, vector<64x1xf32>, vector<16x1xf32> -> vector<16x1xf32>
    %c0_181 = arith.constant 0 : index
    %c0_182 = arith.constant 0 : index
    %556 = vector.load %arg20[%c0_181, %c0_182] : memref<1x1xf32, #tpu.memory_space<vmem>>, vector<1x1xf32>
    %557 = vector.broadcast %556 : vector<1x1xf32> to vector<16x1xf32>
    %558 = arith.addf %555, %557 : vector<16x1xf32>
    %559 = arith.negf %558 : vector<16x1xf32>
    %560 = math.exp %559 : vector<16x1xf32>
    %cst_183 = arith.constant 1.000000e+00 : f32
    %561 = vector.broadcast %cst_183 : f32 to vector<16x1xf32>
    %562 = arith.addf %561, %560 : vector<16x1xf32>
    %563 = arith.divf %561, %562 : vector<16x1xf32>
    %564 = vector.shape_cast %563 : vector<16x1xf32> to vector<8x2x1xf32>
    %c0_184 = arith.constant 0 : index
    %c0_185 = arith.constant 0 : index
    %c0_186 = arith.constant 0 : index
    %565 = vector.load %arg21[%c0_184, %c0_185, %c0_186] : memref<8x2x1xf32, #tpu.memory_space<vmem>>, vector<8x2x1xf32>
    tpu.vector_store %arg21[%c0_184, %c0_185, %c0_186], %564 {strides = array<i32>} : memref<8x2x1xf32, #tpu.memory_space<vmem>>, vector<8x2x1xf32>,
    return
  }
}

</mosaic_0001>

<bundles_post_ra>
// kernel: attncut_forward.1
= control target key start
LH: loop header
LB: loop body
LE: loop exit
PB: predicated region body
PF: predicated region fallthrough
CT: control target
= control target key end

     0   :  { %v9122_v0 = vmov 0.0   ;;  %vm9123_vm0 = vmmov 0   ;;  %v9124_v10 = vmov 0   ;;  %v202_v40 = vlaneseq  ;;  %s9126_s30 = smov 32   ;;  %s11960_s2 = inlined_call_operand.vmem [shape: f32[32,128], index: 2, kind: input, shape index: {}]   ;;  %s11961_s5 = inlined_call_operand.vmem [shape: f32[32,128], index: 5, kind: input, shape index: {}]   ;;  %s11962_s0 = inlined_call_operand.vmem [shape: f32[8,2,1], index: 0, kind: input, shape index: {}]   ;;  %s11963_s1 = inlined_call_operand.vmem [shape: f32[1,128], index: 1, kind: input, shape index: {}]   ;;  %s11964_s4 = inlined_call_operand.vmem [shape: f32[1,128], index: 4, kind: input, shape index: {}]   ;;  %s11965_s3 = inlined_call_operand.vmem [shape: f32[1,128], index: 3, kind: input, shape index: {}]   ;;  %s11966_s6 = inlined_call_operand.vmem [shape: f32[1,128], index: 6, kind: input, shape index: {}]   ;;  %s11967_s7 = inlined_call_operand.vmem [shape: f32[64,192], index: 7, kind: input, shape index: {}]   ;;  %s11968_s8 = inlined_call_operand.vmem [shape: f32[1,192], index: 8, kind: input, shape index: {}]   ;;  %s11969_s9 = inlined_call_operand.vmem [shape: f32[64,64], index: 9, kind: input, shape index: {}]   ;;  %s11970_s10 = inlined_call_operand.vmem [shape: f32[1,64], index: 10, kind: input, shape index: {}]   ;;  %s11971_s13 = inlined_call_operand.vmem [shape: f32[64,2048], index: 13, kind: input, shape index: {}]   ;;  %s11972_s11 = inlined_call_operand.vmem [shape: f32[1,64], index: 11, kind: input, shape index: {}]   ;;  %s11973_s12 = inlined_call_operand.vmem [shape: f32[1,64], index: 12, kind: input, shape index: {}]   ;;  %s11974_s15 = inlined_call_operand.vmem [shape: f32[2048,64], index: 15, kind: input, shape index: {}]   ;;  %s11975_s14 = inlined_call_operand.vmem [shape: f32[1,2048], index: 14, kind: input, shape index: {}]   ;;  %s11976_s16 = inlined_call_operand.vmem [shape: f32[1,64], index: 16, kind: input, shape index: {}]   ;;  %s11977_s19 = inlined_call_operand.vmem [shape: f32[64,1], index: 19, kind: input, shape index: {}]   ;;  %s11978_s20 = inlined_call_operand.<no memory space> [shape: f32[1,1], index: 20, kind: input, shape index: {}]   ;;  %s11979_s17 = inlined_call_operand.vmem [shape: f32[1,64], index: 17, kind: input, shape index: {}]   ;;  %s11980_s18 = inlined_call_operand.vmem [shape: f32[1,64], index: 18, kind: input, shape index: {}]   ;;  %s11981_s21 = inlined_call_operand.vmem [shape: f32[8,2,1], index: 21, kind: output, shape index: {}]  }
   0x1   :  { %11985 = sst [smem:[#allocation7_spill]] %s11960_s2  ;;  %8519 = vmatprep.subr.mxu0 %v9122_v0  ;;  %8530 = vmatprep.subr.mxu1 %v9122_v0  ;;  %v9351_v15 = vld [vmem:[%s11966_s6] ss:$0 sm:$0xff]  ;;  %s9125_s6 = smov 64   ;;  %vm410_vm4 = vcmask 254976   ;;  %vm208_vm5 = vcmask 261120  }
   0x2   :  { %11986 = sst [smem:[#allocation8_spill]] %s11961_s5  ;;  %8527 = vmatprep.mubr.msk.f32.mxu0 %vm9123_vm0, %v9122_v0  ;;  %8538 = vmatprep.mubr.msk.f32.mxu1 %vm9123_vm0, %v9122_v0  ;;  %v203_v41 = vand.u32 127, %v202_v40  ;;  %vm2026_vm6 = vcmask 523264   ;;  %vm2961_vm7 = vcmask 1041408   ;;  %vm2868_vm8 = vcmask 9216  }
   0x3   :  { %11987 = sst [smem:[#allocation9_spill]] %s11962_s0  ;;  %8904 = vset.pattern.permute.xlu0 %v9124_v10  ;;  %8905 = vset.pattern.permute.xlu1 %v9124_v10  ;;  %vm2957_vm9 = vcmask 15360   ;;  %vm7909_vm10 = vcmask 1024  }
   0x4   :  { %11988 = sst [smem:[#allocation10_spill]] %s11963_s1  ;;  %vm204_vm1 = vcmp.ge.s32.totalorder %v203_v41, 64  ;;  %vm205_vm2 = vcmp.lt.s32.totalorder %v203_v41, 96 }
   0x5   :  { %11989 = sst [smem:[#allocation11_spill]] %s11964_s4  ;;  %vm9362_vm3 = vmand %vm204_vm1, %vm205_vm2 }
   0x6   :  { %11990 = sst [smem:[#allocation12_spill]] %s11965_s3 }
   0x7   :  { %s11991_s26 = sld [smem:[#allocation7_spill]] }
   0x8   :  { %s11992_s28 = sld [smem:[#allocation8_spill]] }
   0x9   :  { %s11993_s2 = sld [smem:[#allocation9_spill]] }
   0xa   :  { %s11994_s23 = sld [smem:[#allocation10_spill]] }
   0xb   :  { %s11995_s0 = sld [smem:[#allocation11_spill]] }
   0xc   :  { %s11996_s1 = sld [smem:[#allocation12_spill]] }
   0xd   :  { %v9248_v1 = vld [vmem:[%s11991_s26 + $0x18] sm:$0xff]  ;;  %v9258_v3 = vld [vmem:[%s11991_s26 + $0x10] sm:$0xff]  ;;  %v9272_v5 = vld [vmem:[%s11991_s26 + $0x8] sm:$0xff] }
   0xe   :  { %v9253_v2 = vld [vmem:[%s11992_s28 + $0x18] sm:$0xff]  ;;  %8520 = vmatpush3.msra.mxu0 %v9248_v1  ;;  %v9265_v4 = vld [vmem:[%s11992_s28 + $0x10] sm:$0xff]  ;;  %v9277_v6 = vld [vmem:[%s11992_s28 + $0x8] sm:$0xff] }
   0xf   :  { %8531 = vmatpush3.msra.mxu1 %v9253_v2  ;;  %8521 = vmatprep.subr.mxu0 %v9122_v0  ;;  %v9286_v7 = vld [vmem:[%s11991_s26] sm:$0xff]  ;;  %v77_v9 = vld [vmem:[%s11993_s2 + $0xe] sm:$0x3]  ;;  %v76_v61 = vld [vmem:[%s11993_s2 + $0xc] sm:$0x3] }
  0x10   :  { %8532 = vmatprep.subr.mxu1 %v9122_v0  ;;  %8522 = vmatpush3.msra.mxu0 %v9258_v3  ;;  %v9293_v8 = vld [vmem:[%s11992_s28] sm:$0xff] }
  0x11   :  { %8533 = vmatpush3.msra.mxu1 %v9265_v4  ;;  %8523 = vmatprep.subr.mxu0 %v9122_v0  ;;  %v70_v11 = vld [vmem:[%s11993_s2] sm:$0x3] }
  0x12   :  { %8534 = vmatprep.subr.mxu1 %v9122_v0  ;;  %8524 = vmatpush3.msra.mxu0 %v9272_v5  ;;  %v9336_v12 = vld [vmem:[%s11994_s23] ss:$0 sm:$0xff] }
  0x13   :  { %8535 = vmatpush3.msra.mxu1 %v9277_v6  ;;  %8525 = vmatprep.subr.mxu0 %v9122_v0  ;;  %v9341_v13 = vld [vmem:[%s11995_s0] ss:$0 sm:$0xff] }
  0x14   :  { %8536 = vmatprep.subr.mxu1 %v9122_v0  ;;  %8526 = vmatpush3.msra.mxu0 %v9286_v7  ;;  %v9346_v14 = vld [vmem:[%s11996_s1] ss:$0 sm:$0xff] }
  0x15   :  { %8537 = vmatpush3.msra.mxu1 %v9293_v8  ;;  %8528 = vmatmul.mubr.f32.vlgmr.msra.gmra.mxu0 %v9122_v0 }
  0x16   :  { %8539 = vmatmul.mubr.f32.vlgmr.msra.gmra.mxu1 %v9122_v0  ;;  %8552 = vmatprep.subr.mxu1 %v9122_v0 }
  0x17   :  { %116 = vperm.xlu0 %8904, %v77_v9   ;;  %8553 = vmatpush3.msra.mxu1 %v9253_v2 }
  0x18   :  { %8554 = vmatprep.subr.mxu1 %v9122_v0  ;;  %8541 = vmatprep.subr.mxu0 %v9122_v0 }
  0x19   :  { %8555 = vmatpush3.msra.mxu1 %v9265_v4  ;;  %8542 = vmatpush3.msra.mxu0 %v9248_v1 }
  0x1a   :  { %8556 = vmatprep.subr.mxu1 %v9122_v0  ;;  %8543 = vmatprep.subr.mxu0 %v9122_v0 }
  0x1b   :  { %81 = vperm.xlu0 %8904, %v70_v11   ;;  %8557 = vmatpush3.msra.mxu1 %v9277_v6  ;;  %v71_v11 = vld [vmem:[%s11993_s2 + $0x2] sm:$0x3] }
  0x1c   :  { %8558 = vmatprep.subr.mxu1 %v9122_v0  ;;  %8544 = vmatpush3.msra.mxu0 %v9258_v3 }
  0x1d   :  { %8559 = vmatpush3.msra.mxu1 %v9293_v8  ;;  %8560 = vmatprep.mubr.msk.f32.mxu1 %vm9123_vm0, %v9122_v0 }
  0x1e   :  { %8545 = vmatprep.subr.mxu0 %v9122_v0  ;;  %8549 = vmatprep.mubr.msk.f32.mxu0 %vm9123_vm0, %v9122_v0 }
  0x1f   :  { %8546 = vmatpush3.msra.mxu0 %v9272_v5  ;;  %8574 = vmatprep.subr.mxu1 %v9122_v0 }
  0x20   :  { %8547 = vmatprep.subr.mxu0 %v9122_v0 }
  0x21   :  { %8548 = vmatpush3.msra.mxu0 %v9286_v7 }
  0x22   :  { %8563 = vmatprep.subr.mxu0 %v9122_v0 }
  0x92   :  { %v117_v16 = vpop.permute.xlu0 %116 }
  0x93   :  { %v132_v17 = vmul.f32 %v9336_v12, %v117_v16  ;;  %v170_v18 = vmul.f32 %v9341_v13, %v117_v16 }
  0x95   :  { %v147_v19 = vadd.f32 %v9346_v14, %v132_v17  ;;  %v185_v20 = vadd.f32 %v9351_v15, %v170_v18 }
  0x96   :  { %v82_v21 = vpop.permute.xlu0 %81 }
  0x97   :  { %155 = vst [vmem:[#allocation2 + $0xe] sm:$0x3] %v147_v19  ;;  %193 = vst [vmem:[#allocation3 + $0xe] sm:$0x3] %v185_v20  ;;  %v125_v22 = vmul.f32 %v9336_v12, %v82_v21  ;;  %v163_v23 = vmul.f32 %v9341_v13, %v82_v21 }
  0x99   :  { %v140_v24 = vadd.f32 %v9346_v14, %v125_v22  ;;  %v178_v25 = vadd.f32 %v9351_v15, %v163_v23 }
  0x9b   :  { %148 = vst [vmem:[#allocation2] sm:$0x3] %v140_v24  ;;  %186 = vst [vmem:[#allocation3] sm:$0x3] %v178_v25 }
  0x9e   :  { %v284_v27 = vld [vmem:[#allocation3 + $0xe] sm:$0x3] }
  0xa2   :  { %v207_v26 = vld [vmem:[#allocation2] sm:$0x3] }
  0xd5   :  { %v278_v28 = vpop.f32.mrf.mxu0 }
  0xd6   :  { %v351_v29 = vpop.f32.mrf.mxu1  ;;  %v282_v30 = vadd.f32 %v278_v28, %v207_v26 }
  0xd7   :  { %v355_v31 = vadd.f32 %v351_v29, %v284_v27  ;;  %v8529_v33 = vpop.f32.mrf.mxu0 }
  0xd8   :  { %v8540_v32 = vpop.f32.mrf.mxu1  ;;  %v7926_v34 = vmul.f32 -1.442695, %v282_v30 }
  0xd9   :  { %v7927_v35 = vmul.f32 -1.442695, %v355_v31 }
  0xda   :  { %8906 = vpow2.f32 %v7926_v34 }
  0xdb   :  { %8908 = vpow2.f32 %v7927_v35 }
  0xdc   :  { %8910 = vtanh.f32 %v282_v30 }
  0xdd   :  { %8912 = vtanh.f32 %v355_v31 }
  0xe7   :  { %v8907_v36 = vpop.eup %8906 }
  0xe8   :  { %v8909_v37 = vpop.eup %8908  ;;  %v360_v38 = vadd.f32 1.0, %v8907_v36 }
  0xe9   :  { %v385_v39 = vadd.f32 1.0, %v8909_v37  ;;  %v8911_v42 = vpop.eup %8910 }
  0xea   :  { %8914 = vrcp.f32 %v360_v38  ;;  %v8913_v44 = vpop.eup %8912 }
  0xeb   :  { %8916 = vrcp.f32 %v385_v39 }
  0xf7   :  { %v8915_v45 = vpop.eup %8914 }
  0xf8   :  { %v8917_v46 = vpop.eup %8916  ;;  %v363_v47 = vsel %vm9362_vm3, %v8911_v42, %v8915_v45 }
  0xf9   :  { %v388_v48 = vsel %vm9362_vm3, %v8913_v44, %v8917_v46  ;;  %366 = vrot.lane.b32.xlu0 %v363_v47, %s9125_s6  ;;  %v364_v56 = vmul.f32 0.0, %v363_v47 }
  0xfa   :  { %391 = vrot.lane.b32.xlu1 %v388_v48, %s9125_s6  ;;  %v389_v53 = vmul.f32 0.0, %v388_v48 }
 0x16b   :  { %v367_v51 = vpop.permute.xlu0 %366 }
 0x16c   :  { %v392_v49 = vpop.permute.xlu1 %391  ;;  %v369_v52 = vmul.f32 %v367_v51, %v363_v47 }
 0x16d   :  { %v394_v50 = vmul.f32 %v392_v49, %v388_v48 }
 0x16f   :  { %396 = vrot.lane.b32.xlu1 %v394_v50, %s9126_s30 }
 0x173   :  { %371 = vrot.lane.b32.xlu1 %v369_v52, %s9126_s30 }
 0x1e1   :  { %v397_v54 = vpop.permute.xlu1 %396 }
 0x1e2   :  { %v9374_v55 = vadd.f32 %v397_v54, %v389_v53 }
 0x1e4   :  { %8918 = vtanh.f32 %v9374_v55 }
 0x1e5   :  { %v372_v57 = vpop.permute.xlu1 %371 }
 0x1e6   :  { %v9377_v58 = vadd.f32 %v372_v57, %v364_v56 }
 0x1e8   :  { %8920 = vtanh.f32 %v9377_v58 }
 0x1f1   :  { %v8919_v59 = vpop.eup %8918 }
 0x1f2   :  { %402 = vrot.lane.b32.xlu0 %v8919_v59, %s9125_s6 }
 0x1f5   :  { %v8921_v60 = vpop.eup %8920 }
 0x1f6   :  { %377 = vrot.lane.b32.xlu0 %v8921_v60, %s9125_s6 }
 0x1fa   :  { %111 = vperm.xlu0 %8904, %v76_v61  }
 0x264   :  { %v403_v62 = vpop.permute.xlu0 %402 }
 0x265   :  { %v405_v63 = vmul.f32 %v403_v62, %v388_v48 }
 0x267   :  { %413 = vrot.lane.b32.xlu1 %v405_v63, %s9126_s30 }
 0x268   :  { %v378_v9 = vpop.permute.xlu0 %377 }
 0x269   :  { %v380_v10 = vmul.f32 %v378_v9, %v363_v47 }
 0x26b   :  { %407 = vrot.lane.b32.xlu1 %v380_v10, %s9126_s30 }
 0x26f   :  { %86 = vperm.xlu1 %8905, %v71_v11  }
 0x275   :  { %v112_v16 = vpop.permute.xlu0 %111 }
 0x276   :  { %v131_v17 = vmul.f32 %v9336_v12, %v112_v16  ;;  %v169_v18 = vmul.f32 %v9341_v13, %v112_v16  ;;  %v72_v16 = vld [vmem:[%s11993_s2 + $0x4] sm:$0x3] }
 0x278   :  { %v146_v19 = vadd.f32 %v9346_v14, %v131_v17  ;;  %v184_v20 = vadd.f32 %v9351_v15, %v169_v18 }
 0x27a   :  { %154 = vst [vmem:[#allocation2 + $0xc] sm:$0x3] %v146_v19  ;;  %192 = vst [vmem:[#allocation3 + $0xc] sm:$0x3] %v184_v20 }
 0x281   :  { %v494_v28 = vld [vmem:[#allocation3 + $0xc] sm:$0x3] }
 0x2d9   :  { %v414_v21 = vpop.permute.xlu1 %413 }
 0x2da   :  { %417 = vst.msk [vmem:[#allocation5 + $0xe] sm:$0x3] %vm410_vm4, %v414_v21  ;;  %8561 = vmatmul.mubr.msk.f32.vlgmr.msra.gmra.mxu1 %vm208_vm5, %v414_v21 }
 0x2db   :  { %8575 = vmatpush3.msra.mxu1 %v9253_v2  ;;  %8582 = vmatprep.mubr.msk.f32.mxu1 %vm9123_vm0, %v9122_v0 }
 0x2dc   :  { %8576 = vmatprep.subr.mxu1 %v9122_v0 }
 0x2dd   :  { %v408_v22 = vpop.permute.xlu1 %407  ;;  %8577 = vmatpush3.msra.mxu1 %v9265_v4 }
 0x2de   :  { %411 = vst.msk [vmem:[#allocation4] sm:$0x3] %vm410_vm4, %v408_v22  ;;  %8550 = vmatmul.mubr.msk.f32.vlgmr.msra.gmra.mxu0 %vm208_vm5, %v408_v22  ;;  %8578 = vmatprep.subr.mxu1 %v9122_v0 }
 0x2df   :  { %8564 = vmatpush3.msra.mxu0 %v9248_v1  ;;  %8579 = vmatpush3.msra.mxu1 %v9277_v6 }
 0x2e0   :  { %8565 = vmatprep.subr.mxu0 %v9122_v0  ;;  %8580 = vmatprep.subr.mxu1 %v9122_v0 }
 0x2e1   :  { %8566 = vmatpush3.msra.mxu0 %v9258_v3  ;;  %8581 = vmatpush3.msra.mxu1 %v9293_v8 }
 0x2e2   :  { %8567 = vmatprep.subr.mxu0 %v9122_v0  ;;  %8571 = vmatprep.mubr.msk.f32.mxu0 %vm9123_vm0, %v9122_v0 }
 0x2e3   :  { %8568 = vmatpush3.msra.mxu0 %v9272_v5  ;;  %8596 = vmatprep.subr.mxu1 %v9122_v0 }
 0x2e4   :  { %8569 = vmatprep.subr.mxu0 %v9122_v0 }
 0x2e5   :  { %8570 = vmatpush3.msra.mxu0 %v9286_v7 }
 0x2e6   :  { %8585 = vmatprep.subr.mxu0 %v9122_v0 }
 0x2ea   :  { %v87_v23 = vpop.permute.xlu1 %86 }
 0x2eb   :  { %v126_v24 = vmul.f32 %v9336_v12, %v87_v23  ;;  %v164_v25 = vmul.f32 %v9341_v13, %v87_v23 }
 0x2ed   :  { %v141_v26 = vadd.f32 %v9346_v14, %v126_v24  ;;  %v179_v27 = vadd.f32 %v9351_v15, %v164_v25 }
 0x2ef   :  { %149 = vst [vmem:[#allocation2 + $0x2] sm:$0x3] %v141_v26  ;;  %187 = vst [vmem:[#allocation3 + $0x2] sm:$0x3] %v179_v27 }
 0x2f6   :  { %v419_v32 = vld [vmem:[#allocation2 + $0x2] sm:$0x3] }
 0x39a   :  { %v563_v29 = vpop.f32.mrf.mxu1 }
 0x39b   :  { %v567_v30 = vadd.f32 %v563_v29, %v494_v28 }
 0x39c   :  { %v8562_v31 = vpop.f32.mrf.mxu1 }
 0x39d   :  { %v7931_v33 = vmul.f32 -1.442695, %v567_v30 }
 0x39e   :  { %v488_v34 = vpop.f32.mrf.mxu0 }
 0x39f   :  { %8922 = vpow2.f32 %v7931_v33  ;;  %v492_v35 = vadd.f32 %v488_v34, %v419_v32 }
 0x3a0   :  { %v8551_v36 = vpop.f32.mrf.mxu0 }
 0x3a1   :  { %v7930_v37 = vmul.f32 -1.442695, %v492_v35 }
 0x3a3   :  { %8924 = vpow2.f32 %v7930_v37 }
 0x3a4   :  { %8926 = vtanh.f32 %v567_v30 }
 0x3ac   :  { %v8923_v38 = vpop.eup %8922 }
 0x3ad   :  { %v597_v39 = vadd.f32 1.0, %v8923_v38 }
 0x3af   :  { %8928 = vrcp.f32 %v597_v39 }
 0x3b0   :  { %v8925_v41 = vpop.eup %8924  ;;  %8930 = vtanh.f32 %v492_v35 }
 0x3b1   :  { %v572_v42 = vadd.f32 1.0, %v8925_v41  ;;  %v8927_v44 = vpop.eup %8926 }
 0x3b3   :  { %8932 = vrcp.f32 %v572_v42 }
 0x3bc   :  { %v8929_v45 = vpop.eup %8928 }
 0x3bd   :  { %v600_v46 = vsel %vm9362_vm3, %v8927_v44, %v8929_v45  ;;  %v8931_v47 = vpop.eup %8930 }
 0x3be   :  { %603 = vrot.lane.b32.xlu0 %v600_v46, %s9125_s6  ;;  %v601_v54 = vmul.f32 %v600_v46, %v9374_v55  ;;  %v75_v55 = vld [vmem:[%s11993_s2 + $0xa] sm:$0x3] }
 0x3c0   :  { %v8933_v48 = vpop.eup %8932 }
 0x3c1   :  { %v575_v49 = vsel %vm9362_vm3, %v8931_v47, %v8933_v48 }
 0x3c2   :  { %578 = vrot.lane.b32.xlu0 %v575_v49, %s9125_s6  ;;  %v576_v59 = vmul.f32 %v575_v49, %v9377_v58 }
 0x430   :  { %v604_v50 = vpop.permute.xlu0 %603 }
 0x431   :  { %v606_v51 = vmul.f32 %v604_v50, %v600_v46 }
 0x433   :  { %608 = vrot.lane.b32.xlu1 %v606_v51, %s9126_s30 }
 0x434   :  { %v579_v52 = vpop.permute.xlu0 %578 }
 0x435   :  { %v581_v53 = vmul.f32 %v579_v52, %v575_v49 }
 0x437   :  { %583 = vrot.lane.b32.xlu1 %v581_v53, %s9126_s30 }
 0x4a5   :  { %v609_v56 = vpop.permute.xlu1 %608 }
 0x4a6   :  { %v9431_v57 = vadd.f32 %v609_v56, %v601_v54 }
 0x4a8   :  { %8934 = vtanh.f32 %v9431_v57 }
 0x4a9   :  { %v584_v60 = vpop.permute.xlu1 %583 }
 0x4aa   :  { %v9435_v61 = vadd.f32 %v584_v60, %v576_v59 }
 0x4ac   :  { %8936 = vtanh.f32 %v9435_v61 }
 0x4b5   :  { %v8935_v62 = vpop.eup %8934 }
 0x4b6   :  { %614 = vrot.lane.b32.xlu0 %v8935_v62, %s9125_s6 }
 0x4b9   :  { %v8937_v63 = vpop.eup %8936 }
 0x4ba   :  { %589 = vrot.lane.b32.xlu0 %v8937_v63, %s9125_s6 }
 0x4be   :  { %106 = vperm.xlu0 %8904, %v75_v55  }
 0x528   :  { %v615_v9 = vpop.permute.xlu0 %614 }
 0x529   :  { %v617_v10 = vmul.f32 %v615_v9, %v600_v46 }
 0x52b   :  { %625 = vrot.lane.b32.xlu1 %v617_v10, %s9126_s30 }
 0x52c   :  { %v590_v58 = vpop.permute.xlu0 %589 }
 0x52d   :  { %v592_v11 = vmul.f32 %v590_v58, %v575_v49 }
 0x52f   :  { %619 = vrot.lane.b32.xlu1 %v592_v11, %s9126_s30 }
 0x533   :  { %91 = vperm.xlu1 %8905, %v72_v16  }
 0x539   :  { %v107_v17 = vpop.permute.xlu0 %106 }
 0x53a   :  { %v130_v18 = vmul.f32 %v9336_v12, %v107_v17  ;;  %v168_v19 = vmul.f32 %v9341_v13, %v107_v17  ;;  %v73_v17 = vld [vmem:[%s11993_s2 + $0x6] sm:$0x3] }
 0x53c   :  { %v145_v20 = vadd.f32 %v9346_v14, %v130_v18  ;;  %v183_v21 = vadd.f32 %v9351_v15, %v168_v19 }
 0x53e   :  { %153 = vst [vmem:[#allocation2 + $0xa] sm:$0x3] %v145_v20  ;;  %191 = vst [vmem:[#allocation3 + $0xa] sm:$0x3] %v183_v21 }
 0x545   :  { %v706_v29 = vld [vmem:[#allocation3 + $0xa] sm:$0x3] }
 0x59d   :  { %v626_v22 = vpop.permute.xlu1 %625 }
 0x59e   :  { %629 = vst.msk [vmem:[#allocation5 + $0xc] sm:$0x3] %vm410_vm4, %v626_v22  ;;  %8583 = vmatmul.mubr.msk.f32.vlgmr.msra.gmra.mxu1 %vm208_vm5, %v626_v22 }
 0x59f   :  { %8597 = vmatpush3.msra.mxu1 %v9253_v2  ;;  %8604 = vmatprep.mubr.msk.f32.mxu1 %vm9123_vm0, %v9122_v0 }
 0x5a0   :  { %8598 = vmatprep.subr.mxu1 %v9122_v0 }
 0x5a1   :  { %v620_v23 = vpop.permute.xlu1 %619  ;;  %8599 = vmatpush3.msra.mxu1 %v9265_v4 }
 0x5a2   :  { %623 = vst.msk [vmem:[#allocation4 + $0x2] sm:$0x3] %vm410_vm4, %v620_v23  ;;  %8572 = vmatmul.mubr.msk.f32.vlgmr.msra.gmra.mxu0 %vm208_vm5, %v620_v23  ;;  %8600 = vmatprep.subr.mxu1 %v9122_v0 }
 0x5a3   :  { %8586 = vmatpush3.msra.mxu0 %v9248_v1  ;;  %8601 = vmatpush3.msra.mxu1 %v9277_v6 }
 0x5a4   :  { %8587 = vmatprep.subr.mxu0 %v9122_v0  ;;  %8602 = vmatprep.subr.mxu1 %v9122_v0 }
 0x5a5   :  { %8588 = vmatpush3.msra.mxu0 %v9258_v3  ;;  %8603 = vmatpush3.msra.mxu1 %v9293_v8 }
 0x5a6   :  { %8589 = vmatprep.subr.mxu0 %v9122_v0  ;;  %8593 = vmatprep.mubr.msk.f32.mxu0 %vm9123_vm0, %v9122_v0 }
 0x5a7   :  { %8590 = vmatpush3.msra.mxu0 %v9272_v5  ;;  %8618 = vmatprep.subr.mxu1 %v9122_v0 }
 0x5a8   :  { %8591 = vmatprep.subr.mxu0 %v9122_v0 }
 0x5a9   :  { %8592 = vmatpush3.msra.mxu0 %v9286_v7 }
 0x5aa   :  { %8607 = vmatprep.subr.mxu0 %v9122_v0 }
 0x5ae   :  { %v92_v24 = vpop.permute.xlu1 %91 }
 0x5af   :  { %v127_v25 = vmul.f32 %v9336_v12, %v92_v24  ;;  %v165_v26 = vmul.f32 %v9341_v13, %v92_v24 }
 0x5b1   :  { %v142_v27 = vadd.f32 %v9346_v14, %v127_v25  ;;  %v180_v28 = vadd.f32 %v9351_v15, %v165_v26 }
 0x5b3   :  { %150 = vst [vmem:[#allocation2 + $0x4] sm:$0x3] %v142_v27  ;;  %188 = vst [vmem:[#allocation3 + $0x4] sm:$0x3] %v180_v28 }
 0x5ba   :  { %v631_v34 = vld [vmem:[#allocation2 + $0x4] sm:$0x3] }
 0x65e   :  { %v775_v30 = vpop.f32.mrf.mxu1 }
 0x65f   :  { %v779_v31 = vadd.f32 %v775_v30, %v706_v29 }
 0x660   :  { %v8584_v32 = vpop.f32.mrf.mxu1 }
 0x661   :  { %v7935_v33 = vmul.f32 -1.442695, %v779_v31 }
 0x662   :  { %v700_v35 = vpop.f32.mrf.mxu0 }
 0x663   :  { %8938 = vpow2.f32 %v7935_v33  ;;  %v704_v36 = vadd.f32 %v700_v35, %v631_v34 }
 0x664   :  { %v8573_v37 = vpop.f32.mrf.mxu0 }
 0x665   :  { %v7934_v38 = vmul.f32 -1.442695, %v704_v36 }
 0x667   :  { %8940 = vpow2.f32 %v7934_v38 }
 0x668   :  { %8942 = vtanh.f32 %v779_v31 }
 0x670   :  { %v8939_v39 = vpop.eup %8938 }
 0x671   :  { %v809_v41 = vadd.f32 1.0, %v8939_v39 }
 0x673   :  { %8944 = vrcp.f32 %v809_v41 }
 0x674   :  { %v8941_v42 = vpop.eup %8940  ;;  %8946 = vtanh.f32 %v704_v36 }
 0x675   :  { %v784_v44 = vadd.f32 1.0, %v8941_v42  ;;  %v8943_v45 = vpop.eup %8942 }
 0x677   :  { %8948 = vrcp.f32 %v784_v44 }
 0x680   :  { %v8945_v46 = vpop.eup %8944 }
 0x681   :  { %v812_v47 = vsel %vm9362_vm3, %v8943_v45, %v8945_v46  ;;  %v8947_v48 = vpop.eup %8946 }
 0x682   :  { %815 = vrot.lane.b32.xlu0 %v812_v47, %s9125_s6  ;;  %v813_v56 = vmul.f32 %v812_v47, %v9431_v57  ;;  %v74_v57 = vld [vmem:[%s11993_s2 + $0x8] sm:$0x3] }
 0x684   :  { %v8949_v49 = vpop.eup %8948 }
 0x685   :  { %v787_v50 = vsel %vm9362_vm3, %v8947_v48, %v8949_v49 }
 0x686   :  { %790 = vrot.lane.b32.xlu0 %v787_v50, %s9125_s6  ;;  %v788_v62 = vmul.f32 %v787_v50, %v9435_v61 }
 0x6f4   :  { %v816_v51 = vpop.permute.xlu0 %815 }
 0x6f5   :  { %v818_v52 = vmul.f32 %v816_v51, %v812_v47 }
 0x6f7   :  { %820 = vrot.lane.b32.xlu1 %v818_v52, %s9126_s30 }
 0x6f8   :  { %v791_v53 = vpop.permute.xlu0 %790 }
 0x6f9   :  { %v793_v54 = vmul.f32 %v791_v53, %v787_v50 }
 0x6fb   :  { %795 = vrot.lane.b32.xlu1 %v793_v54, %s9126_s30 }
 0x769   :  { %v821_v59 = vpop.permute.xlu1 %820 }
 0x76a   :  { %v9489_v60 = vadd.f32 %v821_v59, %v813_v56 }
 0x76c   :  { %8950 = vtanh.f32 %v9489_v60 }
 0x76d   :  { %v796_v63 = vpop.permute.xlu1 %795 }
 0x76e   :  { %v9493_v55 = vadd.f32 %v796_v63, %v788_v62 }
 0x770   :  { %8952 = vtanh.f32 %v9493_v55 }
 0x779   :  { %v8951_v9 = vpop.eup %8950 }
 0x77a   :  { %826 = vrot.lane.b32.xlu0 %v8951_v9, %s9125_s6 }
 0x77d   :  { %v8953_v10 = vpop.eup %8952 }
 0x77e   :  { %801 = vrot.lane.b32.xlu0 %v8953_v10, %s9125_s6 }
 0x782   :  { %101 = vperm.xlu0 %8904, %v74_v57  }
 0x7ec   :  { %v827_v58 = vpop.permute.xlu0 %826 }
 0x7ed   :  { %v829_v11 = vmul.f32 %v827_v58, %v812_v47 }
 0x7ef   :  { %837 = vrot.lane.b32.xlu1 %v829_v11, %s9126_s30 }
 0x7f0   :  { %v802_v61 = vpop.permute.xlu0 %801 }
 0x7f1   :  { %v804_v16 = vmul.f32 %v802_v61, %v787_v50 }
 0x7f3   :  { %831 = vrot.lane.b32.xlu1 %v804_v16, %s9126_s30 }
 0x7f7   :  { %96 = vperm.xlu1 %8905, %v73_v17  }
 0x7fd   :  { %v102_v18 = vpop.permute.xlu0 %101 }
 0x7fe   :  { %v129_v19 = vmul.f32 %v9336_v12, %v102_v18  ;;  %v167_v20 = vmul.f32 %v9341_v13, %v102_v18 }
 0x800   :  { %v144_v21 = vadd.f32 %v9346_v14, %v129_v19  ;;  %v182_v22 = vadd.f32 %v9351_v15, %v167_v20 }
 0x802   :  { %152 = vst [vmem:[#allocation2 + $0x8] sm:$0x3] %v144_v21  ;;  %190 = vst [vmem:[#allocation3 + $0x8] sm:$0x3] %v182_v22 }
 0x809   :  { %v918_v30 = vld [vmem:[#allocation3 + $0x8] sm:$0x3]  ;;  %v1055_v20 = vld [vmem:[#allocation2 + $0x8] sm:$0x3] }
 0x861   :  { %v838_v23 = vpop.permute.xlu1 %837 }
 0x862   :  { %841 = vst.msk [vmem:[#allocation5 + $0xa] sm:$0x3] %vm410_vm4, %v838_v23  ;;  %8605 = vmatmul.mubr.msk.f32.vlgmr.msra.gmra.mxu1 %vm208_vm5, %v838_v23 }
 0x863   :  { %8619 = vmatpush3.msra.mxu1 %v9253_v2  ;;  %8626 = vmatprep.mubr.msk.f32.mxu1 %vm9123_vm0, %v9122_v0 }
 0x864   :  { %8620 = vmatprep.subr.mxu1 %v9122_v0 }
 0x865   :  { %v832_v24 = vpop.permute.xlu1 %831  ;;  %8621 = vmatpush3.msra.mxu1 %v9265_v4 }
 0x866   :  { %835 = vst.msk [vmem:[#allocation4 + $0x4] sm:$0x3] %vm410_vm4, %v832_v24  ;;  %8594 = vmatmul.mubr.msk.f32.vlgmr.msra.gmra.mxu0 %vm208_vm5, %v832_v24  ;;  %8622 = vmatprep.subr.mxu1 %v9122_v0 }
 0x867   :  { %8608 = vmatpush3.msra.mxu0 %v9248_v1  ;;  %8623 = vmatpush3.msra.mxu1 %v9277_v6 }
 0x868   :  { %8609 = vmatprep.subr.mxu0 %v9122_v0  ;;  %8624 = vmatprep.subr.mxu1 %v9122_v0 }
 0x869   :  { %8610 = vmatpush3.msra.mxu0 %v9258_v3  ;;  %8625 = vmatpush3.msra.mxu1 %v9293_v8 }
 0x86a   :  { %8611 = vmatprep.subr.mxu0 %v9122_v0  ;;  %8615 = vmatprep.mubr.msk.f32.mxu0 %vm9123_vm0, %v9122_v0 }
 0x86b   :  { %8612 = vmatpush3.msra.mxu0 %v9272_v5  ;;  %8640 = vmatprep.subr.mxu1 %v9122_v0 }
 0x86c   :  { %8613 = vmatprep.subr.mxu0 %v9122_v0 }
 0x86d   :  { %8614 = vmatpush3.msra.mxu0 %v9286_v7 }
 0x86e   :  { %8629 = vmatprep.subr.mxu0 %v9122_v0 }
 0x872   :  { %v97_v25 = vpop.permute.xlu1 %96 }
 0x873   :  { %v128_v26 = vmul.f32 %v9336_v12, %v97_v25  ;;  %v166_v27 = vmul.f32 %v9341_v13, %v97_v25 }
 0x875   :  { %v143_v28 = vadd.f32 %v9346_v14, %v128_v26  ;;  %v181_v29 = vadd.f32 %v9351_v15, %v166_v27 }
 0x877   :  { %151 = vst [vmem:[#allocation2 + $0x6] sm:$0x3] %v143_v28  ;;  %189 = vst [vmem:[#allocation3 + $0x6] sm:$0x3] %v181_v29 }
 0x87e   :  { %v843_v35 = vld [vmem:[#allocation2 + $0x6] sm:$0x3]  ;;  %v1130_v61 = vld [vmem:[#allocation3 + $0x6] sm:$0x3] }
 0x922   :  { %v987_v31 = vpop.f32.mrf.mxu1 }
 0x923   :  { %v991_v32 = vadd.f32 %v987_v31, %v918_v30 }
 0x924   :  { %v8606_v33 = vpop.f32.mrf.mxu1 }
 0x925   :  { %v7939_v34 = vmul.f32 -1.442695, %v991_v32 }
 0x926   :  { %v912_v36 = vpop.f32.mrf.mxu0 }
 0x927   :  { %8954 = vpow2.f32 %v7939_v34  ;;  %v916_v37 = vadd.f32 %v912_v36, %v843_v35 }
 0x928   :  { %v8595_v38 = vpop.f32.mrf.mxu0 }
 0x929   :  { %v7938_v39 = vmul.f32 -1.442695, %v916_v37 }
 0x92b   :  { %8956 = vpow2.f32 %v7938_v39 }
 0x92c   :  { %8958 = vtanh.f32 %v991_v32 }
 0x934   :  { %v8955_v12 = vpop.eup %8954 }
 0x935   :  { %v1021_v13 = vadd.f32 1.0, %v8955_v12 }
 0x937   :  { %8960 = vrcp.f32 %v1021_v13 }
 0x938   :  { %v8957_v14 = vpop.eup %8956  ;;  %8962 = vtanh.f32 %v916_v37 }
 0x939   :  { %v996_v15 = vadd.f32 1.0, %v8957_v14  ;;  %v8959_v41 = vpop.eup %8958 }
 0x93b   :  { %8964 = vrcp.f32 %v996_v15 }
 0x944   :  { %v8961_v42 = vpop.eup %8960 }
 0x945   :  { %v1024_v44 = vsel %vm9362_vm3, %v8959_v41, %v8961_v42  ;;  %v8963_v45 = vpop.eup %8962 }
 0x946   :  { %1027 = vrot.lane.b32.xlu0 %v1024_v44, %s9125_s6  ;;  %v1025_v52 = vmul.f32 %v1024_v44, %v9489_v60 }
 0x948   :  { %v8965_v46 = vpop.eup %8964 }
 0x949   :  { %v999_v47 = vsel %vm9362_vm3, %v8963_v45, %v8965_v46 }
 0x94a   :  { %1002 = vrot.lane.b32.xlu0 %v999_v47, %s9125_s6  ;;  %v1000_v56 = vmul.f32 %v999_v47, %v9493_v55 }
 0x9b8   :  { %v1028_v48 = vpop.permute.xlu0 %1027 }
 0x9b9   :  { %v1030_v49 = vmul.f32 %v1028_v48, %v1024_v44 }
 0x9bb   :  { %1032 = vrot.lane.b32.xlu1 %v1030_v49, %s9126_s30 }
 0x9bc   :  { %v1003_v50 = vpop.permute.xlu0 %1002 }
 0x9bd   :  { %v1005_v51 = vmul.f32 %v1003_v50, %v999_v47 }
 0x9bf   :  { %1007 = vrot.lane.b32.xlu1 %v1005_v51, %s9126_s30 }
 0xa2d   :  { %v1033_v53 = vpop.permute.xlu1 %1032 }
 0xa2e   :  { %v9547_v54 = vadd.f32 %v1033_v53, %v1025_v52 }
 0xa30   :  { %8966 = vtanh.f32 %v9547_v54 }
 0xa31   :  { %v1008_v59 = vpop.permute.xlu1 %1007 }
 0xa32   :  { %v9551_v62 = vadd.f32 %v1008_v59, %v1000_v56 }
 0xa34   :  { %8968 = vtanh.f32 %v9551_v62 }
 0xa3d   :  { %v8967_v63 = vpop.eup %8966 }
 0xa3e   :  { %1038 = vrot.lane.b32.xlu0 %v8967_v63, %s9125_s6 }
 0xa41   :  { %v8969_v9 = vpop.eup %8968 }
 0xa42   :  { %1013 = vrot.lane.b32.xlu0 %v8969_v9, %s9125_s6 }
 0xab0   :  { %v1039_v10 = vpop.permute.xlu0 %1038 }
 0xab1   :  { %v1041_v60 = vmul.f32 %v1039_v10, %v1024_v44 }
 0xab3   :  { %1049 = vrot.lane.b32.xlu1 %v1041_v60, %s9126_s30 }
 0xab4   :  { %v1014_v57 = vpop.permute.xlu0 %1013 }
 0xab5   :  { %v1016_v58 = vmul.f32 %v1014_v57, %v999_v47 }
 0xab7   :  { %1043 = vrot.lane.b32.xlu1 %v1016_v58, %s9126_s30 }
 0xb25   :  { %v1050_v55 = vpop.permute.xlu1 %1049 }
 0xb26   :  { %1053 = vst.msk [vmem:[#allocation5 + $0x8] sm:$0x3] %vm410_vm4, %v1050_v55  ;;  %8627 = vmatmul.mubr.msk.f32.vlgmr.msra.gmra.mxu1 %vm208_vm5, %v1050_v55 }
 0xb27   :  { %8641 = vmatpush3.msra.mxu1 %v9253_v2  ;;  %8648 = vmatprep.mubr.msk.f32.mxu1 %vm9123_vm0, %v9122_v0 }
 0xb28   :  { %8642 = vmatprep.subr.mxu1 %v9122_v0 }
 0xb29   :  { %v1044_v11 = vpop.permute.xlu1 %1043  ;;  %8643 = vmatpush3.msra.mxu1 %v9265_v4 }
 0xb2a   :  { %1047 = vst.msk [vmem:[#allocation4 + $0x6] sm:$0x3] %vm410_vm4, %v1044_v11  ;;  %8616 = vmatmul.mubr.msk.f32.vlgmr.msra.gmra.mxu0 %vm208_vm5, %v1044_v11  ;;  %8644 = vmatprep.subr.mxu1 %v9122_v0 }
 0xb2b   :  { %8630 = vmatpush3.msra.mxu0 %v9248_v1  ;;  %8645 = vmatpush3.msra.mxu1 %v9277_v6 }
 0xb2c   :  { %8631 = vmatprep.subr.mxu0 %v9122_v0  ;;  %8646 = vmatprep.subr.mxu1 %v9122_v0 }
 0xb2d   :  { %8632 = vmatpush3.msra.mxu0 %v9258_v3  ;;  %8647 = vmatpush3.msra.mxu1 %v9293_v8 }
 0xb2e   :  { %8633 = vmatprep.subr.mxu0 %v9122_v0  ;;  %8637 = vmatprep.mubr.msk.f32.mxu0 %vm9123_vm0, %v9122_v0 }
 0xb2f   :  { %8634 = vmatpush3.msra.mxu0 %v9272_v5  ;;  %8662 = vmatprep.subr.mxu1 %v9122_v0 }
 0xb30   :  { %8635 = vmatprep.subr.mxu0 %v9122_v0 }
 0xb31   :  { %8636 = vmatpush3.msra.mxu0 %v9286_v7 }
 0xb32   :  { %8651 = vmatprep.subr.mxu0 %v9122_v0 }
 0xbe6   :  { %v1199_v16 = vpop.f32.mrf.mxu1 }
 0xbe7   :  { %v1203_v17 = vadd.f32 %v1199_v16, %v1130_v61 }
 0xbe8   :  { %v8628_v18 = vpop.f32.mrf.mxu1 }
 0xbe9   :  { %v7943_v19 = vmul.f32 -1.442695, %v1203_v17 }
 0xbea   :  { %v1124_v21 = vpop.f32.mrf.mxu0 }
 0xbeb   :  { %8970 = vpow2.f32 %v7943_v19  ;;  %v1128_v22 = vadd.f32 %v1124_v21, %v1055_v20 }
 0xbec   :  { %v8617_v23 = vpop.f32.mrf.mxu0 }
 0xbed   :  { %v7942_v24 = vmul.f32 -1.442695, %v1128_v22 }
 0xbef   :  { %8972 = vpow2.f32 %v7942_v24 }
 0xbf0   :  { %8974 = vtanh.f32 %v1203_v17 }
 0xbf8   :  { %v8971_v25 = vpop.eup %8970 }
 0xbf9   :  { %v1233_v26 = vadd.f32 1.0, %v8971_v25 }
 0xbfb   :  { %8976 = vrcp.f32 %v1233_v26 }
 0xbfc   :  { %v8973_v27 = vpop.eup %8972  ;;  %8978 = vtanh.f32 %v1128_v22 }
 0xbfd   :  { %v1208_v28 = vadd.f32 1.0, %v8973_v27  ;;  %v8975_v29 = vpop.eup %8974 }
 0xbff   :  { %8980 = vrcp.f32 %v1208_v28 }
 0xc08   :  { %v8977_v30 = vpop.eup %8976 }
 0xc09   :  { %v1236_v31 = vsel %vm9362_vm3, %v8975_v29, %v8977_v30  ;;  %v8979_v32 = vpop.eup %8978  ;;  %v9114_v29 = vld [vmem:[%s11992_s28 + $0x18] sm:$0xff] }
 0xc0a   :  { %1239 = vrot.lane.b32.xlu0 %v1236_v31, %s9125_s6  ;;  %v1237_v39 = vmul.f32 %v1236_v31, %v9547_v54 }
 0xc0c   :  { %v8981_v33 = vpop.eup %8980 }
 0xc0d   :  { %v1211_v34 = vsel %vm9362_vm3, %v8979_v32, %v8981_v33  ;;  %v9116_v32 = vld [vmem:[%s11991_s26 + $0x18] sm:$0xff]  ;;  %v9117_v33 = vld [vmem:[%s11992_s28 + $0x8] sm:$0xff] }
 0xc0e   :  { %1214 = vrot.lane.b32.xlu0 %v1211_v34, %s9125_s6  ;;  %v1212_v14 = vmul.f32 %v1211_v34, %v9551_v62 }
 0xc7c   :  { %v1240_v35 = vpop.permute.xlu0 %1239 }
 0xc7d   :  { %v1242_v36 = vmul.f32 %v1240_v35, %v1236_v31  ;;  %v9119_v35 = vld [vmem:[%s11992_s28] sm:$0xff] }
 0xc7f   :  { %1244 = vrot.lane.b32.xlu1 %v1242_v36, %s9126_s30  ;;  %v9120_v36 = vld [vmem:[%s11991_s26 + $0x8] sm:$0xff] }
 0xc80   :  { %v1215_v37 = vpop.permute.xlu0 %1214 }
 0xc81   :  { %v1217_v38 = vmul.f32 %v1215_v37, %v1211_v34  ;;  %v9121_v37 = vld [vmem:[%s11991_s26] sm:$0xff] }
 0xc83   :  { %1219 = vrot.lane.b32.xlu1 %v1217_v38, %s9126_s30  ;;  %v1554_v38 = vld [vmem:[#allocation3 + $0x2] sm:$0x3] }
 0xcf1   :  { %v1245_v12 = vpop.permute.xlu1 %1244 }
 0xcf2   :  { %v9591_v13 = vadd.f32 %v1245_v12, %v1237_v39 }
 0xcf4   :  { %8982 = vtanh.f32 %v9591_v13 }
 0xcf5   :  { %v1220_v15 = vpop.permute.xlu1 %1219 }
 0xcf6   :  { %v9595_v41 = vadd.f32 %v1220_v15, %v1212_v14  ;;  %v1479_v15 = vld [vmem:[#allocation2 + $0xc] sm:$0x3] }
 0xcf8   :  { %8984 = vtanh.f32 %v9595_v41 }
 0xd01   :  { %v8983_v42 = vpop.eup %8982 }
 0xd02   :  { %1250 = vrot.lane.b32.xlu0 %v8983_v42, %s9125_s6 }
 0xd05   :  { %v8985_v44 = vpop.eup %8984 }
 0xd06   :  { %1225 = vrot.lane.b32.xlu0 %v8985_v44, %s9125_s6 }
 0xd74   :  { %v1251_v45 = vpop.permute.xlu0 %1250 }
 0xd75   :  { %v1253_v46 = vmul.f32 %v1251_v45, %v1236_v31  ;;  %v9115_v31 = vld [vmem:[%s11992_s28 + $0x10] sm:$0xff] }
 0xd77   :  { %1261 = vrot.lane.b32.xlu1 %v1253_v46, %s9126_s30 }
 0xd78   :  { %v1226_v47 = vpop.permute.xlu0 %1225 }
 0xd79   :  { %v1228_v48 = vmul.f32 %v1226_v47, %v1211_v34  ;;  %v9118_v34 = vld [vmem:[%s11991_s26 + $0x10] sm:$0xff] }
 0xd7b   :  { %1255 = vrot.lane.b32.xlu1 %v1228_v48, %s9126_s30 }
 0xde9   :  { %v1262_v49 = vpop.permute.xlu1 %1261 }
 0xdea   :  { %1265 = vst.msk [vmem:[#allocation5 + $0x6] sm:$0x3] %vm410_vm4, %v1262_v49  ;;  %8649 = vmatmul.mubr.msk.f32.vlgmr.msra.gmra.mxu1 %vm208_vm5, %v1262_v49 }
 0xdeb   :  { %8663 = vmatpush3.msra.mxu1 %v9253_v2  ;;  %8670 = vmatprep.mubr.msk.f32.mxu1 %vm9123_vm0, %v9122_v0 }
 0xdec   :  { %8664 = vmatprep.subr.mxu1 %v9122_v0 }
 0xded   :  { %v1256_v50 = vpop.permute.xlu1 %1255  ;;  %8665 = vmatpush3.msra.mxu1 %v9265_v4 }
 0xdee   :  { %1259 = vst.msk [vmem:[#allocation4 + $0x8] sm:$0x3] %vm410_vm4, %v1256_v50  ;;  %8638 = vmatmul.mubr.msk.f32.vlgmr.msra.gmra.mxu0 %vm208_vm5, %v1256_v50  ;;  %8666 = vmatprep.subr.mxu1 %v9122_v0 }
 0xdef   :  { %8652 = vmatpush3.msra.mxu0 %v9248_v1  ;;  %8667 = vmatpush3.msra.mxu1 %v9277_v6  ;;  %v1342_v1 = vld [vmem:[#allocation3 + $0x4] sm:$0x3] }
 0xdf0   :  { %8653 = vmatprep.subr.mxu0 %v9122_v0  ;;  %8668 = vmatprep.subr.mxu1 %v9122_v0 }
 0xdf1   :  { %8654 = vmatpush3.msra.mxu0 %v9258_v3  ;;  %8669 = vmatpush3.msra.mxu1 %v9293_v8  ;;  %v1267_v8 = vld [vmem:[#allocation2 + $0xa] sm:$0x3] }
 0xdf2   :  { %8655 = vmatprep.subr.mxu0 %v9122_v0  ;;  %8659 = vmatprep.mubr.msk.f32.mxu0 %vm9123_vm0, %v9122_v0 }
 0xdf3   :  { %8656 = vmatpush3.msra.mxu0 %v9272_v5  ;;  %8684 = vmatprep.subr.mxu1 %v9122_v0 }
 0xdf4   :  { %8657 = vmatprep.subr.mxu0 %v9122_v0 }
 0xdf5   :  { %8658 = vmatpush3.msra.mxu0 %v9286_v7 }
 0xdf6   :  { %8673 = vmatprep.subr.mxu0 %v9122_v0 }
 0xeaa   :  { %v1411_v2 = vpop.f32.mrf.mxu1 }
 0xeab   :  { %v1415_v3 = vadd.f32 %v1411_v2, %v1342_v1 }
 0xeac   :  { %v8650_v4 = vpop.f32.mrf.mxu1 }
 0xead   :  { %v7947_v6 = vmul.f32 -1.442695, %v1415_v3 }
 0xeae   :  { %v1336_v51 = vpop.f32.mrf.mxu0 }
 0xeaf   :  { %8986 = vpow2.f32 %v7947_v6  ;;  %v1340_v52 = vadd.f32 %v1336_v51, %v1267_v8 }
 0xeb0   :  { %v8639_v53 = vpop.f32.mrf.mxu0 }
 0xeb1   :  { %v7946_v54 = vmul.f32 -1.442695, %v1340_v52 }
 0xeb3   :  { %8988 = vpow2.f32 %v7946_v54 }
 0xeb4   :  { %8990 = vtanh.f32 %v1415_v3 }
 0xebc   :  { %v8987_v5 = vpop.eup %8986 }
 0xebd   :  { %v1445_v56 = vadd.f32 1.0, %v8987_v5 }
 0xebf   :  { %8992 = vrcp.f32 %v1445_v56 }
 0xec0   :  { %v8989_v59 = vpop.eup %8988  ;;  %8994 = vtanh.f32 %v1340_v52 }
 0xec1   :  { %v1420_v7 = vadd.f32 1.0, %v8989_v59  ;;  %v8991_v62 = vpop.eup %8990 }
 0xec3   :  { %8996 = vrcp.f32 %v1420_v7 }
 0xecc   :  { %v8993_v63 = vpop.eup %8992 }
 0xecd   :  { %v1448_v9 = vsel %vm9362_vm3, %v8991_v62, %v8993_v63  ;;  %v8995_v10 = vpop.eup %8994 }
 0xece   :  { %1451 = vrot.lane.b32.xlu0 %v1448_v9, %s9125_s6  ;;  %v1449_v16 = vmul.f32 %v1448_v9, %v9591_v13 }
 0xed0   :  { %v8997_v60 = vpop.eup %8996 }
 0xed1   :  { %v1423_v57 = vsel %vm9362_vm3, %v8995_v10, %v8997_v60 }
 0xed2   :  { %1426 = vrot.lane.b32.xlu0 %v1423_v57, %s9125_s6  ;;  %v1424_v19 = vmul.f32 %v1423_v57, %v9595_v41 }
 0xf40   :  { %v1452_v58 = vpop.permute.xlu0 %1451 }
 0xf41   :  { %v1454_v55 = vmul.f32 %v1452_v58, %v1448_v9 }
 0xf43   :  { %1456 = vrot.lane.b32.xlu1 %v1454_v55, %s9126_s30 }
 0xf44   :  { %v1427_v11 = vpop.permute.xlu0 %1426 }
 0xf45   :  { %v1429_v61 = vmul.f32 %v1427_v11, %v1423_v57 }
 0xf47   :  { %1431 = vrot.lane.b32.xlu1 %v1429_v61, %s9126_s30  ;;  %v1765_v61 = vld [vmem:[#allocation3] sm:$0x3] }
 0xfb5   :  { %v1457_v17 = vpop.permute.xlu1 %1456 }
 0xfb6   :  { %v9635_v18 = vadd.f32 %v1457_v17, %v1449_v16 }
 0xfb8   :  { %8998 = vtanh.f32 %v9635_v18 }
 0xfb9   :  { %v1432_v20 = vpop.permute.xlu1 %1431 }
 0xfba   :  { %v9639_v21 = vadd.f32 %v1432_v20, %v1424_v19  ;;  %v1691_v20 = vld [vmem:[#allocation2 + $0xe] sm:$0x3] }
 0xfbc   :  { %9000 = vtanh.f32 %v9639_v21 }
 0xfc5   :  { %v8999_v22 = vpop.eup %8998 }
 0xfc6   :  { %1462 = vrot.lane.b32.xlu0 %v8999_v22, %s9125_s6 }
 0xfc9   :  { %v9001_v23 = vpop.eup %9000 }
 0xfca   :  { %1437 = vrot.lane.b32.xlu0 %v9001_v23, %s9125_s6 }
0x1038   :  { %v1463_v24 = vpop.permute.xlu0 %1462 }
0x1039   :  { %v1465_v25 = vmul.f32 %v1463_v24, %v1448_v9 }
0x103b   :  { %1473 = vrot.lane.b32.xlu1 %v1465_v25, %s9126_s30 }
0x103c   :  { %v1438_v26 = vpop.permute.xlu0 %1437 }
0x103d   :  { %v1440_v27 = vmul.f32 %v1438_v26, %v1423_v57 }
0x103f   :  { %1467 = vrot.lane.b32.xlu1 %v1440_v27, %s9126_s30 }
0x10ad   :  { %v1474_v28 = vpop.permute.xlu1 %1473 }
0x10ae   :  { %1477 = vst.msk [vmem:[#allocation5 + $0x4] sm:$0x3] %vm410_vm4, %v1474_v28  ;;  %8671 = vmatmul.mubr.msk.f32.vlgmr.msra.gmra.mxu1 %vm208_vm5, %v1474_v28 }
0x10af   :  { %8685 = vmatpush3.msra.mxu1 %v9114_v29  ;;  %8692 = vmatprep.mubr.msk.f32.mxu1 %vm9123_vm0, %v9122_v0 }
0x10b0   :  { %8686 = vmatprep.subr.mxu1 %v9122_v0 }
0x10b1   :  { %v1468_v30 = vpop.permute.xlu1 %1467  ;;  %8687 = vmatpush3.msra.mxu1 %v9115_v31 }
0x10b2   :  { %1471 = vst.msk [vmem:[#allocation4 + $0xa] sm:$0x3] %vm410_vm4, %v1468_v30  ;;  %8660 = vmatmul.mubr.msk.f32.vlgmr.msra.gmra.mxu0 %vm208_vm5, %v1468_v30  ;;  %8688 = vmatprep.subr.mxu1 %v9122_v0 }
0x10b3   :  { %8674 = vmatpush3.msra.mxu0 %v9116_v32  ;;  %8689 = vmatpush3.msra.mxu1 %v9117_v33 }
0x10b4   :  { %8675 = vmatprep.subr.mxu0 %v9122_v0  ;;  %8690 = vmatprep.subr.mxu1 %v9122_v0 }
0x10b5   :  { %8676 = vmatpush3.msra.mxu0 %v9118_v34  ;;  %8691 = vmatpush3.msra.mxu1 %v9119_v35 }
0x10b6   :  { %8677 = vmatprep.subr.mxu0 %v9122_v0  ;;  %8681 = vmatprep.mubr.msk.f32.mxu0 %vm9123_vm0, %v9122_v0 }
0x10b7   :  { %8678 = vmatpush3.msra.mxu0 %v9120_v36  ;;  %8695 = vmatprep.subr.mxu1 %v9122_v0 }
0x10b8   :  { %8679 = vmatprep.subr.mxu0 %v9122_v0 }
0x10b9   :  { %8680 = vmatpush3.msra.mxu0 %v9121_v37 }
0x116e   :  { %v1623_v39 = vpop.f32.mrf.mxu1 }
0x116f   :  { %v1627_v12 = vadd.f32 %v1623_v39, %v1554_v38 }
0x1170   :  { %v8672_v13 = vpop.f32.mrf.mxu1 }
0x1171   :  { %v7951_v14 = vmul.f32 -1.442695, %v1627_v12 }
0x1172   :  { %v1548_v41 = vpop.f32.mrf.mxu0 }
0x1173   :  { %9002 = vpow2.f32 %v7951_v14  ;;  %v1552_v42 = vadd.f32 %v1548_v41, %v1479_v15 }
0x1174   :  { %v8661_v44 = vpop.f32.mrf.mxu0 }
0x1175   :  { %v7950_v45 = vmul.f32 -1.442695, %v1552_v42 }
0x1177   :  { %9004 = vpow2.f32 %v7950_v45  ;;  %v1911_v45 = vld [vmem:[#allocation5 + $0x6] sm:$0x3] }
0x1178   :  { %9006 = vtanh.f32 %v1627_v12 }
0x1180   :  { %v9003_v46 = vpop.eup %9002 }
0x1181   :  { %v1657_v47 = vadd.f32 1.0, %v9003_v46  ;;  %v1912_v46 = vld [vmem:[#allocation5 + $0x8] sm:$0x3] }
0x1183   :  { %9008 = vrcp.f32 %v1657_v47  ;;  %v1914_v47 = vld [vmem:[#allocation5 + $0xc] sm:$0x3] }
0x1184   :  { %v9005_v48 = vpop.eup %9004  ;;  %9010 = vtanh.f32 %v1552_v42 }
0x1185   :  { %v1632_v49 = vadd.f32 1.0, %v9005_v48  ;;  %v9007_v50 = vpop.eup %9006 }
0x1187   :  { %9012 = vrcp.f32 %v1632_v49 }
0x1190   :  { %v9009_v1 = vpop.eup %9008 }
0x1191   :  { %v1660_v2 = vsel %vm9362_vm3, %v9007_v50, %v9009_v1  ;;  %v9011_v3 = vpop.eup %9010  ;;  %v1971_v50 = vld [vmem:[%s11967_s7 + $0x78] sm:$0xff]  ;;  %v1970_v1 = vld [vmem:[%s11967_s7 + $0x70] sm:$0xff] }
0x1192   :  { %1663 = vrot.lane.b32.xlu0 %v1660_v2, %s9125_s6  ;;  %v1661_v54 = vmul.f32 %v1660_v2, %v9635_v18  ;;  %2047 = vmatprep.subr.mxu0 %v1971_v50 }
0x1194   :  { %v9013_v4 = vpop.eup %9012 }
0x1195   :  { %v1635_v6 = vsel %vm9362_vm3, %v9011_v3, %v9013_v4  ;;  %v1968_v3 = vld [vmem:[%s11967_s7 + $0x60] sm:$0xff]  ;;  %v1967_v4 = vld [vmem:[%s11967_s7 + $0x58] sm:$0xff] }
0x1196   :  { %1638 = vrot.lane.b32.xlu0 %v1635_v6, %s9125_s6  ;;  %v1636_v59 = vmul.f32 %v1635_v6, %v9639_v21 }
0x1204   :  { %v1664_v8 = vpop.permute.xlu0 %1663 }
0x1205   :  { %v1666_v51 = vmul.f32 %v1664_v8, %v1660_v2  ;;  %v1965_v8 = vld [vmem:[%s11967_s7 + $0x48] sm:$0xff] }
0x1207   :  { %1668 = vrot.lane.b32.xlu1 %v1666_v51, %s9126_s30  ;;  %v1964_v51 = vld [vmem:[%s11967_s7 + $0x40] sm:$0xff] }
0x1208   :  { %v1639_v52 = vpop.permute.xlu0 %1638 }
0x1209   :  { %v1641_v53 = vmul.f32 %v1639_v52, %v1635_v6  ;;  %v1963_v52 = vld [vmem:[%s11967_s7 + $0x38] sm:$0xff] }
0x120b   :  { %1643 = vrot.lane.b32.xlu1 %v1641_v53, %s9126_s30  ;;  %v1962_v53 = vld [vmem:[%s11967_s7 + $0x30] sm:$0xff] }
0x1279   :  { %v1669_v5 = vpop.permute.xlu1 %1668 }
0x127a   :  { %v1671_v56 = vadd.f32 %v1669_v5, %v1661_v54  ;;  %v1961_v5 = vld [vmem:[%s11967_s7 + $0x28] sm:$0xff] }
0x127c   :  { %9014 = vtanh.f32 %v1671_v56 }
0x127d   :  { %v1644_v7 = vpop.permute.xlu1 %1643 }
0x127e   :  { %v1646_v62 = vadd.f32 %v1644_v7, %v1636_v59  ;;  %v1959_v59 = vld [vmem:[%s11967_s7 + $0x18] sm:$0xff]  ;;  %v1958_v7 = vld [vmem:[%s11967_s7 + $0x10] sm:$0xff] }
0x1280   :  { %9016 = vtanh.f32 %v1646_v62 }
0x1289   :  { %v9015_v63 = vpop.eup %9014 }
0x128a   :  { %1674 = vrot.lane.b32.xlu0 %v9015_v63, %s9125_s6  ;;  %v1956_v63 = vld [vmem:[%s11967_s7] sm:$0xff] }
0x128d   :  { %v9017_v9 = vpop.eup %9016 }
0x128e   :  { %1649 = vrot.lane.b32.xlu0 %v9017_v9, %s9125_s6 }
0x12fc   :  { %v1675_v10 = vpop.permute.xlu0 %1674 }
0x12fd   :  { %v1677_v60 = vmul.f32 %v1675_v10, %v1660_v2  ;;  %v1969_v2 = vld [vmem:[%s11967_s7 + $0x68] sm:$0xff] }
0x12ff   :  { %1685 = vrot.lane.b32.xlu1 %v1677_v60, %s9126_s30  ;;  %v1910_v60 = vld [vmem:[#allocation5 + $0x4] sm:$0x3] }
0x1300   :  { %v1650_v57 = vpop.permute.xlu0 %1649 }
0x1301   :  { %v1652_v58 = vmul.f32 %v1650_v57, %v1635_v6  ;;  %v1966_v6 = vld [vmem:[%s11967_s7 + $0x50] sm:$0xff] }
0x1303   :  { %1679 = vrot.lane.b32.xlu1 %v1652_v58, %s9126_s30  ;;  %v1913_v58 = vld [vmem:[#allocation5 + $0xa] sm:$0x3] }
0x1371   :  { %v1686_v55 = vpop.permute.xlu1 %1685 }
0x1372   :  { %1689 = vst.msk [vmem:[#allocation5 + $0x2] sm:$0x3] %vm410_vm4, %v1686_v55  ;;  %8693 = vmatmul.mubr.msk.f32.vlgmr.msra.gmra.mxu1 %vm208_vm5, %v1686_v55  ;;  %v1915_v55 = vld [vmem:[#allocation5 + $0xe] sm:$0x3] }
0x1373   :  { %8697 = vmatprep.mubr.msk.f32.mxu1 %vm9123_vm0, %v9122_v0 }
0x1375   :  { %v1680_v11 = vpop.permute.xlu1 %1679 }
0x1376   :  { %1683 = vst.msk [vmem:[#allocation4 + $0xc] sm:$0x3] %vm410_vm4, %v1680_v11  ;;  %8682 = vmatmul.mubr.msk.f32.vlgmr.msra.gmra.mxu0 %vm208_vm5, %v1680_v11 }
0x1377   :  { %2095 = vmatprep.mubr.f32.mxu0 %v9122_v0  ;;  %2048 = vmatpush1.msra.mxu0 %v1970_v1  ;;  %v1972_v1 = vld [vmem:[%s11968_s8] sm:$0x3]  ;;  %s9128_s8 = smov 96  }
0x1378   :  { %2049 = vmatprep.subr.mxu0 %v1969_v2 }
0x1379   :  { %v1909_v44 = vld [vmem:[#allocation5 + $0x2] sm:$0x3]  ;;  %2050 = vmatpush1.msra.mxu0 %v1968_v3 }
0x137a   :  { %2051 = vmatprep.subr.mxu0 %v1967_v4 }
0x137b   :  { %2052 = vmatpush1.msra.mxu0 %v1966_v6 }
0x137c   :  { %2053 = vmatprep.subr.mxu0 %v1965_v8 }
0x137d   :  { %2054 = vmatpush1.msra.mxu0 %v1964_v51 }
0x137e   :  { %2055 = vmatprep.subr.mxu0 %v1963_v52 }
0x137f   :  { %2056 = vmatpush1.msra.mxu0 %v1962_v53 }
0x1380   :  { %2057 = vmatprep.subr.mxu0 %v1961_v5 }
0x1432   :  { %v1834_v16 = vpop.f32.mrf.mxu1 }
0x1433   :  { %v1838_v17 = vadd.f32 %v1834_v16, %v1765_v61  ;;  %v9127_v61 = vmov 1983009808  }
0x1434   :  { %v8694_v18 = vpop.f32.mrf.mxu1  ;;  %v1995_v16 = vunpack.c.l.s4 %v9127_v61 }
0x1435   :  { %v7955_v19 = vmul.f32 -1.442695, %v1838_v17  ;;  %v1900_v18 = vld [vmem:[#allocation4] sm:$0x3] }
0x1436   :  { %v1760_v21 = vpop.f32.mrf.mxu0 }
0x1437   :  { %9018 = vpow2.f32 %v7955_v19  ;;  %v1764_v22 = vadd.f32 %v1760_v21, %v1691_v20  ;;  %v1996_v19 = vunpack.c.0.s8 %v1995_v16 }
0x1438   :  { %v8683_v23 = vpop.f32.mrf.mxu0 }
0x1439   :  { %v7954_v24 = vmul.f32 -1.442695, %v1764_v22 }
0x143b   :  { %9020 = vpow2.f32 %v7954_v24 }
0x143c   :  { %9022 = vtanh.f32 %v1838_v17  ;;  %v9783_v17 = vshrl.u32 %v202_v40, 7  ;;  %v1902_v40 = vld [vmem:[#allocation4 + $0x4] sm:$0x3] }
0x143e   :  { %v9831_v50 = vsub.s32 0, %v9783_v17 }
0x1440   :  { %v1977_v2 = vrot.slane %v1972_v1, %v9831_v50 }
0x1444   :  { %v9019_v25 = vpop.eup %9018 }
0x1445   :  { %v1868_v26 = vadd.f32 1.0, %v9019_v25  ;;  %v1903_v25 = vld [vmem:[#allocation4 + $0x6] sm:$0x3] }
0x1447   :  { %9024 = vrcp.f32 %v1868_v26  ;;  %v9792_v26 = vsub.s32 %v1996_v19, %v9783_v17 }
0x1448   :  { %v9021_v27 = vpop.eup %9020  ;;  %9026 = vtanh.f32 %v1764_v22  ;;  %v1901_v22 = vld [vmem:[#allocation4 + $0x2] sm:$0x3] }
0x1449   :  { %v1843_v28 = vadd.f32 1.0, %v9021_v27  ;;  %v9023_v29 = vpop.eup %9022 }
0x144b   :  { %9028 = vrcp.f32 %v1843_v28 }
0x1454   :  { %v9025_v30 = vpop.eup %9024 }
0x1455   :  { %v1871_v31 = vsel %vm9362_vm3, %v9023_v29, %v9025_v30  ;;  %v9027_v32 = vpop.eup %9026 }
0x1456   :  { %1874 = vrot.lane.b32.xlu0 %v1871_v31, %s9125_s6  ;;  %v1872_v39 = vmul.f32 %v1871_v31, %v1671_v56  ;;  %v1960_v56 = vld [vmem:[%s11967_s7 + $0x20] sm:$0xff] }
0x1457   :  { %2058 = vmatpush1.msra.mxu0 %v1960_v56 }
0x1458   :  { %v9029_v33 = vpop.eup %9028  ;;  %2059 = vmatprep.subr.mxu0 %v1959_v59 }
0x1459   :  { %v9711_v34 = vsel %vm9362_vm3, %v9027_v32, %v9029_v33  ;;  %2060 = vmatpush1.msra.mxu0 %v1958_v7 }
0x145a   :  { %1849 = vrot.lane.b32.xlu0 %v9711_v34, %s9125_s6  ;;  %v1847_v43 = vmul.f32 %v9711_v34, %v1646_v62  ;;  %v1957_v62 = vld [vmem:[%s11967_s7 + $0x8] sm:$0xff] }
0x145b   :  { %2061 = vmatprep.subr.mxu0 %v1957_v62 }
0x145c   :  { %2062 = vmatpush1.msra.mxu0 %v1956_v63 }
0x145d   :  { %8720 = vmatprep.subr.mxu0 %v9122_v0 }
0x14c8   :  { %v1875_v35 = vpop.permute.xlu0 %1874 }
0x14c9   :  { %v1877_v36 = vmul.f32 %v1875_v35, %v1871_v31 }
0x14cb   :  { %1879 = vrot.lane.b32.xlu1 %v1877_v36, %s9126_s30 }
0x14cc   :  { %v1850_v37 = vpop.permute.xlu0 %1849 }
0x14cd   :  { %v1852_v38 = vmul.f32 %v1850_v37, %v9711_v34  ;;  %v1905_v37 = vld [vmem:[#allocation4 + $0xa] sm:$0x3] }
0x14cf   :  { %1854 = vrot.lane.b32.xlu1 %v1852_v38, %s9126_s30 }
0x153d   :  { %v1880_v12 = vpop.permute.xlu1 %1879 }
0x153e   :  { %v1882_v13 = vadd.f32 %v1880_v12, %v1872_v39  ;;  %v1904_v12 = vld [vmem:[#allocation4 + $0x8] sm:$0x3] }
0x1540   :  { %9030 = vtanh.f32 %v1882_v13 }
0x1541   :  { %v1855_v14 = vpop.permute.xlu1 %1854 }
0x1542   :  { %v1857_v15 = vadd.f32 %v1855_v14, %v1847_v43  ;;  %v1906_v14 = vld [vmem:[#allocation4 + $0xc] sm:$0x3] }
0x1544   :  { %9032 = vtanh.f32 %v1857_v15 }
0x154d   :  { %v9031_v41 = vpop.eup %9030 }
0x154e   :  { %1885 = vrot.lane.b32.xlu0 %v9031_v41, %s9125_s6 }
0x1551   :  { %v9033_v42 = vpop.eup %9032 }
0x1552   :  { %1860 = vrot.lane.b32.xlu0 %v9033_v42, %s9125_s6 }
0x1556   :  { %1926 = vrot.lane.b32.xlu0 %v1909_v44, %s9126_s30 }
0x155a   :  { %1930 = vrot.lane.b32.xlu0 %v1911_v45, %s9126_s30 }
0x155e   :  { %1932 = vrot.lane.b32.xlu0 %v1912_v46, %s9126_s30 }
0x1562   :  { %1936 = vrot.lane.b32.xlu0 %v1914_v47, %s9126_s30 }
0x15c0   :  { %v1886_v48 = vpop.permute.xlu0 %1885 }
0x15c1   :  { %v1888_v49 = vmul.f32 %v1886_v48, %v1871_v31 }
0x15c3   :  { %1896 = vrot.lane.b32.xlu1 %v1888_v49, %s9126_s30 }
0x15c4   :  { %v1861_v10 = vpop.permute.xlu0 %1860 }
0x15c5   :  { %v1863_v57 = vmul.f32 %v1861_v10, %v9711_v34 }
0x15c8   :  { %v1927_v11 = vpop.permute.xlu0 %1926 }
0x15c9   :  { %v9789_v24 = vsel %vm208_vm5, %v1901_v22, %v1927_v11  ;;  %v9888_v22 = vsub.s32 1, %v9783_v17 }
0x15cc   :  { %v1931_v23 = vpop.permute.xlu0 %1930 }
0x15cd   :  { %v9797_v29 = vsel %vm208_vm5, %v1903_v25, %v1931_v23 }
0x15d0   :  { %v1933_v32 = vpop.permute.xlu0 %1932 }
0x15d1   :  { %v9813_v43 = vsel %vm208_vm5, %v1904_v12, %v1933_v32 }
0x15d4   :  { %v1937_v13 = vpop.permute.xlu0 %1936 }
0x15d5   :  { %v9818_v44 = vsel %vm208_vm5, %v1906_v14, %v1937_v13 }
0x1635   :  { %v1897_v54 = vpop.permute.xlu1 %1896 }
0x1636   :  { %1899 = vst.msk [vmem:[#allocation5] sm:$0x3] %vm410_vm4, %v1897_v54 }
0x163d   :  { %v1908_v9 = vld [vmem:[#allocation5] sm:$0x3] }
0x163e   :  { %1924 = vrot.lane.b32.xlu1 %v1908_v9, %s9126_s30 }
0x1642   :  { %1928 = vrot.lane.b32.xlu1 %v1910_v60, %s9126_s30 }
0x1646   :  { %1890 = vrot.lane.b32.xlu1 %v1863_v57, %s9126_s30 }
0x164a   :  { %1934 = vrot.lane.b32.xlu1 %v1913_v58, %s9126_s30 }
0x164e   :  { %1938 = vrot.lane.b32.xlu1 %v1915_v55, %s9126_s30 }
0x16b0   :  { %v1925_v20 = vpop.permute.xlu1 %1924 }
0x16b1   :  { %v9786_v21 = vsel %vm208_vm5, %v1900_v18, %v1925_v20 }
0x16b2   :  { %v1992_v27 = vcombine.low %v9786_v21, %v9789_v24 }
0x16b4   :  { %v1929_v28 = vpop.permute.xlu1 %1928  ;;  %v2000_v33 = vrot.slane %v1992_v27, %v9792_v26  ;;  %v9899_v27 = vrot.slane %v1972_v1, %v9888_v22 }
0x16b5   :  { %v9800_v30 = vsel %vm208_vm5, %v1902_v40, %v1929_v28 }
0x16b6   :  { %v1993_v31 = vcombine.low %v9800_v30, %v9797_v29 }
0x16b8   :  { %v2007_v34 = vrot.slane %v1993_v31, %v9792_v26  ;;  %v1891_v35 = vpop.permute.xlu1 %1890 }
0x16b9   :  { %1894 = vst.msk [vmem:[#allocation4 + $0xe] sm:$0x3] %vm410_vm4, %v1891_v35 }
0x16ba   :  { %v2008_v36 = vcombine.low %v2000_v33, %v2007_v34 }
0x16bc   :  { %v1935_v38 = vpop.permute.xlu1 %1934  ;;  %7956 = vmatmul.mubr.msk.f32.vlgmr.msra.gmra.mxu0 %vm2026_vm6, %v2008_v36 }
0x16bd   :  { %v9809_v39 = vsel %vm208_vm5, %v1905_v37, %v1935_v38  ;;  %2101 = vmatprep.mubr.f32.mxu0 %v9122_v0 }
0x16be   :  { %v2009_v15 = vcombine.low %v9813_v43, %v9809_v39 }
0x16c0   :  { %v1907_v41 = vld [vmem:[#allocation4 + $0xe] sm:$0x3]  ;;  %v1939_v42 = vpop.permute.xlu1 %1938  ;;  %v2017_v47 = vrot.slane %v2009_v15, %v9792_v26 }
0x16c1   :  { %v9821_v45 = vsel %vm208_vm5, %v1907_v41, %v1939_v42 }
0x16c2   :  { %v2010_v46 = vcombine.low %v9818_v44, %v9821_v45 }
0x16c4   :  { %v2024_v48 = vrot.slane %v2010_v46, %v9792_v26 }
0x16c6   :  { %v2025_v49 = vcombine.low %v2017_v47, %v2024_v48 }
0x16c8   :  { %7957 = vmatmul.mubr.msk.f32.gmra.mxu0 %vm2026_vm6, %v2025_v49 }
0x16c9   :  { %8722 = vmatprep.mubr.msk.f32.mxu0 %vm9123_vm0, %v9122_v0 }
0x177c   :  { %v2097_v3 = vpop.f32.mrf.mxu0 }
0x177d   :  { %v2098_v4 = vadd.f32 %v2097_v3, %v1977_v2 }
0x177e   :  { %v2099_v56 = vpop.f32.mrf.mxu0 }
0x177f   :  { %v2110_v6 = vcombine.high %v2098_v4, %v2098_v4  ;;  %v2117_v8 = vrot.slane %v2098_v4, %v9792_v26  ;;  %v9910_v31 = vadd.f32 %v2099_v56, %v9899_v27 }
0x1781   :  { %v2124_v51 = vrot.slane %v2110_v6, %v9792_v26  ;;  %v9840_v52 = vrot.slane %v2117_v8, %v9792_v26  ;;  %v2125_v53 = vcombine.high %v2117_v8, %v2117_v8  ;;  %v9882_v19 = vmul.f32 0.17677669, %v2117_v8 }
0x1782   :  { %v9926_v36 = vrot.slane %v9910_v31, %v9792_v26 }
0x1783   :  { %2203 = vrot.lane.b32.xlu0 %v9840_v52, %s9125_s6  ;;  %v9845_v54 = vrot.slane %v2125_v53, %v9792_v26  ;;  %v2126_v5 = vcombine.high %v2124_v51, %v2124_v51  ;;  %v9850_v59 = vrot.slane %v2124_v51, %v9792_v26  ;;  %v9893_v23 = vmul.f32 0.17677669, %v2125_v53 }
0x1784   :  { %v9904_v40 = vmul.f32 0.17677669, %v2124_v51  ;;  %v9946_v14 = vcombine.high %v9926_v36, %v9926_v36 }
0x1785   :  { %2287 = vrot.lane.b32.xlu1 %v9845_v54, %s9125_s6  ;;  %v9855_v62 = vrot.slane %v2126_v5, %v9792_v26  ;;  %v9915_v32 = vmul.f32 0.17677669, %v2126_v5 }
0x1787   :  { %2371 = vrot.lane.b32.xlu0 %v9850_v59, %s9125_s6 }
0x1788   :  { %v2103_v7 = vpop.f32.mrf.mxu0 }
0x1789   :  { %v2104_v63 = vadd.f32 %v2103_v7, %v1977_v2  ;;  %2455 = vrot.lane.b32.xlu1 %v9855_v62, %s9125_s6 }
0x178a   :  { %v9971_v4 = vpop.f32.mrf.mxu0 }
0x178b   :  { %v2127_v9 = vcombine.high %v2104_v63, %v2104_v63  ;;  %v2134_v10 = vrot.slane %v2104_v63, %v9792_v26 }
0x178d   :  { %v2141_v60 = vrot.slane %v2127_v9, %v9792_v26  ;;  %v9862_v57 = vrot.slane %v2134_v10, %v9792_v26  ;;  %v2142_v58 = vcombine.high %v2134_v10, %v2134_v10  ;;  %v9931_v37 = vmul.f32 0.17677669, %v2134_v10 }
0x178f   :  { %2539 = vrot.lane.b32.xlu0 %v9862_v57, %s9125_s6  ;;  %v9867_v55 = vrot.slane %v2142_v58, %v9792_v26  ;;  %v2143_v11 = vcombine.high %v2141_v60, %v2141_v60  ;;  %v9872_v61 = vrot.slane %v2141_v60, %v9792_v26  ;;  %v9919_v35 = vmul.f32 0.17677669, %v2142_v58 }
0x1790   :  { %v9951_v15 = vmul.f32 0.17677669, %v2141_v60 }
0x1791   :  { %2623 = vrot.lane.b32.xlu1 %v9867_v55, %s9125_s6  ;;  %v9877_v16 = vrot.slane %v2143_v11, %v9792_v26  ;;  %v9939_v12 = vmul.f32 0.17677669, %v2143_v11 }
0x1793   :  { %2707 = vrot.lane.b32.xlu0 %v9872_v61, %s9125_s6 }
0x1795   :  { %2791 = vrot.lane.b32.xlu1 %v9877_v16, %s9125_s6 }
0x17f5   :  { %v2204_v18 = vpop.permute.xlu0 %2203 }
0x17f6   :  { %8696 = vmatpush3.xpose.msk.msra.mxu1 %vm208_vm5, %v2204_v18 }
0x17f7   :  { %8700 = vmatprep.subr.mxu1 %v9122_v0  ;;  %v2288_v20 = vpop.permute.xlu1 %2287 }
0x17f9   :  { %8698 = vmatmul.mubr.msk.f32.vlgmr.msra.gmra.mxu1 %vm208_vm5, %v9882_v19  ;;  %v2372_v25 = vpop.permute.xlu0 %2371 }
0x17fa   :  { %8701 = vmatpush3.xpose.msk.msra.mxu1 %vm208_vm5, %v2288_v20  ;;  %8702 = vmatprep.mubr.msk.f32.mxu1 %vm9123_vm0, %v9122_v0 }
0x17fb   :  { %8705 = vmatprep.subr.mxu1 %v9122_v0  ;;  %v2456_v28 = vpop.permute.xlu1 %2455 }
0x17fd   :  { %8703 = vmatmul.mubr.msk.f32.vlgmr.msra.gmra.mxu1 %vm208_vm5, %v9893_v23 }
0x17fe   :  { %8706 = vmatpush3.xpose.msk.msra.mxu1 %vm208_vm5, %v2372_v25  ;;  %8707 = vmatprep.mubr.msk.f32.mxu1 %vm9123_vm0, %v9122_v0 }
0x17ff   :  { %8710 = vmatprep.subr.mxu1 %v9122_v0 }
0x1801   :  { %8708 = vmatmul.mubr.msk.f32.vlgmr.msra.gmra.mxu1 %vm208_vm5, %v9904_v40  ;;  %v2540_v33 = vpop.permute.xlu0 %2539 }
0x1802   :  { %8711 = vmatpush3.xpose.msk.msra.mxu1 %vm208_vm5, %v2456_v28  ;;  %8712 = vmatprep.mubr.msk.f32.mxu1 %vm9123_vm0, %v9122_v0 }
0x1803   :  { %v2624_v34 = vpop.permute.xlu1 %2623  ;;  %8715 = vmatprep.subr.mxu1 %v9122_v0 }
0x1804   :  { %8721 = vmatpush3.xpose.msk.msra.mxu0 %vm208_vm5, %v2624_v34 }
0x1805   :  { %8713 = vmatmul.mubr.msk.f32.vlgmr.msra.gmra.mxu1 %vm208_vm5, %v9915_v32  ;;  %8730 = vmatprep.subr.mxu0 %v9122_v0  ;;  %v2708_v13 = vpop.permute.xlu0 %2707 }
0x1806   :  { %8716 = vmatpush3.xpose.msk.msra.mxu1 %vm208_vm5, %v2540_v33  ;;  %8717 = vmatprep.mubr.msk.f32.mxu1 %vm9123_vm0, %v9122_v0 }
0x1807   :  { %8723 = vmatmul.mubr.msk.f32.vlgmr.msra.gmra.mxu0 %vm208_vm5, %v9919_v35  ;;  %v2792_v38 = vpop.permute.xlu1 %2791  ;;  %8725 = vmatprep.subr.mxu1 %v9122_v0 }
0x1808   :  { %8731 = vmatpush3.xpose.msk.msra.mxu0 %vm208_vm5, %v2792_v38  ;;  %8732 = vmatprep.mubr.msk.f32.mxu0 %vm9123_vm0, %v9122_v0 }
0x1809   :  { %8718 = vmatmul.mubr.msk.f32.vlgmr.msra.gmra.mxu1 %vm208_vm5, %v9931_v37  ;;  %8740 = vmatprep.subr.mxu0 %v9122_v0 }
0x180a   :  { %8726 = vmatpush3.xpose.msk.msra.mxu1 %vm208_vm5, %v2708_v13  ;;  %8727 = vmatprep.mubr.msk.f32.mxu1 %vm9123_vm0, %v9122_v0 }
0x180b   :  { %8733 = vmatmul.mubr.msk.f32.vlgmr.msra.gmra.mxu0 %vm208_vm5, %v9939_v12  ;;  %8735 = vmatprep.subr.mxu1 %v9122_v0 }
0x180c   :  { %8741 = vmatpush3.msk.msra.mxu0 %vm2961_vm7, %v9946_v14  ;;  %8742 = vmatprep.mubr.msk.f32.mxu0 %vm9123_vm0, %v9122_v0 }
0x180d   :  { %8728 = vmatmul.mubr.msk.f32.vlgmr.msra.gmra.mxu1 %vm208_vm5, %v9951_v15  ;;  %8750 = vmatprep.subr.mxu0 %v9122_v0 }
0x180e   :  { %8736 = vmatpush3.msk.msra.mxu1 %vm2961_vm7, %v9926_v36  ;;  %8737 = vmatprep.mubr.msk.f32.mxu1 %vm9123_vm0, %v9122_v0 }
0x180f   :  { %8745 = vmatprep.subr.mxu1 %v9122_v0 }
0x18b9   :  { %v2276_v41 = vpop.f32.mrf.mxu1 }
0x18ba   :  { %v2869_v42 = vsel %vm2868_vm8, %v2276_v41, -inf }
0x18bb   :  { %2870 = vmax.xlane.f32.xlu0 %v2869_v42  ;;  %v8699_v46 = vpop.f32.mrf.mxu1 }
0x18bd   :  { %v2360_v47 = vpop.f32.mrf.mxu1 }
0x18be   :  { %v2872_v48 = vsel %vm2868_vm8, %v2360_v47, -inf }
0x18bf   :  { %2873 = vmax.xlane.f32.xlu1 %v2872_v48  ;;  %v8704_v49 = vpop.f32.mrf.mxu1 }
0x18c1   :  { %v2444_v1 = vpop.f32.mrf.mxu1 }
0x18c2   :  { %v2875_v2 = vsel %vm2868_vm8, %v2444_v1, -inf }
0x18c3   :  { %2876 = vmax.xlane.f32.xlu0 %v2875_v2  ;;  %v8709_v3 = vpop.f32.mrf.mxu1 }
0x18c5   :  { %v2528_v6 = vpop.f32.mrf.mxu1 }
0x18c6   :  { %v2878_v8 = vsel %vm2868_vm8, %v2528_v6, -inf }
0x18c7   :  { %v2696_v51 = vpop.f32.mrf.mxu0  ;;  %2879 = vmax.xlane.f32.xlu0 %v2878_v8  ;;  %v8714_v53 = vpop.f32.mrf.mxu1 }
0x18c8   :  { %v2884_v7 = vsel %vm2868_vm8, %v2696_v51, -inf }
0x18c9   :  { %v9974_v5 = vpop.f32.mrf.mxu1  ;;  %v8724_v56 = vpop.f32.mrf.mxu0 }
0x18ca   :  { %v2881_v63 = vsel %vm2868_vm8, %v9974_v5, -inf }
0x18cb   :  { %v2864_v9 = vpop.f32.mrf.mxu0  ;;  %2885 = vmax.xlane.f32.xlu0 %v2884_v7  ;;  %2882 = vmax.xlane.f32.xlu1 %v2881_v63  ;;  %v8719_v10 = vpop.f32.mrf.mxu1 }
0x18cc   :  { %v2890_v11 = vsel %vm2868_vm8, %v2864_v9, -inf }
0x18cd   :  { %v9979_v60 = vpop.f32.mrf.mxu1  ;;  %v8734_v58 = vpop.f32.mrf.mxu0 }
0x18ce   :  { %v2887_v18 = vsel %vm2868_vm8, %v9979_v60, -inf }
0x18cf   :  { %2891 = vmax.xlane.f32.xlu0 %v2890_v11  ;;  %2888 = vmax.xlane.f32.xlu1 %v2887_v18  ;;  %v8729_v20 = vpop.f32.mrf.mxu1 }
0x18e0   :  { %3568 = vrot.lane.b32.xlu1 %v9840_v52, %s9126_s30 }
0x1944   :  { %v2871_v25 = vpop.xlane.xlu0 %2870 }
0x1945   :  { %v2893_v28 = vsub.f32 %v2276_v41, %v2871_v25  ;;  %v3565_v25 = vrot.slane %v9882_v19, %v9792_v26 }
0x1947   :  { %v2901_v33 = vmul.f32 1.442695, %v2893_v28 }
0x1948   :  { %v2874_v34 = vpop.xlane.xlu1 %2873 }
0x1949   :  { %9034 = vpow2.f32 %v2901_v33  ;;  %v2894_v38 = vsub.f32 %v2360_v47, %v2874_v34  ;;  %v3650_v33 = vrot.slane %v9893_v23, %v9792_v26  ;;  %v3820_v34 = vrot.slane %v9915_v32, %v9792_v26 }
0x194b   :  { %v2903_v13 = vmul.f32 1.442695, %v2894_v38 }
0x194c   :  { %v2877_v42 = vpop.xlane.xlu0 %2876 }
0x194d   :  { %9036 = vpow2.f32 %v2903_v13  ;;  %v2895_v46 = vsub.f32 %v2444_v1, %v2877_v42 }
0x194f   :  { %v2905_v48 = vmul.f32 1.442695, %v2895_v46 }
0x1950   :  { %v2880_v49 = vpop.xlane.xlu0 %2879 }
0x1951   :  { %9038 = vpow2.f32 %v2905_v48  ;;  %v2896_v41 = vsub.f32 %v2528_v6, %v2880_v49 }
0x1953   :  { %v2907_v10 = vmul.f32 1.442695, %v2896_v41 }
0x1954   :  { %v2886_v2 = vpop.xlane.xlu0 %2885  ;;  %v2883_v19 = vpop.xlane.xlu1 %2882 }
0x1955   :  { %v2898_v3 = vsub.f32 %v2696_v51, %v2886_v2  ;;  %v2897_v23 = vsub.f32 %v9974_v5, %v2883_v19 }
0x1956   :  { %v9986_v8 = vpop.eup %9034 }
0x1957   :  { %v2911_v53 = vmul.f32 1.442695, %v2898_v3  ;;  %v2917_v52 = vsel %vm2868_vm8, %v9986_v8, 0.0  ;;  %v2909_v32 = vmul.f32 1.442695, %v2897_v23 }
0x1958   :  { %2918 = vadd.xlane.f32.xlu1 %v2917_v52  ;;  %v2892_v56 = vpop.xlane.xlu0 %2891  ;;  %v2889_v38 = vpop.xlane.xlu1 %2888 }
0x1959   :  { %v2900_v7 = vsub.f32 %v2864_v9, %v2892_v56  ;;  %9040 = vpow2.f32 %v2911_v53  ;;  %v2899_v13 = vsub.f32 %v9979_v60, %v2889_v38 }
0x195a   :  { %v9990_v47 = vpop.eup %9036 }
0x195b   :  { %v2915_v63 = vmul.f32 1.442695, %v2900_v7  ;;  %v2920_v1 = vsel %vm2868_vm8, %v9990_v47, 0.0 }
0x195c   :  { %2921 = vadd.xlane.f32.xlu0 %v2920_v1  ;;  %v10058_v60 = vpop.permute.xlu1 %3568 }
0x195d   :  { %9042 = vpow2.f32 %v2915_v63 }
0x195e   :  { %v9994_v51 = vpop.eup %9038  ;;  %9044 = vpow2.f32 %v2907_v10 }
0x195f   :  { %v2923_v58 = vsel %vm2868_vm8, %v9994_v51, 0.0  ;;  %9046 = vpow2.f32 %v2909_v32 }
0x1960   :  { %2924 = vadd.xlane.f32.xlu1 %v2923_v58 }
0x1966   :  { %v9998_v6 = vpop.eup %9040 }
0x1967   :  { %v2932_v9 = vsel %vm2868_vm8, %v9998_v6, 0.0 }
0x1968   :  { %2933 = vadd.xlane.f32.xlu0 %v2932_v9 }
0x196a   :  { %v10002_v11 = vpop.eup %9042 }
0x196b   :  { %v2938_v18 = vsel %vm2868_vm8, %v10002_v11, 0.0  ;;  %v10006_v20 = vpop.eup %9044 }
0x196c   :  { %2939 = vadd.xlane.f32.xlu0 %v2938_v18  ;;  %v2926_v28 = vsel %vm2868_vm8, %v10006_v20, 0.0 }
0x1970   :  { %2927 = vadd.xlane.f32.xlu0 %v2926_v28 }
0x1971   :  { %3566 = vrot.lane.b32.xlu1 %v3565_v25, %s9128_s8 }
0x1975   :  { %3651 = vrot.lane.b32.xlu1 %v3650_v33, %s9128_s8 }
0x1979   :  { %3823 = vrot.lane.b32.xlu1 %v9855_v62, %s9126_s30  ;;  %v3735_v62 = vrot.slane %v9904_v40, %v9792_v26  ;;  %v10042_v40 = vpop.eup %9046 }
0x197d   :  { %3821 = vrot.lane.b32.xlu1 %v3820_v34, %s9128_s8 }
0x1981   :  { %3993 = vrot.lane.b32.xlu1 %v9867_v55, %s9126_s30  ;;  %v2913_v55 = vmul.f32 1.442695, %v2899_v13 }
0x1983   :  { %9048 = vpow2.f32 %v2913_v55 }
0x1986   :  { %3653 = vrot.lane.b32.xlu0 %v9845_v54, %s9126_s30  ;;  %v3905_v54 = vrot.slane %v9931_v37, %v9792_v26 }
0x198a   :  { %3738 = vrot.lane.b32.xlu0 %v9850_v59, %s9126_s30  ;;  %v4075_v59 = vrot.slane %v9951_v15, %v9792_v26  ;;  %v4160_v15 = vrot.slane %v9939_v12, %v9792_v26 }
0x198e   :  { %3736 = vrot.lane.b32.xlu0 %v3735_v62, %s9128_s8 }
0x1990   :  { %v10046_v5 = vpop.eup %9048 }
0x1991   :  { %v2935_v37 = vsel %vm2868_vm8, %v10046_v5, 0.0 }
0x1992   :  { %3908 = vrot.lane.b32.xlu0 %v9862_v57, %s9126_s30  ;;  %v2929_v57 = vsel %vm2868_vm8, %v10042_v40, 0.0 }
0x1996   :  { %3906 = vrot.lane.b32.xlu0 %v3905_v54, %s9128_s8 }
0x199a   :  { %4078 = vrot.lane.b32.xlu0 %v9872_v61, %s9126_s30  ;;  %v3990_v61 = vrot.slane %v9919_v35, %v9792_v26  ;;  %v2162_v35 = vcombine.high %v9910_v31, %v9910_v31 }
0x199c   :  { %v10064_v2 = vrot.slane %v2162_v35, %v9792_v26 }
0x199e   :  { %4076 = vrot.lane.b32.xlu0 %v4075_v59, %s9128_s8  ;;  %v10075_v31 = vcombine.high %v10064_v2, %v10064_v2 }
0x19a5   :  { %2930 = vadd.xlane.f32.xlu1 %v2929_v57 }
0x19a9   :  { %2936 = vadd.xlane.f32.xlu1 %v2935_v37 }
0x19ba   :  { %3991 = vrot.lane.b32.xlu1 %v3990_v61, %s9128_s8 }
0x19be   :  { %4163 = vrot.lane.b32.xlu1 %v9877_v16, %s9126_s30 }
0x19c2   :  { %4161 = vrot.lane.b32.xlu1 %v4160_v15, %s9128_s8 }
0x19e1   :  { %v2919_v42 = vpop.xlane.xlu1 %2918 }
0x19e2   :  { %9050 = vrcp.f32 %v2919_v42 }
0x19e5   :  { %v2922_v46 = vpop.xlane.xlu0 %2921 }
0x19e6   :  { %9052 = vrcp.f32 %v2922_v46 }
0x19e9   :  { %v2925_v48 = vpop.xlane.xlu1 %2924 }
0x19ea   :  { %9054 = vrcp.f32 %v2925_v48 }
0x19ef   :  { %v9051_v49 = vpop.eup %9050 }
0x19f0   :  { %v2949_v16 = vmul.f32 %v9051_v49, %v9986_v8  ;;  %v2106_v8 = vadd.f32 %v9971_v4, %v9899_v27  ;;  %v10095_v27 = vpop.permute.xlu1 %3566 }
0x19f1   :  { %v2934_v12 = vpop.xlane.xlu0 %2933 }
0x19f2   :  { %8738 = vmatmul.mubr.msk.f32.vlgmr.msra.gmra.mxu1 %vm2957_vm9, %v2949_v16  ;;  %v10087_v7 = vrot.slane %v2106_v8, %v9792_v26  ;;  %v2179_v4 = vcombine.high %v2106_v8, %v2106_v8 }
0x19f3   :  { %v9053_v3 = vpop.eup %9052  ;;  %8746 = vmatpush3.msk.msra.mxu1 %vm2961_vm7, %v10064_v2  ;;  %8747 = vmatprep.mubr.msk.f32.mxu1 %vm9123_vm0, %v9122_v0 }
0x19f4   :  { %v2950_v53 = vmul.f32 %v9053_v3, %v9990_v47  ;;  %8755 = vmatprep.subr.mxu1 %v9122_v0  ;;  %v3652_v1 = vpop.permute.xlu1 %3651  ;;  %v10099_v58 = vrot.slane %v2179_v4, %v9792_v26  ;;  %v10103_v9 = vcombine.high %v10087_v7, %v10087_v7 }
0x19f5   :  { %v2940_v52 = vpop.xlane.xlu0 %2939 }
0x19f6   :  { %8743 = vmatmul.mubr.msk.f32.vlgmr.msra.gmra.mxu0 %vm2957_vm9, %v2950_v53  ;;  %v10114_v25 = vcombine.high %v10099_v58, %v10099_v58 }
0x19f7   :  { %v9055_v41 = vpop.eup %9054  ;;  %8751 = vmatpush3.msk.msra.mxu0 %vm2961_vm7, %v10075_v31  ;;  %8752 = vmatprep.mubr.msk.f32.mxu0 %vm9123_vm0, %v9122_v0 }
0x19f8   :  { %v2951_v56 = vmul.f32 %v9055_v41, %v9994_v51  ;;  %8760 = vmatprep.subr.mxu0 %v9122_v0  ;;  %v3824_v28 = vpop.permute.xlu1 %3823 }
0x19f9   :  { %v2928_v47 = vpop.xlane.xlu0 %2927 }
0x19fa   :  { %8748 = vmatmul.mubr.msk.f32.vlgmr.msra.gmra.mxu1 %vm2957_vm9, %v2951_v56  ;;  %9056 = vrcp.f32 %v2928_v47 }
0x19fb   :  { %8756 = vmatpush3.msk.msra.mxu1 %vm2961_vm7, %v10087_v7  ;;  %8757 = vmatprep.mubr.msk.f32.mxu1 %vm9123_vm0, %v9122_v0  ;;  %9058 = vrcp.f32 %v2934_v12 }
0x19fc   :  { %8765 = vmatprep.subr.mxu1 %v9122_v0  ;;  %9060 = vrcp.f32 %v2940_v52 }
0x19fd   :  { %v3654_v34 = vpop.permute.xlu0 %3653 }
0x1a01   :  { %v3739_v38 = vpop.permute.xlu0 %3738 }
0x1a05   :  { %v3737_v32 = vpop.permute.xlu0 %3736 }
0x1a07   :  { %v9057_v63 = vpop.eup %9056 }
0x1a08   :  { %v2952_v10 = vmul.f32 %v9057_v63, %v10006_v20  ;;  %v9059_v51 = vpop.eup %9058 }
0x1a09   :  { %v2954_v18 = vmul.f32 %v9059_v51, %v9998_v6  ;;  %v9061_v20 = vpop.eup %9060  ;;  %v3822_v6 = vpop.permute.xlu1 %3821 }
0x1a0a   :  { %8753 = vmatmul.mubr.msk.f32.vlgmr.msra.gmra.mxu0 %vm2957_vm9, %v2952_v10  ;;  %v2956_v33 = vmul.f32 %v9061_v20, %v10002_v11  ;;  %v3909_v37 = vpop.permute.xlu0 %3908 }
0x1a0b   :  { %8761 = vmatpush3.msk.msra.mxu0 %vm2961_vm7, %v10103_v9  ;;  %8762 = vmatprep.mubr.msk.f32.mxu0 %vm9123_vm0, %v9122_v0 }
0x1a0c   :  { %8770 = vmatprep.subr.mxu0 %v9122_v0 }
0x1a0d   :  { %v3994_v11 = vpop.permute.xlu1 %3993 }
0x1a0e   :  { %8763 = vmatmul.mubr.msk.f32.vlgmr.msra.gmra.mxu0 %vm2957_vm9, %v2954_v18 }
0x1a0f   :  { %8771 = vmatpush3.msk.msra.mxu0 %vm2961_vm7, %v10114_v25  ;;  %8772 = vmatprep.mubr.msk.f32.mxu0 %vm9123_vm0, %v9122_v0 }
0x1a10   :  { %8780 = vmatprep.subr.mxu0 %v9122_v0 }
0x1a12   :  { %8773 = vmatmul.mubr.msk.f32.vlgmr.msra.gmra.mxu0 %vm2957_vm9, %v2956_v33 }
0x1a13   :  { %8781 = vmatpush3.xpose.msk.msra.mxu0 %vm208_vm5, %v3654_v34  ;;  %8782 = vmatprep.mubr.msk.f32.mxu0 %vm9123_vm0, %v9122_v0 }
0x1a14   :  { %8790 = vmatprep.subr.mxu0 %v9122_v0 }
0x1a16   :  { %8783 = vmatmul.mubr.msk.f32.vlgmr.msra.gmra.mxu0 %vm208_vm5, %v3652_v1 }
0x1a17   :  { %8791 = vmatpush3.xpose.msk.msra.mxu0 %vm208_vm5, %v3824_v28  ;;  %8792 = vmatprep.mubr.msk.f32.mxu0 %vm9123_vm0, %v9122_v0 }
0x1a18   :  { %8800 = vmatprep.subr.mxu0 %v9122_v0 }
0x1a1a   :  { %8793 = vmatmul.mubr.msk.f32.vlgmr.msra.gmra.mxu0 %vm208_vm5, %v3822_v6 }
0x1a1b   :  { %8801 = vmatpush3.xpose.msk.msra.mxu0 %vm208_vm5, %v3994_v11  ;;  %8802 = vmatprep.mubr.msk.f32.mxu0 %vm9123_vm0, %v9122_v0 }
0x1a1c   :  { %8810 = vmatprep.subr.mxu0 %v9122_v0 }
0x1a2e   :  { %v2931_v19 = vpop.xlane.xlu1 %2930 }
0x1a2f   :  { %9062 = vrcp.f32 %v2931_v19 }
0x1a32   :  { %v2937_v23 = vpop.xlane.xlu1 %2936 }
0x1a33   :  { %9064 = vrcp.f32 %v2937_v23 }
0x1a36   :  { %v3992_v62 = vpop.permute.xlu1 %3991 }
0x1a37   :  { %8803 = vmatmul.mubr.msk.f32.vlgmr.msra.gmra.mxu0 %vm208_vm5, %v3992_v62 }
0x1a38   :  { %8812 = vmatprep.mubr.msk.f32.mxu0 %vm9123_vm0, %v9122_v0 }
0x1a3a   :  { %v4164_v13 = vpop.permute.xlu1 %4163 }
0x1a3b   :  { %8811 = vmatpush3.xpose.msk.msra.mxu0 %vm208_vm5, %v4164_v13 }
0x1a3c   :  { %v9063_v55 = vpop.eup %9062  ;;  %8820 = vmatprep.subr.mxu0 %v9122_v0 }
0x1a3d   :  { %v2953_v54 = vmul.f32 %v9063_v55, %v10042_v40  ;;  %v3907_v40 = vpop.permute.xlu0 %3906 }
0x1a3e   :  { %v4162_v59 = vpop.permute.xlu1 %4161 }
0x1a3f   :  { %8758 = vmatmul.mubr.msk.f32.vlgmr.msra.gmra.mxu1 %vm2957_vm9, %v2953_v54  ;;  %8813 = vmatmul.mubr.msk.f32.vlgmr.msra.gmra.mxu0 %vm208_vm5, %v4162_v59 }
0x1a40   :  { %v9065_v57 = vpop.eup %9064  ;;  %8766 = vmatpush3.msk.msra.mxu1 %vm2961_vm7, %v10099_v58  ;;  %8767 = vmatprep.mubr.msk.f32.mxu1 %vm9123_vm0, %v9122_v0 }
0x1a41   :  { %8775 = vmatprep.subr.mxu1 %v9122_v0  ;;  %v2955_v61 = vmul.f32 %v9065_v57, %v10046_v5  ;;  %8822 = vmatprep.mubr.msk.f32.mxu0 %vm9123_vm0, %v9122_v0  ;;  %v4079_v5 = vpop.permute.xlu0 %4078 }
0x1a43   :  { %8768 = vmatmul.mubr.msk.f32.vlgmr.msra.gmra.mxu1 %vm2957_vm9, %v2955_v61 }
0x1a44   :  { %8776 = vmatpush3.xpose.msk.msra.mxu1 %vm208_vm5, %v10058_v60  ;;  %8777 = vmatprep.mubr.msk.f32.mxu1 %vm9123_vm0, %v9122_v0 }
0x1a45   :  { %8785 = vmatprep.subr.mxu1 %v9122_v0  ;;  %v4077_v15 = vpop.permute.xlu0 %4076 }
0x1a47   :  { %8778 = vmatmul.mubr.msk.f32.vlgmr.msra.gmra.mxu1 %vm208_vm5, %v10095_v27 }
0x1a48   :  { %8786 = vmatpush3.xpose.msk.msra.mxu1 %vm208_vm5, %v3739_v38  ;;  %8787 = vmatprep.mubr.msk.f32.mxu1 %vm9123_vm0, %v9122_v0 }
0x1a49   :  { %8795 = vmatprep.subr.mxu1 %v9122_v0 }
0x1a4b   :  { %8788 = vmatmul.mubr.msk.f32.vlgmr.msra.gmra.mxu1 %vm208_vm5, %v3737_v32 }
0x1a4c   :  { %8796 = vmatpush3.xpose.msk.msra.mxu1 %vm208_vm5, %v3909_v37  ;;  %8797 = vmatprep.mubr.msk.f32.mxu1 %vm9123_vm0, %v9122_v0 }
0x1a4d   :  { %8805 = vmatprep.subr.mxu1 %v9122_v0 }
0x1a4f   :  { %8798 = vmatmul.mubr.msk.f32.vlgmr.msra.gmra.mxu1 %vm208_vm5, %v3907_v40  ;;  %v4333_v40 = vrot.slane %v9926_v36, %v9792_v26  ;;  %v4753_v36 = vrot.slane %v10103_v9, %v9792_v26 }
0x1a50   :  { %8806 = vmatpush3.xpose.msk.msra.mxu1 %vm208_vm5, %v4079_v5  ;;  %8807 = vmatprep.mubr.msk.f32.mxu1 %vm9123_vm0, %v9122_v0  ;;  %v4501_v5 = vrot.slane %v10064_v2, %v9792_v26 }
0x1a51   :  { %8815 = vmatprep.subr.mxu1 %v9122_v0 }
0x1a53   :  { %8808 = vmatmul.mubr.msk.f32.vlgmr.msra.gmra.mxu1 %vm208_vm5, %v4077_v15  ;;  %v4585_v15 = vrot.slane %v10075_v31, %v9792_v26 }
0x1a54   :  { %8817 = vmatprep.mubr.msk.f32.mxu1 %vm9123_vm0, %v9122_v0 }
0x1ab2   :  { %v10179_v60 = vpop.f32.mrf.mxu1 }
0x1ab4   :  { %v8739_v42 = vpop.f32.mrf.mxu1 }
0x1ab5   :  { %v4417_v42 = vrot.slane %v9946_v14, %v9792_v26 }
0x1ab6   :  { %v10181_v46 = vpop.f32.mrf.mxu0 }
0x1ab8   :  { %v8744_v48 = vpop.f32.mrf.mxu0 }
0x1ab9   :  { %v4669_v48 = vrot.slane %v10087_v7, %v9792_v26 }
0x1aba   :  { %v10183_v35 = vpop.f32.mrf.mxu1 }
0x1abc   :  { %v8749_v49 = vpop.f32.mrf.mxu1 }
0x1aca   :  { %v10185_v16 = vpop.f32.mrf.mxu0 }
0x1acc   :  { %v8754_v12 = vpop.f32.mrf.mxu0 }
0x1ace   :  { %v10187_v3 = vpop.f32.mrf.mxu0 }
0x1ad0   :  { %v8764_v53 = vpop.f32.mrf.mxu0 }
0x1ad2   :  { %v10189_v8 = vpop.f32.mrf.mxu0 }
0x1ad4   :  { %v8774_v52 = vpop.f32.mrf.mxu0 }
0x1ad6   :  { %v3725_v41 = vpop.f32.mrf.mxu0 }
0x1ad7   :  { %v4242_v56 = vsel %vm2868_vm8, %v3725_v41, -inf }
0x1ad8   :  { %4243 = vmax.xlane.f32.xlu1 %v4242_v56  ;;  %v8784_v47 = vpop.f32.mrf.mxu0 }
0x1ada   :  { %v10192_v27 = vpop.f32.mrf.mxu0 }
0x1adb   :  { %v4248_v32 = vsel %vm2868_vm8, %v10192_v27, -inf }
0x1adc   :  { %v8794_v4 = vpop.f32.mrf.mxu0 }
0x1af7   :  { %v10194_v63 = vpop.f32.mrf.mxu0 }
0x1af8   :  { %v4254_v59 = vsel %vm2868_vm8, %v10194_v63, -inf }
0x1af9   :  { %v8804_v1 = vpop.f32.mrf.mxu0 }
0x1aff   :  { %v10196_v10 = vpop.f32.mrf.mxu1  ;;  %v10198_v51 = vpop.f32.mrf.mxu0 }
0x1b00   :  { %v4260_v61 = vsel %vm2868_vm8, %v10198_v51, -inf }
0x1b01   :  { %v8759_v18 = vpop.f32.mrf.mxu1  ;;  %v8814_v20 = vpop.f32.mrf.mxu0 }
0x1b03   :  { %v10200_v28 = vpop.f32.mrf.mxu1 }
0x1b05   :  { %v8769_v33 = vpop.f32.mrf.mxu1 }
0x1b07   :  { %v3640_v34 = vpop.f32.mrf.mxu1 }
0x1b08   :  { %v4239_v6 = vsel %vm2868_vm8, %v3640_v34, -inf }
0x1b09   :  { %v8779_v11 = vpop.f32.mrf.mxu1  ;;  %4240 = vmax.xlane.f32.xlu0 %v4239_v6 }
0x1b0b   :  { %v3810_v19 = vpop.f32.mrf.mxu1 }
0x1b0c   :  { %v4245_v23 = vsel %vm2868_vm8, %v3810_v19, -inf }
0x1b0d   :  { %4246 = vmax.xlane.f32.xlu0 %v4245_v23  ;;  %v8789_v38 = vpop.f32.mrf.mxu1 }
0x1b0f   :  { %v3980_v62 = vpop.f32.mrf.mxu1 }
0x1b10   :  { %v4251_v13 = vsel %vm2868_vm8, %v3980_v62, -inf }
0x1b11   :  { %4249 = vmax.xlane.f32.xlu0 %v4248_v32  ;;  %4252 = vmax.xlane.f32.xlu1 %v4251_v13  ;;  %v8799_v55 = vpop.f32.mrf.mxu1 }
0x1b13   :  { %v4150_v54 = vpop.f32.mrf.mxu1 }
0x1b14   :  { %v4257_v57 = vsel %vm2868_vm8, %v4150_v54, -inf }
0x1b15   :  { %4255 = vmax.xlane.f32.xlu0 %v4254_v59  ;;  %4258 = vmax.xlane.f32.xlu1 %v4257_v57  ;;  %v8809_v37 = vpop.f32.mrf.mxu1 }
0x1b19   :  { %4261 = vmax.xlane.f32.xlu0 %v4260_v61 }
0x1b26   :  { %4334 = vrot.lane.b32.xlu1 %v4333_v40, %s9128_s8 }
0x1b2a   :  { %4502 = vrot.lane.b32.xlu1 %v4501_v5, %s9128_s8 }
0x1b2e   :  { %4586 = vrot.lane.b32.xlu1 %v4585_v15, %s9128_s8 }
0x1b2f   :  { %4418 = vrot.lane.b32.xlu0 %v4417_v42, %s9128_s8 }
0x1b32   :  { %4754 = vrot.lane.b32.xlu1 %v4753_v36, %s9128_s8 }
0x1b33   :  { %4670 = vrot.lane.b32.xlu0 %v4669_v48, %s9128_s8 }
0x1b61   :  { %v4244_v2 = vpop.xlane.xlu1 %4243 }
0x1b62   :  { %v4264_v49 = vsub.f32 %v3725_v41, %v4244_v2 }
0x1b64   :  { %v4273_v31 = vmul.f32 1.442695, %v4264_v49  ;;  %v4921_v49 = vrot.slane %v10114_v25, %v9792_v26 }
0x1b66   :  { %9066 = vpow2.f32 %v4273_v31  ;;  %v4837_v31 = vrot.slane %v10099_v58, %v9792_v26 }
0x1b73   :  { %v10230_v12 = vpop.eup %9066 }
0x1b74   :  { %v4290_v14 = vsel %vm2868_vm8, %v10230_v12, 0.0 }
0x1b75   :  { %4291 = vadd.xlane.f32.xlu0 %v4290_v14 }
0x1b92   :  { %v4241_v53 = vpop.xlane.xlu0 %4240 }
0x1b93   :  { %v4263_v52 = vsub.f32 %v3640_v34, %v4241_v53 }
0x1b95   :  { %v4271_v9 = vmul.f32 1.442695, %v4263_v52 }
0x1b96   :  { %v4247_v56 = vpop.xlane.xlu0 %4246 }
0x1b97   :  { %9068 = vpow2.f32 %v4271_v9  ;;  %v4265_v7 = vsub.f32 %v3810_v19, %v4247_v56 }
0x1b99   :  { %v4275_v47 = vmul.f32 1.442695, %v4265_v7 }
0x1b9a   :  { %v4253_v4 = vpop.xlane.xlu1 %4252  ;;  %v4250_v1 = vpop.xlane.xlu0 %4249 }
0x1b9b   :  { %9070 = vpow2.f32 %v4275_v47  ;;  %v4267_v18 = vsub.f32 %v3980_v62, %v4253_v4  ;;  %v4266_v41 = vsub.f32 %v10192_v27, %v4250_v1 }
0x1b9d   :  { %v4279_v20 = vmul.f32 1.442695, %v4267_v18  ;;  %v4277_v33 = vmul.f32 1.442695, %v4266_v41 }
0x1b9e   :  { %v4259_v6 = vpop.xlane.xlu1 %4258  ;;  %v4256_v11 = vpop.xlane.xlu0 %4255 }
0x1b9f   :  { %9072 = vpow2.f32 %v4279_v20  ;;  %v4269_v23 = vsub.f32 %v4150_v54, %v4259_v6  ;;  %v4268_v38 = vsub.f32 %v10194_v63, %v4256_v11 }
0x1ba0   :  { %9074 = vpow2.f32 %v4277_v33 }
0x1ba1   :  { %v4283_v34 = vmul.f32 1.442695, %v4269_v23  ;;  %v4281_v32 = vmul.f32 1.442695, %v4268_v38 }
0x1ba2   :  { %v4335_v13 = vpop.permute.xlu1 %4334  ;;  %v4262_v19 = vpop.xlane.xlu0 %4261 }
0x1ba3   :  { %9076 = vpow2.f32 %v4283_v34  ;;  %v4270_v55 = vsub.f32 %v10198_v51, %v4262_v19  ;;  %8816 = vmatpush3.msk.msra.mxu1 %vm2961_vm7, %v4335_v13 }
0x1ba4   :  { %v9069_v62 = vpop.eup %9068  ;;  %9078 = vpow2.f32 %v4281_v32  ;;  %8825 = vmatprep.subr.mxu1 %v9122_v0 }
0x1ba5   :  { %v4285_v27 = vmul.f32 1.442695, %v4270_v55  ;;  %v4287_v59 = vsel %vm2868_vm8, %v9069_v62, 0.0 }
0x1ba6   :  { %4288 = vadd.xlane.f32.xlu1 %v4287_v59  ;;  %v4419_v54 = vpop.permute.xlu0 %4418  ;;  %v4503_v52 = vpop.permute.xlu1 %4502 }
0x1ba7   :  { %9080 = vpow2.f32 %v4285_v27  ;;  %8821 = vmatpush3.msk.msra.mxu0 %vm2961_vm7, %v4419_v54 }
0x1ba8   :  { %v9071_v63 = vpop.eup %9070  ;;  %8830 = vmatprep.subr.mxu0 %v9122_v0 }
0x1ba9   :  { %v4293_v57 = vsel %vm2868_vm8, %v9071_v63, 0.0 }
0x1baa   :  { %4294 = vadd.xlane.f32.xlu1 %v4293_v57  ;;  %v4671_v14 = vpop.permute.xlu0 %4670  ;;  %v4587_v7 = vpop.permute.xlu1 %4586 }
0x1bac   :  { %v9073_v51 = vpop.eup %9072 }
0x1bad   :  { %v9075_v37 = vpop.eup %9074  ;;  %v4299_v61 = vsel %vm2868_vm8, %v9073_v51, 0.0 }
0x1bae   :  { %4300 = vadd.xlane.f32.xlu1 %v4299_v61  ;;  %v4296_v40 = vsel %vm2868_vm8, %v9075_v37, 0.0  ;;  %v4755_v58 = vpop.permute.xlu1 %4754  ;;  %v5045_v61 = vld [vmem:[%s11969_s9 + $0x30] sm:$0xff] }
0x1baf   :  { %4297 = vadd.xlane.f32.xlu0 %v4296_v40 }
0x1bb0   :  { %v10245_v5 = vpop.eup %9076 }
0x1bb1   :  { %v10247_v15 = vpop.eup %9078  ;;  %v4305_v42 = vsel %vm2868_vm8, %v10245_v5, 0.0 }
0x1bb2   :  { %4306 = vadd.xlane.f32.xlu1 %v4305_v42  ;;  %v4302_v36 = vsel %vm2868_vm8, %v10247_v15, 0.0  ;;  %v5043_v42 = vld [vmem:[%s11969_s9 + $0x20] sm:$0xff] }
0x1bb3   :  { %4303 = vadd.xlane.f32.xlu0 %v4302_v36 }
0x1bb4   :  { %v10253_v48 = vpop.eup %9080 }
0x1bb5   :  { %v4308_v2 = vsel %vm2868_vm8, %v10253_v48, 0.0 }
0x1bb7   :  { %4309 = vadd.xlane.f32.xlu0 %v4308_v2 }
0x1bc3   :  { %4922 = vrot.lane.b32.xlu1 %v4921_v49, %s9128_s8  ;;  %v5041_v49 = vld [vmem:[%s11969_s9 + $0x10] sm:$0xff] }
0x1bcd   :  { %4838 = vrot.lane.b32.xlu0 %v4837_v31, %s9128_s8 }
0x1bfe   :  { %v4292_v53 = vpop.xlane.xlu0 %4291 }
0x1bff   :  { %9082 = vrcp.f32 %v4292_v53 }
0x1c0c   :  { %v9083_v9 = vpop.eup %9082 }
0x1c0d   :  { %v4320_v56 = vmul.f32 %v9083_v9, %v10230_v12  ;;  %v5039_v9 = vld [vmem:[%s11969_s9] sm:$0xff] }
0x1c0f   :  { %8823 = vmatmul.mubr.msk.f32.vlgmr.msra.gmra.mxu0 %vm2957_vm9, %v4320_v56 }
0x1c10   :  { %8831 = vmatpush3.msk.msra.mxu0 %vm2961_vm7, %v4587_v7  ;;  %8832 = vmatprep.mubr.msk.f32.mxu0 %vm9123_vm0, %v9122_v0 }
0x1c11   :  { %8840 = vmatprep.subr.mxu0 %v9122_v0 }
0x1c2f   :  { %v4289_v25 = vpop.xlane.xlu1 %4288 }
0x1c30   :  { %9084 = vrcp.f32 %v4289_v25 }
0x1c33   :  { %v4295_v47 = vpop.xlane.xlu1 %4294 }
0x1c34   :  { %9086 = vrcp.f32 %v4295_v47 }
0x1c37   :  { %v4301_v4 = vpop.xlane.xlu1 %4300 }
0x1c38   :  { %9088 = vrcp.f32 %v4301_v4  ;;  %v4298_v1 = vpop.xlane.xlu0 %4297 }
0x1c39   :  { %9090 = vrcp.f32 %v4298_v1 }
0x1c3b   :  { %v4307_v12 = vpop.xlane.xlu1 %4306 }
0x1c3c   :  { %9092 = vrcp.f32 %v4307_v12  ;;  %v4304_v18 = vpop.xlane.xlu0 %4303 }
0x1c3d   :  { %v9085_v41 = vpop.eup %9084  ;;  %9094 = vrcp.f32 %v4304_v18 }
0x1c3e   :  { %v4319_v20 = vmul.f32 %v9085_v41, %v9069_v62 }
0x1c3f   :  { %v4923_v59 = vpop.permute.xlu1 %4922 }
0x1c40   :  { %v4310_v33 = vpop.xlane.xlu0 %4309  ;;  %8818 = vmatmul.mubr.msk.f32.vlgmr.msra.gmra.mxu1 %vm2957_vm9, %v4319_v20 }
0x1c41   :  { %v9087_v6 = vpop.eup %9086  ;;  %9096 = vrcp.f32 %v4310_v33  ;;  %8826 = vmatpush3.msk.msra.mxu1 %vm2961_vm7, %v4503_v52  ;;  %8827 = vmatprep.mubr.msk.f32.mxu1 %vm9123_vm0, %v9122_v0 }
0x1c42   :  { %8835 = vmatprep.subr.mxu1 %v9122_v0  ;;  %v4321_v11 = vmul.f32 %v9087_v6, %v9071_v63 }
0x1c44   :  { %8828 = vmatmul.mubr.msk.f32.vlgmr.msra.gmra.mxu1 %vm2957_vm9, %v4321_v11  ;;  %v4839_v13 = vpop.permute.xlu0 %4838 }
0x1c45   :  { %v9089_v23 = vpop.eup %9088  ;;  %8836 = vmatpush3.msk.msra.mxu1 %vm2961_vm7, %v4671_v14  ;;  %8837 = vmatprep.mubr.msk.f32.mxu1 %vm9123_vm0, %v9122_v0  ;;  %v5040_v14 = vld [vmem:[%s11969_s9 + $0x8] sm:$0xff] }
0x1c46   :  { %v9091_v38 = vpop.eup %9090  ;;  %8845 = vmatprep.subr.mxu1 %v9122_v0  ;;  %v4323_v34 = vmul.f32 %v9089_v23, %v9073_v51 }
0x1c47   :  { %v4322_v32 = vmul.f32 %v9091_v38, %v9075_v37  ;;  %v5046_v37 = vld [vmem:[%s11969_s9 + $0x38] sm:$0xff] }
0x1c48   :  { %8838 = vmatmul.mubr.msk.f32.vlgmr.msra.gmra.mxu1 %vm2957_vm9, %v4323_v34 }
0x1c49   :  { %v9093_v19 = vpop.eup %9092  ;;  %8833 = vmatmul.mubr.msk.f32.vlgmr.msra.gmra.mxu0 %vm2957_vm9, %v4322_v32  ;;  %8846 = vmatpush3.msk.msra.mxu1 %vm2961_vm7, %v4839_v13 }
0x1c4a   :  { %v9095_v55 = vpop.eup %9094  ;;  %8841 = vmatpush3.msk.msra.mxu0 %vm2961_vm7, %v4755_v58  ;;  %8842 = vmatprep.mubr.msk.f32.mxu0 %vm9123_vm0, %v9122_v0  ;;  %v4325_v62 = vmul.f32 %v9093_v19, %v10245_v5  ;;  %v5044_v5 = vld [vmem:[%s11969_s9 + $0x28] sm:$0xff] }
0x1c4b   :  { %8847 = vmatprep.mubr.msk.f32.mxu1 %vm9123_vm0, %v9122_v0  ;;  %8850 = vmatprep.subr.mxu0 %v9122_v0  ;;  %v4324_v27 = vmul.f32 %v9095_v55, %v10247_v15 }
0x1c4c   :  { %8848 = vmatmul.mubr.msk.f32.vlgmr.msra.gmra.mxu1 %vm2957_vm9, %v4325_v62  ;;  %8855 = vmatprep.subr.mxu1 %v5046_v37 }
0x1c4d   :  { %8843 = vmatmul.mubr.msk.f32.vlgmr.msra.gmra.mxu0 %vm2957_vm9, %v4324_v27  ;;  %8856 = vmatpush3.msra.mxu1 %v5046_v37 }
0x1c4e   :  { %v9097_v54 = vpop.eup %9096  ;;  %8851 = vmatpush3.msk.msra.mxu0 %vm2961_vm7, %v4923_v59  ;;  %8852 = vmatprep.mubr.msk.f32.mxu0 %vm9123_vm0, %v9122_v0 }
0x1c4f   :  { %v4326_v63 = vmul.f32 %v9097_v54, %v10253_v48  ;;  %8857 = vmatprep.subr.mxu1 %v5045_v61  ;;  %v5042_v48 = vld [vmem:[%s11969_s9 + $0x18] sm:$0xff] }
0x1c50   :  { %8858 = vmatpush3.msra.mxu1 %v5045_v61 }
0x1c51   :  { %8853 = vmatmul.mubr.msk.f32.vlgmr.msra.gmra.mxu0 %vm2957_vm9, %v4326_v63  ;;  %8859 = vmatprep.subr.mxu1 %v5044_v5 }
0x1c52   :  { %5884 = vmatprep.mubr.f32.mxu0 %v9122_v0  ;;  %8860 = vmatpush3.msra.mxu1 %v5044_v5 }
0x1c53   :  { %8861 = vmatprep.subr.mxu1 %v5043_v42 }
0x1c54   :  { %8862 = vmatpush3.msra.mxu1 %v5043_v42 }
0x1c55   :  { %8863 = vmatprep.subr.mxu1 %v5042_v48 }
0x1c56   :  { %8864 = vmatpush3.msra.mxu1 %v5042_v48 }
0x1c57   :  { %8865 = vmatprep.subr.mxu1 %v5041_v49 }
0x1c58   :  { %8866 = vmatpush3.msra.mxu1 %v5041_v49 }
0x1c59   :  { %8867 = vmatprep.subr.mxu1 %v5040_v14 }
0x1c5a   :  { %8868 = vmatpush3.msra.mxu1 %v5040_v14 }
0x1c5b   :  { %8869 = vmatprep.subr.mxu1 %v5039_v9 }
0x1c5c   :  { %8870 = vmatpush3.msra.mxu1 %v5039_v9 }
0x1ccf   :  { %v4491_v57 = vpop.f32.mrf.mxu0 }
0x1cd0   :  { %5009 = vrot.lane.b32.xlu1 %v4491_v57, %s9126_s30 }
0x1cd1   :  { %v8824_v51 = vpop.f32.mrf.mxu0 }
0x1d00   :  { %v4407_v40 = vpop.f32.mrf.mxu1 }
0x1d01   :  { %5007 = vrot.lane.b32.xlu0 %v4407_v40, %s9126_s30 }
0x1d02   :  { %v8819_v15 = vpop.f32.mrf.mxu1 }
0x1d04   :  { %v4575_v36 = vpop.f32.mrf.mxu1 }
0x1d05   :  { %5011 = vrot.lane.b32.xlu0 %v4575_v36, %s9126_s30 }
0x1d06   :  { %v8829_v2 = vpop.f32.mrf.mxu1 }
0x1d08   :  { %v4743_v31 = vpop.f32.mrf.mxu1 }
0x1d09   :  { %v4659_v53 = vpop.f32.mrf.mxu0  ;;  %5015 = vrot.lane.b32.xlu0 %v4743_v31, %s9126_s30 }
0x1d0a   :  { %5013 = vrot.lane.b32.xlu1 %v4659_v53, %s9126_s30  ;;  %v8839_v52 = vpop.f32.mrf.mxu1 }
0x1d0b   :  { %v8834_v56 = vpop.f32.mrf.mxu0 }
0x1d0c   :  { %v4911_v7 = vpop.f32.mrf.mxu1 }
0x1d0d   :  { %v4827_v58 = vpop.f32.mrf.mxu0  ;;  %5019 = vrot.lane.b32.xlu0 %v4911_v7, %s9126_s30 }
0x1d0e   :  { %5017 = vrot.lane.b32.xlu1 %v4827_v58, %s9126_s30  ;;  %v8849_v25 = vpop.f32.mrf.mxu1 }
0x1d0f   :  { %v8844_v47 = vpop.f32.mrf.mxu0 }
0x1d11   :  { %v4995_v4 = vpop.f32.mrf.mxu0 }
0x1d12   :  { %5021 = vrot.lane.b32.xlu1 %v4995_v4, %s9126_s30 }
0x1d13   :  { %v8854_v1 = vpop.f32.mrf.mxu0 }
0x1d42   :  { %v5010_v41 = vpop.permute.xlu1 %5009 }
0x1d43   :  { %v5032_v33 = vsel %vm208_vm5, %v10181_v46, %v5010_v41 }
0x1d73   :  { %v5008_v12 = vpop.permute.xlu0 %5007 }
0x1d74   :  { %v5031_v20 = vsel %vm208_vm5, %v10179_v60, %v5008_v12 }
0x1d75   :  { %v5062_v6 = vcombine.low %v5031_v20, %v5032_v33  ;;  %v9130_v33 = vmov 842150450  }
0x1d77   :  { %v5012_v18 = vpop.permute.xlu0 %5011  ;;  %v5070_v13 = vrot.slane %v5062_v6, %v9792_v26  ;;  %v5292_v6 = vunpack.c.l.s4 %v9130_v33  ;;  %v5661_v33 = vld [vmem:[%s11971_s13 + $0x318] sm:$0xff] }
0x1d78   :  { %v5033_v38 = vsel %vm208_vm5, %v10183_v35, %v5012_v18 }
0x1d7b   :  { %v5016_v23 = vpop.permute.xlu0 %5015 }
0x1d7c   :  { %v5014_v11 = vpop.permute.xlu1 %5013  ;;  %v5035_v27 = vsel %vm208_vm5, %v10196_v10, %v5016_v23  ;;  %v8022_v10 = vld [vmem:[%s11970_s10] ss:$0 sm:$0xff] }
0x1d7d   :  { %v5034_v34 = vsel %vm208_vm5, %v10185_v16, %v5014_v11  ;;  %v9131_v11 = vmov 1414812756  }
0x1d7e   :  { %v5063_v32 = vcombine.low %v5033_v38, %v5034_v34  ;;  %v5299_v23 = vunpack.c.l.s4 %v9131_v11  ;;  %v9132_v38 = vmov 1987475062   ;;  %v5660_v11 = vld [vmem:[%s11971_s13 + $0x310] sm:$0xff] }
0x1d7f   :  { %v5020_v46 = vpop.permute.xlu0 %5019  ;;  %v5306_v34 = vunpack.c.l.s4 %v9132_v38  ;;  %v5645_v38 = vld [vmem:[%s11971_s13 + $0x298] sm:$0xff] }
0x1d80   :  { %v5077_v19 = vrot.slane %v5063_v32, %v9792_v26  ;;  %v5018_v55 = vpop.permute.xlu1 %5017  ;;  %v5037_v35 = vsel %vm208_vm5, %v10200_v28, %v5020_v46 }
0x1d81   :  { %v5036_v60 = vsel %vm208_vm5, %v10187_v3, %v5018_v55  ;;  %v5307_v55 = vunpack.c.0.s8 %v5306_v34  ;;  %v5642_v34 = vld [vmem:[%s11971_s13 + $0x280] sm:$0xff] }
0x1d82   :  { %v5078_v62 = vcombine.low %v5070_v13, %v5077_v19  ;;  %v5079_v59 = vcombine.low %v5035_v27, %v5036_v60  ;;  %v5293_v13 = vunpack.c.0.s8 %v5292_v6  ;;  %v5300_v19 = vunpack.c.0.s8 %v5299_v23  ;;  %v5658_v6 = vld [vmem:[%s11971_s13 + $0x300] sm:$0xff]  ;;  %v5643_v23 = vld [vmem:[%s11971_s13 + $0x288] sm:$0xff] }
0x1d83   :  { %v10384_v27 = vsub.s32 %v5307_v55, %v9783_v17  ;;  %v5626_v55 = vld [vmem:[%s11971_s13 + $0x200] sm:$0xff] }
0x1d84   :  { %v5022_v54 = vpop.permute.xlu1 %5021  ;;  %8871 = vmatprep.mubr.msk.f32.mxu1 %vm2026_vm6, %v5078_v62  ;;  %v5087_v57 = vrot.slane %v5079_v59, %v9792_v26  ;;  %v10378_v62 = vsub.s32 %v5293_v13, %v9783_v17  ;;  %v10381_v46 = vsub.s32 %v5300_v19, %v9783_v17  ;;  %v5627_v13 = vld [vmem:[%s11971_s13 + $0x208] sm:$0xff]  ;;  %v5629_v19 = vld [vmem:[%s11971_s13 + $0x218] sm:$0xff] }
0x1d85   :  { %v5038_v16 = vsel %vm208_vm5, %v10189_v8, %v5022_v54 }
0x1d86   :  { %v5080_v63 = vcombine.low %v5037_v35, %v5038_v16 }
0x1d88   :  { %v5094_v3 = vrot.slane %v5080_v63, %v9792_v26 }
0x1d8a   :  { %v5095_v51 = vcombine.low %v5087_v57, %v5094_v3 }
0x1d8c   :  { %8872 = vmatmul.mubr.msk.f32.vlgmr.msra.gmra.mxu1 %vm2026_vm6, %v5095_v51 }
0x1d8d   :  { %5961 = vmatprep.mubr.f32.mxu1 %v9122_v0 }
0x1e4c   :  { %v8873_v37 = vpop.f32.mrf.mxu1 }
0x1e4d   :  { %v5172_v61 = vadd.f32 %v8873_v37, %v8022_v10 }
0x1e4e   :  { %v5166_v28 = vpop.f32.mrf.mxu1 }
0x1e4f   :  { %v5194_v40 = vcombine.high %v5172_v61, %v5172_v61  ;;  %v5201_v8 = vrot.slane %v5172_v61, %v9792_v26  ;;  %v5167_v5 = vadd.f32 %v8022_v10, %v5166_v28 }
0x1e51   :  { %v5208_v15 = vrot.slane %v5194_v40, %v9792_v26  ;;  %v5209_v42 = vcombine.high %v5201_v8, %v5201_v8  ;;  %v5177_v36 = vcombine.high %v5167_v5, %v5167_v5  ;;  %v5184_v48 = vrot.slane %v5167_v5, %v9792_v26 }
0x1e52   :  { %v5223_v49 = vadd.f32 %v5201_v8, %v9813_v43 }
0x1e53   :  { %v5210_v2 = vcombine.high %v5208_v15, %v5208_v15  ;;  %v5224_v31 = vadd.f32 %v5209_v42, %v9809_v39  ;;  %v5191_v14 = vrot.slane %v5177_v36, %v9792_v26  ;;  %v5192_v53 = vcombine.high %v5184_v48, %v5184_v48 }
0x1e54   :  { %v5225_v52 = vadd.f32 %v5208_v15, %v9818_v44  ;;  %v5219_v58 = vadd.f32 %v5184_v48, %v9786_v21 }
0x1e55   :  { %v5226_v9 = vadd.f32 %v5210_v2, %v9821_v45  ;;  %v5254_v56 = vcombine.low %v5223_v49, %v5224_v31  ;;  %v5193_v7 = vcombine.high %v5191_v14, %v5191_v14  ;;  %v5220_v25 = vadd.f32 %v5192_v53, %v9789_v24 }
0x1e56   :  { %v5221_v47 = vadd.f32 %v5191_v14, %v9800_v30 }
0x1e57   :  { %v5222_v4 = vadd.f32 %v5193_v7, %v9797_v29  ;;  %v5255_v43 = vcombine.low %v5225_v52, %v5226_v9  ;;  %v5237_v1 = vcombine.low %v5219_v58, %v5220_v25  ;;  %v5262_v39 = vrot.slane %v5254_v56, %v9792_v26 }
0x1e58   :  { %v9129_v29 = vmov 269488144  }
0x1e59   :  { %v5269_v12 = vrot.slane %v5255_v43, %v9792_v26  ;;  %v5238_v18 = vcombine.low %v5221_v47, %v5222_v4  ;;  %v5245_v45 = vrot.slane %v5237_v1, %v9792_v26  ;;  %v5285_v30 = vunpack.c.l.s4 %v9129_v29  ;;  %v5676_v29 = vld [vmem:[%s11971_s13 + $0x390] sm:$0xff] }
0x1e5b   :  { %v5270_v44 = vcombine.low %v5262_v39, %v5269_v12  ;;  %v5252_v41 = vrot.slane %v5238_v18, %v9792_v26  ;;  %v5286_v32 = vunpack.c.0.s8 %v5285_v30  ;;  %v5659_v30 = vld [vmem:[%s11971_s13 + $0x308] sm:$0xff] }
0x1e5d   :  { %v5276_v21 = vsel %vm2026_vm6, %v5270_v44, 0.0  ;;  %v5253_v20 = vcombine.low %v5245_v45, %v5252_v41  ;;  %v10375_v60 = vsub.s32 %v5286_v32, %v9783_v17  ;;  %v5644_v32 = vld [vmem:[%s11971_s13 + $0x290] sm:$0xff] }
0x1e5e   :  { %5277 = vadd.xlane.f32.xlu1 %v5276_v21  ;;  %v5675_v21 = vld [vmem:[%s11971_s13 + $0x388] sm:$0xff] }
0x1e5f   :  { %v5273_v24 = vsel %vm2026_vm6, %v5253_v20, 0.0  ;;  %v5677_v20 = vld [vmem:[%s11971_s13 + $0x398] sm:$0xff]  ;;  %5836 = vmatprep.subr.mxu0 %v5675_v21 }
0x1e60   :  { %5274 = vadd.xlane.f32.xlu0 %v5273_v24  ;;  %v5674_v24 = vld [vmem:[%s11971_s13 + $0x380] sm:$0xff]  ;;  %5913 = vmatprep.subr.mxu1 %v5677_v20 }
0x1e61   :  { %5837 = vmatpush1.msra.mxu0 %v5674_v24  ;;  %5914 = vmatpush1.msra.mxu1 %v5676_v29 }
0x1e62   :  { %5838 = vmatprep.subr.mxu0 %v5659_v30  ;;  %5915 = vmatprep.subr.mxu1 %v5661_v33 }
0x1e63   :  { %5839 = vmatpush1.msra.mxu0 %v5658_v6  ;;  %5916 = vmatpush1.msra.mxu1 %v5660_v11 }
0x1e64   :  { %5840 = vmatprep.subr.mxu0 %v5643_v23  ;;  %5917 = vmatprep.subr.mxu1 %v5645_v38 }
0x1e65   :  { %5841 = vmatpush1.msra.mxu0 %v5642_v34  ;;  %5918 = vmatpush1.msra.mxu1 %v5644_v32 }
0x1e66   :  { %5842 = vmatprep.subr.mxu0 %v5627_v13  ;;  %5919 = vmatprep.subr.mxu1 %v5629_v19 }
0x1e67   :  { %5843 = vmatpush1.msra.mxu0 %v5626_v55 }
0x1ee7   :  { %v5278_v59 = vpop.xlane.xlu1 %5277 }
0x1ee8   :  { %v5281_v54 = vmul.f32 0.015625, %v5278_v59  ;;  %v5628_v59 = vld [vmem:[%s11971_s13 + $0x210] sm:$0xff] }
0x1ee9   :  { %v5275_v35 = vpop.xlane.xlu0 %5274  ;;  %5920 = vmatpush1.msra.mxu1 %v5628_v59 }
0x1eea   :  { %v5318_v16 = vrot.slane %v5281_v54, %v10375_v60  ;;  %v5325_v63 = vrot.slane %v5281_v54, %v10378_v62  ;;  %v5332_v57 = vrot.slane %v5281_v54, %v10381_v46  ;;  %v5339_v3 = vrot.slane %v5281_v54, %v10384_v27  ;;  %v5611_v54 = vld [vmem:[%s11971_s13 + $0x188] sm:$0xff] }
0x1eeb   :  { %v5280_v51 = vmul.f32 0.015625, %v5275_v35  ;;  %v5613_v35 = vld [vmem:[%s11971_s13 + $0x198] sm:$0xff]  ;;  %5844 = vmatprep.subr.mxu0 %v5611_v54 }
0x1eec   :  { %v10390_v10 = vsub.f32 %v5223_v49, %v5318_v16  ;;  %v10392_v37 = vsub.f32 %v5224_v31, %v5325_v63  ;;  %v10394_v61 = vsub.f32 %v5225_v52, %v5332_v57  ;;  %v10396_v28 = vsub.f32 %v5226_v9, %v5339_v3  ;;  %v5610_v16 = vld [vmem:[%s11971_s13 + $0x180] sm:$0xff]  ;;  %v5612_v63 = vld [vmem:[%s11971_s13 + $0x190] sm:$0xff]  ;;  %v5595_v57 = vld [vmem:[%s11971_s13 + $0x108] sm:$0xff]  ;;  %5921 = vmatprep.subr.mxu1 %v5613_v35 }
0x1eed   :  { %v5290_v40 = vrot.slane %v5280_v51, %v10375_v60  ;;  %v5297_v8 = vrot.slane %v5280_v51, %v10378_v62  ;;  %v5304_v5 = vrot.slane %v5280_v51, %v10381_v46  ;;  %v5311_v15 = vrot.slane %v5280_v51, %v10384_v27  ;;  %v5597_v3 = vld [vmem:[%s11971_s13 + $0x118] sm:$0xff]  ;;  %v5594_v51 = vld [vmem:[%s11971_s13 + $0x100] sm:$0xff]  ;;  %5845 = vmatpush1.msra.mxu0 %v5610_v16 }
0x1eee   :  { %v5360_v42 = vmul.f32 %v10390_v10, %v10390_v10  ;;  %v5361_v36 = vmul.f32 %v10392_v37, %v10392_v37  ;;  %v5362_v48 = vmul.f32 %v10394_v61, %v10394_v61  ;;  %v5363_v2 = vmul.f32 %v10396_v28, %v10396_v28  ;;  %5922 = vmatpush1.msra.mxu1 %v5612_v63 }
0x1eef   :  { %v10410_v49 = vsub.f32 %v5219_v58, %v5290_v40  ;;  %v10412_v31 = vsub.f32 %v5220_v25, %v5297_v8  ;;  %v10414_v14 = vsub.f32 %v5221_v47, %v5304_v5  ;;  %v10416_v53 = vsub.f32 %v5222_v4, %v5311_v15  ;;  %v5596_v40 = vld [vmem:[%s11971_s13 + $0x110] sm:$0xff]  ;;  %v5579_v8 = vld [vmem:[%s11971_s13 + $0x88] sm:$0xff]  ;;  %v5581_v5 = vld [vmem:[%s11971_s13 + $0x98] sm:$0xff]  ;;  %5846 = vmatprep.subr.mxu0 %v5595_v57 }
0x1ef0   :  { %v5389_v52 = vcombine.low %v5360_v42, %v5361_v36  ;;  %v5390_v9 = vcombine.low %v5362_v48, %v5363_v2  ;;  %5923 = vmatprep.subr.mxu1 %v5597_v3  ;;  %v5578_v15 = vld [vmem:[%s11971_s13 + $0x80] sm:$0xff]  ;;  %v5580_v42 = vld [vmem:[%s11971_s13 + $0x90] sm:$0xff]  ;;  %5847 = vmatpush1.msra.mxu0 %v5594_v51  ;;  %v5563_v36 = vld [vmem:[%s11971_s13 + $0x8] sm:$0xff] }
0x1ef1   :  { %v5356_v56 = vmul.f32 %v10410_v49, %v10410_v49  ;;  %v5357_v7 = vmul.f32 %v10412_v31, %v10412_v31  ;;  %v5358_v43 = vmul.f32 %v10414_v14, %v10414_v14  ;;  %v5359_v58 = vmul.f32 %v10416_v53, %v10416_v53  ;;  %5924 = vmatpush1.msra.mxu1 %v5596_v40  ;;  %v5565_v48 = vld [vmem:[%s11971_s13 + $0x18] sm:$0xff]  ;;  %v5562_v2 = vld [vmem:[%s11971_s13] sm:$0xff] }
0x1ef2   :  { %v5397_v39 = vrot.slane %v5389_v52, %v9792_v26  ;;  %v5404_v12 = vrot.slane %v5390_v9, %v9792_v26  ;;  %5848 = vmatprep.subr.mxu0 %v5579_v8  ;;  %5925 = vmatprep.subr.mxu1 %v5581_v5  ;;  %v5564_v52 = vld [vmem:[%s11971_s13 + $0x10] sm:$0xff]  ;;  %v5679_v9 = vld [vmem:[%s11971_s13 + $0x3a8] sm:$0xff] }
0x1ef3   :  { %v5372_v25 = vcombine.low %v5356_v56, %v5357_v7  ;;  %v5373_v1 = vcombine.low %v5358_v43, %v5359_v58  ;;  %5849 = vmatpush1.msra.mxu0 %v5578_v15  ;;  %5926 = vmatpush1.msra.mxu1 %v5580_v42  ;;  %v5681_v56 = vld [vmem:[%s11971_s13 + $0x3b8] sm:$0xff] }
0x1ef4   :  { %v5405_v45 = vcombine.low %v5397_v39, %v5404_v12  ;;  %5850 = vmatprep.subr.mxu0 %v5563_v36  ;;  %5927 = vmatprep.subr.mxu1 %v5565_v48  ;;  %v8026_v39 = vld [vmem:[%s11973_s12] ss:$0 sm:$0xff] }
0x1ef5   :  { %v5380_v47 = vrot.slane %v5372_v25, %v9792_v26  ;;  %v5387_v4 = vrot.slane %v5373_v1, %v9792_v26  ;;  %5851 = vmatpush1.msra.mxu0 %v5562_v2  ;;  %5928 = vmatpush1.msra.mxu1 %v5564_v52 }
0x1ef6   :  { %v5411_v41 = vsel %vm2026_vm6, %v5405_v45, 0.0  ;;  %5990 = vmatprep.subr.mxu0 %v5679_v9  ;;  %6067 = vmatprep.subr.mxu1 %v5681_v56 }
0x1ef7   :  { %v5388_v18 = vcombine.low %v5380_v47, %v5387_v4  ;;  %v8025_v4 = vld [vmem:[%s11972_s11] ss:$0 sm:$0xff] }
0x1ef8   :  { %v5499_v12 = vcombine.high %v8025_v4, %v8025_v4 }
0x1ef9   :  { %v5408_v44 = vsel %vm2026_vm6, %v5388_v18, 0.0  ;;  %v5533_v18 = vcombine.high %v8026_v39, %v8026_v39 }
0x1efa   :  { %5409 = vadd.xlane.f32.xlu0 %v5408_v44  ;;  %v5506_v44 = vrot.slane %v8025_v4, %v9792_v26  ;;  %v5513_v45 = vrot.slane %v5499_v12, %v9792_v26  ;;  %v5662_v12 = vld [vmem:[%s11971_s13 + $0x320] sm:$0xff] }
0x1efb   :  { %v5547_v21 = vrot.slane %v5533_v18, %v9792_v26  ;;  %v5664_v18 = vld [vmem:[%s11971_s13 + $0x330] sm:$0xff] }
0x1efc   :  { %v5514_v24 = vcombine.high %v5506_v44, %v5506_v44  ;;  %v5515_v29 = vcombine.high %v5513_v45, %v5513_v45 }
0x1efd   :  { %v5549_v38 = vcombine.high %v5547_v21, %v5547_v21 }
0x1efe   :  { %5412 = vadd.xlane.f32.xlu0 %v5411_v41  ;;  %v5540_v41 = vrot.slane %v8026_v39, %v9792_v26 }
0x1f00   :  { %v5548_v23 = vcombine.high %v5540_v41, %v5540_v41 }
0x1f83   :  { %v5410_v7 = vpop.xlane.xlu0 %5409 }
0x1f84   :  { %v5414_v43 = vmul.f32 0.015625, %v5410_v7 }
0x1f86   :  { %v5416_v58 = vadd.f32 1e-05, %v5414_v43 }
0x1f87   :  { %v5413_v25 = vpop.xlane.xlu0 %5412 }
0x1f88   :  { %9098 = vrsqrt.f32 %v5416_v58  ;;  %v5415_v1 = vmul.f32 0.015625, %v5413_v25  ;;  %v5678_v58 = vld [vmem:[%s11971_s13 + $0x3a0] sm:$0xff]  ;;  %v5680_v25 = vld [vmem:[%s11971_s13 + $0x3b0] sm:$0xff] }
0x1f8a   :  { %v5417_v47 = vadd.f32 1e-05, %v5415_v1  ;;  %v5663_v1 = vld [vmem:[%s11971_s13 + $0x328] sm:$0xff] }
0x1f8c   :  { %9100 = vrsqrt.f32 %v5417_v47  ;;  %v5665_v47 = vld [vmem:[%s11971_s13 + $0x338] sm:$0xff] }
0x1f95   :  { %v9099_v20 = vpop.eup %9098 }
0x1f96   :  { %v5428_v30 = vrot.slane %v9099_v20, %v10375_v60  ;;  %v5435_v33 = vrot.slane %v9099_v20, %v10378_v62  ;;  %v5442_v6 = vrot.slane %v9099_v20, %v10381_v46  ;;  %v5449_v11 = vrot.slane %v9099_v20, %v10384_v27 }
0x1f98   :  { %v5486_v34 = vmul.f32 %v5428_v30, %v10410_v49  ;;  %v5487_v32 = vmul.f32 %v5435_v33, %v10412_v31  ;;  %v5488_v13 = vmul.f32 %v5442_v6, %v10414_v14  ;;  %v5489_v19 = vmul.f32 %v5449_v11, %v10416_v53  ;;  %v5631_v30 = vld [vmem:[%s11971_s13 + $0x228] sm:$0xff]  ;;  %v5633_v33 = vld [vmem:[%s11971_s13 + $0x238] sm:$0xff]  ;;  %v5630_v6 = vld [vmem:[%s11971_s13 + $0x220] sm:$0xff] }
0x1f99   :  { %v9101_v55 = vpop.eup %9100  ;;  %v5632_v11 = vld [vmem:[%s11971_s13 + $0x230] sm:$0xff] }
0x1f9a   :  { %v5520_v59 = vmul.f32 %v5506_v44, %v5486_v34  ;;  %v5521_v54 = vmul.f32 %v5514_v24, %v5487_v32  ;;  %v5522_v35 = vmul.f32 %v5513_v45, %v5488_v13  ;;  %v5523_v16 = vmul.f32 %v5515_v29, %v5489_v19  ;;  %v5614_v34 = vld [vmem:[%s11971_s13 + $0x1a0] sm:$0xff]  ;;  %v5616_v32 = vld [vmem:[%s11971_s13 + $0x1b0] sm:$0xff]  ;;  %v5599_v13 = vld [vmem:[%s11971_s13 + $0x128] sm:$0xff] }
0x1f9b   :  { %v5456_v63 = vrot.slane %v9101_v55, %v10375_v60  ;;  %v5463_v57 = vrot.slane %v9101_v55, %v10378_v62  ;;  %v5470_v3 = vrot.slane %v9101_v55, %v10381_v46  ;;  %v5477_v51 = vrot.slane %v9101_v55, %v10384_v27  ;;  %v5601_v19 = vld [vmem:[%s11971_s13 + $0x138] sm:$0xff]  ;;  %v5598_v55 = vld [vmem:[%s11971_s13 + $0x120] sm:$0xff] }
0x1f9c   :  { %v10556_v49 = vadd.f32 %v5540_v41, %v5520_v59  ;;  %v10558_v31 = vadd.f32 %v5548_v23, %v5521_v54  ;;  %v10560_v14 = vadd.f32 %v5547_v21, %v5522_v35  ;;  %v10562_v53 = vadd.f32 %v5549_v38, %v5523_v16  ;;  %v5600_v59 = vld [vmem:[%s11971_s13 + $0x130] sm:$0xff]  ;;  %v5583_v54 = vld [vmem:[%s11971_s13 + $0xa8] sm:$0xff]  ;;  %v5585_v35 = vld [vmem:[%s11971_s13 + $0xb8] sm:$0xff] }
0x1f9d   :  { %v5490_v40 = vmul.f32 %v5456_v63, %v10390_v10  ;;  %v5491_v8 = vmul.f32 %v5463_v57, %v10392_v37  ;;  %v5492_v5 = vmul.f32 %v5470_v3, %v10394_v61  ;;  %v5493_v15 = vmul.f32 %v5477_v51, %v10396_v28  ;;  %v5582_v16 = vld [vmem:[%s11971_s13 + $0xa0] sm:$0xff]  ;;  %v5584_v63 = vld [vmem:[%s11971_s13 + $0xb0] sm:$0xff]  ;;  %v5567_v57 = vld [vmem:[%s11971_s13 + $0x28] sm:$0xff] }
0x1f9e   :  { %v5782_v42 = vcombine.low %v10556_v49, %v10558_v31  ;;  %v5783_v36 = vcombine.low %v10560_v14, %v10562_v53  ;;  %v5569_v3 = vld [vmem:[%s11971_s13 + $0x38] sm:$0xff]  ;;  %v5566_v51 = vld [vmem:[%s11971_s13 + $0x20] sm:$0xff] }
0x1f9f   :  { %v5524_v48 = vmul.f32 %v5506_v44, %v5490_v40  ;;  %v5525_v2 = vmul.f32 %v5514_v24, %v5491_v8  ;;  %v5526_v52 = vmul.f32 %v5513_v45, %v5492_v5  ;;  %v5527_v9 = vmul.f32 %v5515_v29, %v5493_v15  ;;  %v5646_v24 = vld [vmem:[%s11971_s13 + $0x2a0] sm:$0xff]  ;;  %v5648_v29 = vld [vmem:[%s11971_s13 + $0x2b0] sm:$0xff]  ;;  %v5683_v8 = vld [vmem:[%s11971_s13 + $0x3c8] sm:$0xff] }
0x1fa0   :  { %v5790_v56 = vrot.slane %v5782_v42, %v9792_v26  ;;  %v5797_v10 = vrot.slane %v5783_v36, %v9792_v26  ;;  %v5568_v40 = vld [vmem:[%s11971_s13 + $0x30] sm:$0xff]  ;;  %v5685_v5 = vld [vmem:[%s11971_s13 + $0x3d8] sm:$0xff]  ;;  %v5682_v15 = vld [vmem:[%s11971_s13 + $0x3c0] sm:$0xff] }
0x1fa1   :  { %v10574_v7 = vadd.f32 %v5540_v41, %v5524_v48  ;;  %v10576_v37 = vadd.f32 %v5548_v23, %v5525_v2  ;;  %v10578_v61 = vadd.f32 %v5547_v21, %v5526_v52  ;;  %v10580_v28 = vadd.f32 %v5549_v38, %v5527_v9  ;;  %v5647_v41 = vld [vmem:[%s11971_s13 + $0x2a8] sm:$0xff]  ;;  %v5649_v21 = vld [vmem:[%s11971_s13 + $0x2b8] sm:$0xff]  ;;  %v5684_v42 = vld [vmem:[%s11971_s13 + $0x3d0] sm:$0xff] }
0x1fa2   :  { %v10582_v43 = vcombine.low %v5790_v56, %v5797_v10  ;;  %v5615_v23 = vld [vmem:[%s11971_s13 + $0x1a8] sm:$0xff]  ;;  %v5617_v38 = vld [vmem:[%s11971_s13 + $0x1b8] sm:$0xff]  ;;  %v5666_v2 = vld [vmem:[%s11971_s13 + $0x340] sm:$0xff] }
0x1fa3   :  { %v5799_v4 = vcombine.low %v10574_v7, %v10576_v37  ;;  %v5800_v39 = vcombine.low %v10578_v61, %v10580_v28  ;;  %v5667_v36 = vld [vmem:[%s11971_s13 + $0x348] sm:$0xff]  ;;  %v5669_v48 = vld [vmem:[%s11971_s13 + $0x358] sm:$0xff]  ;;  %v5668_v52 = vld [vmem:[%s11971_s13 + $0x350] sm:$0xff] }
0x1fa4   :  { %8027 = vmatmul.mubr.msk.f32.vlgmr.msra.gmra.mxu0 %vm2026_vm6, %v10582_v43  ;;  %8029 = vmatmul.mubr.msk.f32.vlgmr.msra.gmra.mxu1 %vm2026_vm6, %v10582_v43  ;;  %v5651_v9 = vld [vmem:[%s11971_s13 + $0x2c8] sm:$0xff]  ;;  %v5653_v56 = vld [vmem:[%s11971_s13 + $0x2d8] sm:$0xff]  ;;  %v5650_v10 = vld [vmem:[%s11971_s13 + $0x2c0] sm:$0xff] }
0x1fa5   :  { %5991 = vmatpush1.msra.mxu0 %v5678_v58  ;;  %6068 = vmatpush1.msra.mxu1 %v5680_v25  ;;  %v5807_v44 = vrot.slane %v5799_v4, %v9792_v26  ;;  %v5814_v45 = vrot.slane %v5800_v39, %v9792_v26  ;;  %v5652_v58 = vld [vmem:[%s11971_s13 + $0x2d0] sm:$0xff]  ;;  %v5635_v25 = vld [vmem:[%s11971_s13 + $0x248] sm:$0xff] }
0x1fa6   :  { %5992 = vmatprep.subr.mxu0 %v5663_v1  ;;  %6069 = vmatprep.subr.mxu1 %v5665_v47  ;;  %v5637_v1 = vld [vmem:[%s11971_s13 + $0x258] sm:$0xff]  ;;  %v5634_v47 = vld [vmem:[%s11971_s13 + $0x240] sm:$0xff]  ;;  %v5636_v4 = vld [vmem:[%s11971_s13 + $0x250] sm:$0xff] }
0x1fa7   :  { %5993 = vmatpush1.msra.mxu0 %v5662_v12  ;;  %6070 = vmatpush1.msra.mxu1 %v5664_v18  ;;  %v10618_v20 = vcombine.low %v5807_v44, %v5814_v45  ;;  %v5619_v39 = vld [vmem:[%s11971_s13 + $0x1c8] sm:$0xff]  ;;  %v5621_v12 = vld [vmem:[%s11971_s13 + $0x1d8] sm:$0xff]  ;;  %v5618_v18 = vld [vmem:[%s11971_s13 + $0x1c0] sm:$0xff] }
0x1fa8   :  { %5890 = vmatprep.mubr.f32.mxu0 %v9122_v0  ;;  %5967 = vmatprep.mubr.f32.mxu1 %v9122_v0  ;;  %v5620_v44 = vld [vmem:[%s11971_s13 + $0x1d0] sm:$0xff]  ;;  %v5603_v45 = vld [vmem:[%s11971_s13 + $0x148] sm:$0xff] }
0x1fa9   :  { %5994 = vmatprep.subr.mxu0 %v5647_v41  ;;  %6071 = vmatprep.subr.mxu1 %v5649_v21  ;;  %v5605_v41 = vld [vmem:[%s11971_s13 + $0x158] sm:$0xff]  ;;  %v5602_v21 = vld [vmem:[%s11971_s13 + $0x140] sm:$0xff] }
0x1faa   :  { %8028 = vmatmul.mubr.msk.f32.gmra.mxu0 %vm2026_vm6, %v10618_v20  ;;  %8030 = vmatmul.mubr.msk.f32.gmra.mxu1 %vm2026_vm6, %v10618_v20 }
0x1fab   :  { %5995 = vmatpush1.msra.mxu0 %v5646_v24  ;;  %6072 = vmatpush1.msra.mxu1 %v5648_v29  ;;  %v5604_v24 = vld [vmem:[%s11971_s13 + $0x150] sm:$0xff]  ;;  %v5587_v29 = vld [vmem:[%s11971_s13 + $0xc8] sm:$0xff] }
0x1fac   :  { %5996 = vmatprep.subr.mxu0 %v5631_v30  ;;  %6073 = vmatprep.subr.mxu1 %v5633_v33  ;;  %v5589_v30 = vld [vmem:[%s11971_s13 + $0xd8] sm:$0xff]  ;;  %v5586_v33 = vld [vmem:[%s11971_s13 + $0xc0] sm:$0xff] }
0x1fad   :  { %5997 = vmatpush1.msra.mxu0 %v5630_v6  ;;  %6074 = vmatpush1.msra.mxu1 %v5632_v11  ;;  %v5588_v6 = vld [vmem:[%s11971_s13 + $0xd0] sm:$0xff]  ;;  %v5571_v11 = vld [vmem:[%s11971_s13 + $0x48] sm:$0xff] }
0x1fae   :  { %5998 = vmatprep.subr.mxu0 %v5615_v23  ;;  %6075 = vmatprep.subr.mxu1 %v5617_v38  ;;  %v5573_v23 = vld [vmem:[%s11971_s13 + $0x58] sm:$0xff]  ;;  %v5570_v38 = vld [vmem:[%s11971_s13 + $0x40] sm:$0xff] }
0x1faf   :  { %5999 = vmatpush1.msra.mxu0 %v5614_v34  ;;  %6076 = vmatpush1.msra.mxu1 %v5616_v32  ;;  %v5572_v34 = vld [vmem:[%s11971_s13 + $0x50] sm:$0xff]  ;;  %v5687_v32 = vld [vmem:[%s11971_s13 + $0x3e8] sm:$0xff] }
0x1fb0   :  { %6000 = vmatprep.subr.mxu0 %v5599_v13  ;;  %6077 = vmatprep.subr.mxu1 %v5601_v19  ;;  %v5689_v13 = vld [vmem:[%s11971_s13 + $0x3f8] sm:$0xff]  ;;  %v5686_v19 = vld [vmem:[%s11971_s13 + $0x3e0] sm:$0xff] }
0x1fb1   :  { %6001 = vmatpush1.msra.mxu0 %v5598_v55  ;;  %6078 = vmatpush1.msra.mxu1 %v5600_v59  ;;  %v5688_v55 = vld [vmem:[%s11971_s13 + $0x3f0] sm:$0xff]  ;;  %v5671_v59 = vld [vmem:[%s11971_s13 + $0x368] sm:$0xff] }
0x1fb2   :  { %6002 = vmatprep.subr.mxu0 %v5583_v54  ;;  %6079 = vmatprep.subr.mxu1 %v5585_v35  ;;  %v5673_v54 = vld [vmem:[%s11971_s13 + $0x378] sm:$0xff]  ;;  %v5670_v35 = vld [vmem:[%s11971_s13 + $0x360] sm:$0xff] }
0x1fb3   :  { %6003 = vmatpush1.msra.mxu0 %v5582_v16  ;;  %6080 = vmatpush1.msra.mxu1 %v5584_v63  ;;  %v5672_v16 = vld [vmem:[%s11971_s13 + $0x370] sm:$0xff]  ;;  %v5655_v63 = vld [vmem:[%s11971_s13 + $0x2e8] sm:$0xff] }
0x1fb4   :  { %6004 = vmatprep.subr.mxu0 %v5567_v57  ;;  %6081 = vmatprep.subr.mxu1 %v5569_v3  ;;  %v5657_v57 = vld [vmem:[%s11971_s13 + $0x2f8] sm:$0xff]  ;;  %v5654_v3 = vld [vmem:[%s11971_s13 + $0x2e0] sm:$0xff] }
0x1fb5   :  { %6005 = vmatpush1.msra.mxu0 %v5566_v51  ;;  %6038 = vmatprep.mubr.f32.mxu0 %v9122_v0  ;;  %v5656_v51 = vld [vmem:[%s11971_s13 + $0x2f0] sm:$0xff] }
0x1fb6   :  { %6082 = vmatpush1.msra.mxu1 %v5568_v40  ;;  %6115 = vmatprep.mubr.f32.mxu1 %v9122_v0  ;;  %v5639_v40 = vld [vmem:[%s11971_s13 + $0x268] sm:$0xff] }
0x1fb7   :  { %8031 = vmatmul.mubr.msk.f32.vlgmr.msra.gmra.mxu0 %vm2026_vm6, %v10582_v43  ;;  %8033 = vmatmul.mubr.msk.f32.vlgmr.msra.gmra.mxu1 %vm2026_vm6, %v10582_v43 }
0x1fb8   :  { %6144 = vmatprep.subr.mxu0 %v5683_v8  ;;  %6221 = vmatprep.subr.mxu1 %v5685_v5  ;;  %v5641_v8 = vld [vmem:[%s11971_s13 + $0x278] sm:$0xff]  ;;  %v5638_v5 = vld [vmem:[%s11971_s13 + $0x260] sm:$0xff] }
0x1fb9   :  { %6145 = vmatpush1.msra.mxu0 %v5682_v15  ;;  %6222 = vmatpush1.msra.mxu1 %v5684_v42  ;;  %v5640_v15 = vld [vmem:[%s11971_s13 + $0x270] sm:$0xff]  ;;  %v5623_v42 = vld [vmem:[%s11971_s13 + $0x1e8] sm:$0xff] }
0x1fba   :  { %6146 = vmatprep.subr.mxu0 %v5667_v36  ;;  %6223 = vmatprep.subr.mxu1 %v5669_v48  ;;  %v5625_v36 = vld [vmem:[%s11971_s13 + $0x1f8] sm:$0xff]  ;;  %v5622_v48 = vld [vmem:[%s11971_s13 + $0x1e0] sm:$0xff] }
0x1fbb   :  { %6044 = vmatprep.mubr.f32.mxu0 %v9122_v0  ;;  %6121 = vmatprep.mubr.f32.mxu1 %v9122_v0 }
0x1fbc   :  { %6147 = vmatpush1.msra.mxu0 %v5666_v2  ;;  %6224 = vmatpush1.msra.mxu1 %v5668_v52  ;;  %v5624_v2 = vld [vmem:[%s11971_s13 + $0x1f0] sm:$0xff]  ;;  %v5607_v52 = vld [vmem:[%s11971_s13 + $0x168] sm:$0xff] }
0x1fbd   :  { %8032 = vmatmul.mubr.msk.f32.gmra.mxu0 %vm2026_vm6, %v10618_v20  ;;  %8034 = vmatmul.mubr.msk.f32.gmra.mxu1 %vm2026_vm6, %v10618_v20 }
0x1fbe   :  { %6148 = vmatprep.subr.mxu0 %v5651_v9  ;;  %6225 = vmatprep.subr.mxu1 %v5653_v56  ;;  %v5609_v9 = vld [vmem:[%s11971_s13 + $0x178] sm:$0xff]  ;;  %v5606_v56 = vld [vmem:[%s11971_s13 + $0x160] sm:$0xff] }
0x1fbf   :  { %6149 = vmatpush1.msra.mxu0 %v5650_v10  ;;  %6226 = vmatpush1.msra.mxu1 %v5652_v58  ;;  %v5608_v10 = vld [vmem:[%s11971_s13 + $0x170] sm:$0xff]  ;;  %v5591_v58 = vld [vmem:[%s11971_s13 + $0xe8] sm:$0xff] }
0x1fc0   :  { %6150 = vmatprep.subr.mxu0 %v5635_v25  ;;  %6227 = vmatprep.subr.mxu1 %v5637_v1  ;;  %v5593_v25 = vld [vmem:[%s11971_s13 + $0xf8] sm:$0xff]  ;;  %v5590_v1 = vld [vmem:[%s11971_s13 + $0xe0] sm:$0xff] }
0x1fc1   :  { %6151 = vmatpush1.msra.mxu0 %v5634_v47  ;;  %6228 = vmatpush1.msra.mxu1 %v5636_v4  ;;  %v5592_v47 = vld [vmem:[%s11971_s13 + $0xf0] sm:$0xff]  ;;  %v5575_v4 = vld [vmem:[%s11971_s13 + $0x68] sm:$0xff] }
0x1fc2   :  { %6152 = vmatprep.subr.mxu0 %v5619_v39  ;;  %6229 = vmatprep.subr.mxu1 %v5621_v12  ;;  %v5577_v39 = vld [vmem:[%s11971_s13 + $0x78] sm:$0xff]  ;;  %v5574_v12 = vld [vmem:[%s11971_s13 + $0x60] sm:$0xff] }
0x1fc3   :  { %6153 = vmatpush1.msra.mxu0 %v5618_v18  ;;  %6230 = vmatpush1.msra.mxu1 %v5620_v44  ;;  %v5576_v18 = vld [vmem:[%s11971_s13 + $0x70] sm:$0xff]  ;;  %v6499_v44 = vld [vmem:[%s11974_s15 + $0xf8] sm:$0xff] }
0x1fc4   :  { %6154 = vmatprep.subr.mxu0 %v5603_v45  ;;  %6231 = vmatprep.subr.mxu1 %v5605_v41  ;;  %v6531_v45 = vld [vmem:[%s11974_s15 + $0x1f8] sm:$0xff] }
0x1fc5   :  { %6155 = vmatpush1.msra.mxu0 %v5602_v21  ;;  %6232 = vmatpush1.msra.mxu1 %v5604_v24  ;;  %v6483_v41 = vld [vmem:[%s11974_s15 + $0x78] sm:$0xff]  ;;  %v6498_v24 = vld [vmem:[%s11974_s15 + $0xf0] sm:$0xff] }
0x1fc6   :  { %6156 = vmatprep.subr.mxu0 %v5587_v29  ;;  %6233 = vmatprep.subr.mxu1 %v5589_v30  ;;  %v6515_v21 = vld [vmem:[%s11974_s15 + $0x178] sm:$0xff]  ;;  %v6482_v29 = vld [vmem:[%s11974_s15 + $0x70] sm:$0xff]  ;;  %v6497_v30 = vld [vmem:[%s11974_s15 + $0xe8] sm:$0xff] }
0x1fc7   :  { %6157 = vmatpush1.msra.mxu0 %v5586_v33  ;;  %6234 = vmatpush1.msra.mxu1 %v5588_v6  ;;  %v6529_v33 = vld [vmem:[%s11974_s15 + $0x1e8] sm:$0xff] }
0x1fc8   :  { %6158 = vmatprep.subr.mxu0 %v5571_v11  ;;  %6235 = vmatprep.subr.mxu1 %v5573_v23  ;;  %v6481_v6 = vld [vmem:[%s11974_s15 + $0x68] sm:$0xff]  ;;  %v6528_v23 = vld [vmem:[%s11974_s15 + $0x1e0] sm:$0xff] }
0x1fc9   :  { %6159 = vmatpush1.msra.mxu0 %v5570_v38  ;;  %6192 = vmatprep.mubr.f32.mxu0 %v9122_v0  ;;  %v6513_v11 = vld [vmem:[%s11974_s15 + $0x168] sm:$0xff]  ;;  %v6480_v38 = vld [vmem:[%s11974_s15 + $0x60] sm:$0xff] }
0x1fca   :  { %6236 = vmatpush1.msra.mxu1 %v5572_v34  ;;  %6269 = vmatprep.mubr.f32.mxu1 %v9122_v0  ;;  %v6512_v34 = vld [vmem:[%s11974_s15 + $0x160] sm:$0xff] }
0x1fcb   :  { %8035 = vmatmul.mubr.msk.f32.vlgmr.msra.gmra.mxu0 %vm2026_vm6, %v10582_v43  ;;  %8037 = vmatmul.mubr.msk.f32.vlgmr.msra.gmra.mxu1 %vm2026_vm6, %v10582_v43 }
0x1fcc   :  { %6298 = vmatprep.subr.mxu0 %v5687_v32  ;;  %6375 = vmatprep.subr.mxu1 %v5689_v13  ;;  %v6495_v32 = vld [vmem:[%s11974_s15 + $0xd8] sm:$0xff] }
0x1fcd   :  { %6299 = vmatpush1.msra.mxu0 %v5686_v19  ;;  %6376 = vmatpush1.msra.mxu1 %v5688_v55  ;;  %v6527_v13 = vld [vmem:[%s11974_s15 + $0x1d8] sm:$0xff] }
0x1fce   :  { %6300 = vmatprep.subr.mxu0 %v5671_v59  ;;  %6377 = vmatprep.subr.mxu1 %v5673_v54  ;;  %v6479_v19 = vld [vmem:[%s11974_s15 + $0x58] sm:$0xff]  ;;  %v6494_v59 = vld [vmem:[%s11974_s15 + $0xd0] sm:$0xff] }
0x1fcf   :  { %6198 = vmatprep.mubr.f32.mxu0 %v9122_v0  ;;  %6275 = vmatprep.mubr.f32.mxu1 %v9122_v0  ;;  %v6511_v55 = vld [vmem:[%s11974_s15 + $0x158] sm:$0xff]  ;;  %v6526_v54 = vld [vmem:[%s11974_s15 + $0x1d0] sm:$0xff] }
0x1fd0   :  { %6301 = vmatpush1.msra.mxu0 %v5670_v35  ;;  %6378 = vmatpush1.msra.mxu1 %v5672_v16  ;;  %v6478_v35 = vld [vmem:[%s11974_s15 + $0x50] sm:$0xff] }
0x1fd1   :  { %8036 = vmatmul.mubr.msk.f32.gmra.mxu0 %vm2026_vm6, %v10618_v20  ;;  %8038 = vmatmul.mubr.msk.f32.gmra.mxu1 %vm2026_vm6, %v10618_v20  ;;  %v6510_v16 = vld [vmem:[%s11974_s15 + $0x150] sm:$0xff] }
0x1fd2   :  { %6302 = vmatprep.subr.mxu0 %v5655_v63  ;;  %6379 = vmatprep.subr.mxu1 %v5657_v57  ;;  %v6493_v63 = vld [vmem:[%s11974_s15 + $0xc8] sm:$0xff] }
0x1fd3   :  { %6303 = vmatpush1.msra.mxu0 %v5654_v3  ;;  %6380 = vmatpush1.msra.mxu1 %v5656_v51  ;;  %v6525_v57 = vld [vmem:[%s11974_s15 + $0x1c8] sm:$0xff] }
0x1fd4   :  { %6304 = vmatprep.subr.mxu0 %v5639_v40  ;;  %6381 = vmatprep.subr.mxu1 %v5641_v8  ;;  %v6477_v3 = vld [vmem:[%s11974_s15 + $0x48] sm:$0xff]  ;;  %v6492_v40 = vld [vmem:[%s11974_s15 + $0xc0] sm:$0xff] }
0x1fd5   :  { %6305 = vmatpush1.msra.mxu0 %v5638_v5  ;;  %6382 = vmatpush1.msra.mxu1 %v5640_v15  ;;  %v6509_v51 = vld [vmem:[%s11974_s15 + $0x148] sm:$0xff]  ;;  %v6524_v8 = vld [vmem:[%s11974_s15 + $0x1c0] sm:$0xff] }
0x1fd6   :  { %6306 = vmatprep.subr.mxu0 %v5623_v42  ;;  %6383 = vmatprep.subr.mxu1 %v5625_v36  ;;  %v6476_v5 = vld [vmem:[%s11974_s15 + $0x40] sm:$0xff]  ;;  %v6491_v42 = vld [vmem:[%s11974_s15 + $0xb8] sm:$0xff] }
0x1fd7   :  { %6307 = vmatpush1.msra.mxu0 %v5622_v48  ;;  %6384 = vmatpush1.msra.mxu1 %v5624_v2  ;;  %v6508_v15 = vld [vmem:[%s11974_s15 + $0x140] sm:$0xff]  ;;  %v6523_v36 = vld [vmem:[%s11974_s15 + $0x1b8] sm:$0xff] }
0x1fd8   :  { %6308 = vmatprep.subr.mxu0 %v5607_v52  ;;  %6385 = vmatprep.subr.mxu1 %v5609_v9  ;;  %v6475_v48 = vld [vmem:[%s11974_s15 + $0x38] sm:$0xff]  ;;  %v6490_v52 = vld [vmem:[%s11974_s15 + $0xb0] sm:$0xff] }
0x1fd9   :  { %6309 = vmatpush1.msra.mxu0 %v5606_v56  ;;  %6386 = vmatpush1.msra.mxu1 %v5608_v10  ;;  %v6507_v2 = vld [vmem:[%s11974_s15 + $0x138] sm:$0xff]  ;;  %v6522_v9 = vld [vmem:[%s11974_s15 + $0x1b0] sm:$0xff] }
0x1fda   :  { %6310 = vmatprep.subr.mxu0 %v5591_v58  ;;  %6387 = vmatprep.subr.mxu1 %v5593_v25  ;;  %v6474_v56 = vld [vmem:[%s11974_s15 + $0x30] sm:$0xff]  ;;  %v6489_v58 = vld [vmem:[%s11974_s15 + $0xa8] sm:$0xff] }
0x1fdb   :  { %6311 = vmatpush1.msra.mxu0 %v5590_v1  ;;  %6388 = vmatpush1.msra.mxu1 %v5592_v47  ;;  %v6506_v10 = vld [vmem:[%s11974_s15 + $0x130] sm:$0xff]  ;;  %v6521_v25 = vld [vmem:[%s11974_s15 + $0x1a8] sm:$0xff] }
0x1fdc   :  { %6312 = vmatprep.subr.mxu0 %v5575_v4  ;;  %6389 = vmatprep.subr.mxu1 %v5577_v39  ;;  %v6473_v1 = vld [vmem:[%s11974_s15 + $0x28] sm:$0xff]  ;;  %v6488_v4 = vld [vmem:[%s11974_s15 + $0xa0] sm:$0xff] }
0x1fdd   :  { %6313 = vmatpush1.msra.mxu0 %v5574_v12  ;;  %6346 = vmatprep.mubr.f32.mxu0 %v9122_v0  ;;  %v6505_v47 = vld [vmem:[%s11974_s15 + $0x128] sm:$0xff]  ;;  %v6520_v39 = vld [vmem:[%s11974_s15 + $0x1a0] sm:$0xff] }
0x1fde   :  { %6390 = vmatpush1.msra.mxu1 %v5576_v18  ;;  %6423 = vmatprep.mubr.f32.mxu1 %v9122_v0  ;;  %v6472_v12 = vld [vmem:[%s11974_s15 + $0x20] sm:$0xff] }
0x1fdf   :  { %8039 = vmatmul.mubr.msk.f32.vlgmr.msra.gmra.mxu0 %vm2026_vm6, %v10582_v43  ;;  %8041 = vmatmul.mubr.msk.f32.vlgmr.msra.gmra.mxu1 %vm2026_vm6, %v10582_v43  ;;  %v6530_v43 = vld [vmem:[%s11974_s15 + $0x1f0] sm:$0xff]  ;;  %v6504_v18 = vld [vmem:[%s11974_s15 + $0x120] sm:$0xff] }
0x1fe0   :  { %6352 = vmatprep.mubr.f32.mxu0 %v9122_v0  ;;  %6429 = vmatprep.mubr.f32.mxu1 %v9122_v0  ;;  %v6514_v0 = vld [vmem:[%s11974_s15 + $0x170] sm:$0xff] }
0x1fe1   :  { %8205 = vmatprep.subr.mxu0 %v6499_v44  ;;  %8243 = vmatprep.subr.mxu1 %v6531_v45  ;;  %v6487_v44 = vld [vmem:[%s11974_s15 + $0x98] sm:$0xff] }
0x1fe2   :  { %8206 = vmatpush3.msra.mxu0 %v6483_v41  ;;  %8244 = vmatpush3.msra.mxu1 %v6515_v21  ;;  %v6519_v45 = vld [vmem:[%s11974_s15 + $0x198] sm:$0xff] }
0x1fe3   :  { %8040 = vmatmul.mubr.msk.f32.gmra.mxu0 %vm2026_vm6, %v10618_v20  ;;  %8042 = vmatmul.mubr.msk.f32.gmra.mxu1 %vm2026_vm6, %v10618_v20  ;;  %v6496_v20 = vld [vmem:[%s11974_s15 + $0xe0] sm:$0xff]  ;;  %v6471_v41 = vld [vmem:[%s11974_s15 + $0x18] sm:$0xff] }
0x1fe4   :  { %8207 = vmatprep.subr.mxu0 %v6498_v24  ;;  %8245 = vmatprep.subr.mxu1 %v6530_v43  ;;  %v6503_v21 = vld [vmem:[%s11974_s15 + $0x118] sm:$0xff]  ;;  %v6486_v24 = vld [vmem:[%s11974_s15 + $0x90] sm:$0xff] }
0x1fe5   :  { %8208 = vmatpush3.msra.mxu0 %v6482_v29  ;;  %8246 = vmatpush3.msra.mxu1 %v6514_v0  ;;  %v6518_v43 = vld [vmem:[%s11974_s15 + $0x190] sm:$0xff] }
0x1fe6   :  { %8209 = vmatprep.subr.mxu0 %v6497_v30  ;;  %8247 = vmatprep.subr.mxu1 %v6529_v33  ;;  %v6470_v29 = vld [vmem:[%s11974_s15 + $0x10] sm:$0xff]  ;;  %v6485_v30 = vld [vmem:[%s11974_s15 + $0x88] sm:$0xff] }
0x1fe7   :  { %8210 = vmatpush3.msra.mxu0 %v6481_v6  ;;  %8248 = vmatpush3.msra.mxu1 %v6513_v11  ;;  %v6502_v0 = vld [vmem:[%s11974_s15 + $0x110] sm:$0xff]  ;;  %v6517_v33 = vld [vmem:[%s11974_s15 + $0x188] sm:$0xff] }
0x1fe8   :  { %8211 = vmatprep.subr.mxu0 %v6496_v20  ;;  %8249 = vmatprep.subr.mxu1 %v6528_v23  ;;  %v6469_v6 = vld [vmem:[%s11974_s15 + $0x8] sm:$0xff]  ;;  %v6484_v20 = vld [vmem:[%s11974_s15 + $0x80] sm:$0xff] }
0x1fe9   :  { %8212 = vmatpush3.msra.mxu0 %v6480_v38  ;;  %8250 = vmatpush3.msra.mxu1 %v6512_v34  ;;  %v6501_v11 = vld [vmem:[%s11974_s15 + $0x108] sm:$0xff]  ;;  %v6516_v23 = vld [vmem:[%s11974_s15 + $0x180] sm:$0xff] }
0x1fea   :  { %8213 = vmatprep.subr.mxu0 %v6495_v32  ;;  %8251 = vmatprep.subr.mxu1 %v6527_v13  ;;  %v6468_v38 = vld [vmem:[%s11974_s15] sm:$0xff]  ;;  %v6563_v32 = vld [vmem:[%s11974_s15 + $0x2f8] sm:$0xff] }
0x1feb   :  { %8214 = vmatpush3.msra.mxu0 %v6479_v19  ;;  %8252 = vmatpush3.msra.mxu1 %v6511_v55  ;;  %v6500_v34 = vld [vmem:[%s11974_s15 + $0x100] sm:$0xff]  ;;  %v6595_v13 = vld [vmem:[%s11974_s15 + $0x3f8] sm:$0xff]  ;;  %v5712_v19 = vsub.s32 4, %v9783_v17  ;;  %v11122_v55 = vld [vmem:[%s11975_s14 + $0x8] sm:$0xff] }
0x1fec   :  { %8215 = vmatprep.subr.mxu0 %v6494_v59  ;;  %8253 = vmatprep.subr.mxu1 %v6526_v54  ;;  %v5720_v54 = vsub.s32 6, %v9783_v17 }
0x1fed   :  { %8216 = vmatpush3.msra.mxu0 %v6478_v35  ;;  %8254 = vmatpush3.msra.mxu1 %v6510_v16  ;;  %v11127_v59 = vrot.slane %v11122_v55, %v5712_v19  ;;  %v5704_v16 = vsub.s32 2, %v9783_v17 }
0x1fee   :  { %8217 = vmatprep.subr.mxu0 %v6493_v63  ;;  %8255 = vmatprep.subr.mxu1 %v6525_v57  ;;  %v11133_v35 = vrot.slane %v11122_v55, %v5720_v54  ;;  %v11139_v63 = vld [vmem:[%s11975_s14] sm:$0xff]  ;;  %v5708_v57 = vsub.s32 3, %v9783_v17 }
0x1fef   :  { %8218 = vmatpush3.msra.mxu0 %v6477_v3  ;;  %8256 = vmatpush3.msra.mxu1 %v6509_v51  ;;  %v5697_v3 = vrot.slane %v11139_v63, %v9831_v50  ;;  %v5705_v51 = vrot.slane %v11139_v63, %v5704_v16 }
0x1ff0   :  { %8219 = vmatprep.subr.mxu0 %v6492_v40  ;;  %8257 = vmatprep.subr.mxu1 %v6524_v8  ;;  %v5701_v40 = vrot.slane %v11139_v63, %v9888_v22  ;;  %v5709_v8 = vrot.slane %v11139_v63, %v5708_v57 }
0x1ff1   :  { %8220 = vmatpush3.msra.mxu0 %v6476_v5  ;;  %8258 = vmatpush3.msra.mxu1 %v6508_v15 }
0x1ff2   :  { %8221 = vmatprep.subr.mxu0 %v6491_v42  ;;  %8259 = vmatprep.subr.mxu1 %v6523_v36 }
0x1ff3   :  { %8222 = vmatpush3.msra.mxu0 %v6475_v48  ;;  %8260 = vmatpush3.msra.mxu1 %v6507_v2 }
0x1ff4   :  { %8223 = vmatprep.subr.mxu0 %v6490_v52  ;;  %8261 = vmatprep.subr.mxu1 %v6522_v9 }
0x1ff5   :  { %8224 = vmatpush3.msra.mxu0 %v6474_v56  ;;  %8262 = vmatpush3.msra.mxu1 %v6506_v10 }
0x1ff6   :  { %8225 = vmatprep.subr.mxu0 %v6489_v58  ;;  %8263 = vmatprep.subr.mxu1 %v6521_v25 }
0x1ff7   :  { %8226 = vmatpush3.msra.mxu0 %v6473_v1  ;;  %8264 = vmatpush3.msra.mxu1 %v6505_v47 }
0x1ff8   :  { %8227 = vmatprep.subr.mxu0 %v6488_v4  ;;  %8265 = vmatprep.subr.mxu1 %v6520_v39  ;;  %v6547_v4 = vld [vmem:[%s11974_s15 + $0x278] sm:$0xff] }
0x1ff9   :  { %8228 = vmatpush3.msra.mxu0 %v6472_v12  ;;  %8266 = vmatpush3.msra.mxu1 %v6504_v18  ;;  %v6579_v39 = vld [vmem:[%s11974_s15 + $0x378] sm:$0xff]  ;;  %v6562_v12 = vld [vmem:[%s11974_s15 + $0x2f0] sm:$0xff] }
0x1ffa   :  { %8229 = vmatprep.subr.mxu0 %v6487_v44  ;;  %8267 = vmatprep.subr.mxu1 %v6519_v45  ;;  %v6594_v18 = vld [vmem:[%s11974_s15 + $0x3f0] sm:$0xff] }
0x1ffb   :  { %8230 = vmatpush3.msra.mxu0 %v6471_v41  ;;  %8268 = vmatpush3.msra.mxu1 %v6503_v21 }
0x1ffc   :  { %8231 = vmatprep.subr.mxu0 %v6486_v24  ;;  %8269 = vmatprep.subr.mxu1 %v6518_v43  ;;  %v6546_v24 = vld [vmem:[%s11974_s15 + $0x270] sm:$0xff] }
0x1ffd   :  { %8232 = vmatpush3.msra.mxu0 %v6470_v29  ;;  %8270 = vmatpush3.msra.mxu1 %v6502_v0  ;;  %v6578_v43 = vld [vmem:[%s11974_s15 + $0x370] sm:$0xff] }
0x1ffe   :  { %8233 = vmatprep.subr.mxu0 %v6485_v30  ;;  %8271 = vmatprep.subr.mxu1 %v6517_v33  ;;  %v6561_v30 = vld [vmem:[%s11974_s15 + $0x2e8] sm:$0xff] }
0x1fff   :  { %8234 = vmatpush3.msra.mxu0 %v6469_v6  ;;  %8272 = vmatpush3.msra.mxu1 %v6501_v11  ;;  %v6593_v33 = vld [vmem:[%s11974_s15 + $0x3e8] sm:$0xff] }
0x2000   :  { %8235 = vmatprep.subr.mxu0 %v6484_v20  ;;  %8273 = vmatprep.subr.mxu1 %v6516_v23 }
0x2001   :  { %8236 = vmatpush3.msra.mxu0 %v6468_v38  ;;  %8274 = vmatpush3.msra.mxu1 %v6500_v34  ;;  %v6545_v38 = vld [vmem:[%s11974_s15 + $0x268] sm:$0xff] }
0x2002   :  { %8281 = vmatprep.subr.mxu0 %v6563_v32  ;;  %8319 = vmatprep.subr.mxu1 %v6595_v13  ;;  %v6577_v34 = vld [vmem:[%s11974_s15 + $0x368] sm:$0xff]  ;;  %v6560_v32 = vld [vmem:[%s11974_s15 + $0x2e0] sm:$0xff] }
0x2003   :  { %v6592_v13 = vld [vmem:[%s11974_s15 + $0x3e0] sm:$0xff] }
0x2064   :  { %v5886_v5 = vpop.f32.mrf.mxu0  ;;  %v5963_v15 = vpop.f32.mrf.mxu1 }
0x2065   :  { %v5887_v42 = vadd.f32 %v5886_v5, %v5697_v3  ;;  %v5964_v36 = vadd.f32 %v5963_v15, %v5705_v51  ;;  %v6559_v5 = vld [vmem:[%s11974_s15 + $0x2d8] sm:$0xff] }
0x2066   :  { %v5888_v48 = vpop.f32.mrf.mxu0  ;;  %v5965_v2 = vpop.f32.mrf.mxu1  ;;  %v6591_v15 = vld [vmem:[%s11974_s15 + $0x3d8] sm:$0xff] }
0x2067   :  { %v5889_v52 = vadd.f32 %v5888_v48, %v5701_v40  ;;  %v5966_v9 = vadd.f32 %v5965_v2, %v5709_v8  ;;  %v6436_v58 = vmax.f32 %v5887_v42, 0.0  ;;  %v6438_v25 = vmax.f32 %v5964_v36, 0.0  ;;  %v6543_v42 = vld [vmem:[%s11974_s15 + $0x258] sm:$0xff]  ;;  %v6558_v48 = vld [vmem:[%s11974_s15 + $0x2d0] sm:$0xff] }
0x2068   :  { %v6575_v36 = vld [vmem:[%s11974_s15 + $0x358] sm:$0xff]  ;;  %v6590_v2 = vld [vmem:[%s11974_s15 + $0x3d0] sm:$0xff] }
0x2069   :  { %v6437_v56 = vmax.f32 %v5889_v52, 0.0  ;;  %v6439_v10 = vmax.f32 %v5966_v9, 0.0 }
0x206a   :  { %v5892_v1 = vpop.f32.mrf.mxu0  ;;  %v5969_v47 = vpop.f32.mrf.mxu1 }
0x206b   :  { %6795 = vmatprep.mubr.f32.mxu0 %v6437_v56  ;;  %6870 = vmatprep.mubr.f32.mxu1 %v6439_v10  ;;  %v5893_v44 = vadd.f32 %v5892_v1, %v5697_v3  ;;  %v5970_v45 = vadd.f32 %v5969_v47, %v5705_v51  ;;  %v6544_v3 = vld [vmem:[%s11974_s15 + $0x260] sm:$0xff]  ;;  %v6542_v56 = vld [vmem:[%s11974_s15 + $0x250] sm:$0xff]  ;;  %v6557_v1 = vld [vmem:[%s11974_s15 + $0x2c8] sm:$0xff] }
0x206c   :  { %v5894_v41 = vpop.f32.mrf.mxu0  ;;  %v5971_v21 = vpop.f32.mrf.mxu1  ;;  %6796 = vmatmul.mubr.f32.vlgmr.msra.gmra.mxu0 %v6436_v58  ;;  %6871 = vmatmul.mubr.f32.vlgmr.msra.gmra.mxu1 %v6438_v25  ;;  %v6576_v51 = vld [vmem:[%s11974_s15 + $0x360] sm:$0xff]  ;;  %v6574_v10 = vld [vmem:[%s11974_s15 + $0x350] sm:$0xff]  ;;  %v6589_v47 = vld [vmem:[%s11974_s15 + $0x3c8] sm:$0xff] }
0x206d   :  { %v5895_v29 = vadd.f32 %v5894_v41, %v5701_v40  ;;  %v5972_v0 = vadd.f32 %v5971_v21, %v5709_v8  ;;  %8282 = vmatpush3.msra.mxu0 %v6547_v4  ;;  %8320 = vmatpush3.msra.mxu1 %v6579_v39  ;;  %v6452_v20 = vmax.f32 %v5893_v44, 0.0  ;;  %v6454_v23 = vmax.f32 %v5970_v45, 0.0  ;;  %v6541_v4 = vld [vmem:[%s11974_s15 + $0x248] sm:$0xff]  ;;  %v6556_v44 = vld [vmem:[%s11974_s15 + $0x2c0] sm:$0xff] }
0x206e   :  { %8283 = vmatprep.subr.mxu0 %v6562_v12  ;;  %8321 = vmatprep.subr.mxu1 %v6594_v18  ;;  %v5716_v40 = vsub.s32 5, %v9783_v17  ;;  %v5724_v8 = vsub.s32 7, %v9783_v17  ;;  %v6573_v39 = vld [vmem:[%s11974_s15 + $0x348] sm:$0xff]  ;;  %v6588_v45 = vld [vmem:[%s11974_s15 + $0x3c0] sm:$0xff]  ;;  %v6707_v17 = vld [vmem:[%s11974_s15 + $0x778] sm:$0xff] }
0x206f   :  { %v6453_v6 = vmax.f32 %v5895_v29, 0.0  ;;  %v6455_v11 = vmax.f32 %v5972_v0, 0.0  ;;  %8284 = vmatpush3.msra.mxu0 %v6546_v24  ;;  %8322 = vmatpush3.msra.mxu1 %v6578_v43  ;;  %v6540_v24 = vld [vmem:[%s11974_s15 + $0x240] sm:$0xff] }
0x2070   :  { %8285 = vmatprep.subr.mxu0 %v6561_v30  ;;  %8323 = vmatprep.subr.mxu1 %v6593_v33  ;;  %v11217_v52 = vrot.slane %v11139_v63, %v5716_v40  ;;  %v11222_v9 = vrot.slane %v11139_v63, %v5724_v8  ;;  %v6572_v43 = vld [vmem:[%s11974_s15 + $0x340] sm:$0xff]  ;;  %v6555_v30 = vld [vmem:[%s11974_s15 + $0x2b8] sm:$0xff] }
0x2071   :  { %6800 = vmatprep.mubr.f32.mxu0 %v6453_v6  ;;  %6875 = vmatprep.mubr.f32.mxu1 %v6455_v11  ;;  %v6587_v33 = vld [vmem:[%s11974_s15 + $0x3b8] sm:$0xff] }
0x2072   :  { %6801 = vmatmul.mubr.f32.gmra.mxu0 %v6452_v20  ;;  %6876 = vmatmul.mubr.f32.gmra.mxu1 %v6454_v23  ;;  %v6539_v6 = vld [vmem:[%s11974_s15 + $0x238] sm:$0xff]  ;;  %v6554_v20 = vld [vmem:[%s11974_s15 + $0x2b0] sm:$0xff] }
0x2073   :  { %8286 = vmatpush3.msra.mxu0 %v6545_v38  ;;  %8324 = vmatpush3.msra.mxu1 %v6577_v34  ;;  %v6571_v11 = vld [vmem:[%s11974_s15 + $0x338] sm:$0xff]  ;;  %v6586_v23 = vld [vmem:[%s11974_s15 + $0x3b0] sm:$0xff] }
0x2074   :  { %8287 = vmatprep.subr.mxu0 %v6560_v32  ;;  %8325 = vmatprep.subr.mxu1 %v6592_v13  ;;  %v6538_v38 = vld [vmem:[%s11974_s15 + $0x230] sm:$0xff]  ;;  %v6553_v32 = vld [vmem:[%s11974_s15 + $0x2a8] sm:$0xff] }
0x2075   :  { %8288 = vmatpush3.msra.mxu0 %v6544_v3  ;;  %8326 = vmatpush3.msra.mxu1 %v6576_v51  ;;  %v6570_v34 = vld [vmem:[%s11974_s15 + $0x330] sm:$0xff]  ;;  %v6585_v13 = vld [vmem:[%s11974_s15 + $0x3a8] sm:$0xff] }
0x2076   :  { %8289 = vmatprep.subr.mxu0 %v6559_v5  ;;  %8327 = vmatprep.subr.mxu1 %v6591_v15  ;;  %v6537_v3 = vld [vmem:[%s11974_s15 + $0x228] sm:$0xff]  ;;  %v6552_v5 = vld [vmem:[%s11974_s15 + $0x2a0] sm:$0xff] }
0x2077   :  { %v11230_v58 = vpop.f32.mrf.mxu0  ;;  %v11232_v25 = vpop.f32.mrf.mxu1  ;;  %8290 = vmatpush3.msra.mxu0 %v6543_v42  ;;  %8328 = vmatpush3.msra.mxu1 %v6575_v36  ;;  %v6569_v51 = vld [vmem:[%s11974_s15 + $0x328] sm:$0xff]  ;;  %v6584_v15 = vld [vmem:[%s11974_s15 + $0x3a0] sm:$0xff] }
0x2078   :  { %8291 = vmatprep.subr.mxu0 %v6558_v48  ;;  %8329 = vmatprep.subr.mxu1 %v6590_v2  ;;  %v6536_v42 = vld [vmem:[%s11974_s15 + $0x220] sm:$0xff] }
0x2079   :  { %v6042_v12 = vpop.f32.mrf.mxu0  ;;  %v6119_v18 = vpop.f32.mrf.mxu1  ;;  %8292 = vmatpush3.msra.mxu0 %v6542_v56  ;;  %8330 = vmatpush3.msra.mxu1 %v6574_v10  ;;  %v6568_v36 = vld [vmem:[%s11974_s15 + $0x320] sm:$0xff]  ;;  %v6551_v56 = vld [vmem:[%s11974_s15 + $0x298] sm:$0xff] }
0x207a   :  { %v6043_v41 = vadd.f32 %v6042_v12, %v11217_v52  ;;  %v6120_v21 = vadd.f32 %v6119_v18, %v11222_v9  ;;  %8293 = vmatprep.subr.mxu0 %v6557_v1  ;;  %8331 = vmatprep.subr.mxu1 %v6589_v47  ;;  %v6583_v10 = vld [vmem:[%s11974_s15 + $0x398] sm:$0xff]  ;;  %v5713_v1 = vrot.slane %v11139_v63, %v5712_v19  ;;  %v6550_v19 = vld [vmem:[%s11974_s15 + $0x290] sm:$0xff] }
0x207b   :  { %8294 = vmatpush3.msra.mxu0 %v6541_v4  ;;  %8332 = vmatpush3.msra.mxu1 %v6573_v39  ;;  %v5721_v47 = vrot.slane %v11139_v63, %v5720_v54  ;;  %v6535_v4 = vld [vmem:[%s11974_s15 + $0x218] sm:$0xff]  ;;  %v6582_v54 = vld [vmem:[%s11974_s15 + $0x390] sm:$0xff] }
0x207c   :  { %v6441_v29 = vmax.f32 %v6043_v41, 0.0  ;;  %v6443_v0 = vmax.f32 %v6120_v21, 0.0  ;;  %8295 = vmatprep.subr.mxu0 %v6556_v44  ;;  %8333 = vmatprep.subr.mxu1 %v6588_v45  ;;  %v6567_v39 = vld [vmem:[%s11974_s15 + $0x318] sm:$0xff]  ;;  %v6534_v63 = vld [vmem:[%s11974_s15 + $0x210] sm:$0xff]  ;;  %v6549_v45 = vld [vmem:[%s11974_s15 + $0x288] sm:$0xff]  ;;  %v6041_v21 = vadd.f32 %v11230_v58, %v5713_v1 }
0x207d   :  { %8296 = vmatpush3.msra.mxu0 %v6540_v24  ;;  %8334 = vmatpush3.msra.mxu1 %v6572_v43  ;;  %v6046_v48 = vpop.f32.mrf.mxu0  ;;  %v6123_v2 = vpop.f32.mrf.mxu1  ;;  %v6566_v12 = vld [vmem:[%s11974_s15 + $0x310] sm:$0xff]  ;;  %v6581_v41 = vld [vmem:[%s11974_s15 + $0x388] sm:$0xff]  ;;  %v6118_v24 = vadd.f32 %v11232_v25, %v5721_v47  ;;  %v6580_v58 = vld [vmem:[%s11974_s15 + $0x380] sm:$0xff] }
0x207e   :  { %6945 = vmatprep.mubr.f32.mxu0 %v6441_v29  ;;  %7020 = vmatprep.mubr.f32.mxu1 %v6443_v0  ;;  %v6533_v43 = vld [vmem:[%s11974_s15 + $0x208] sm:$0xff]  ;;  %v6548_v0 = vld [vmem:[%s11974_s15 + $0x280] sm:$0xff] }
0x207f   :  { %8297 = vmatprep.subr.mxu0 %v6555_v30  ;;  %8335 = vmatprep.subr.mxu1 %v6587_v33  ;;  %v6048_v18 = vpop.f32.mrf.mxu0  ;;  %v6125_v44 = vpop.f32.mrf.mxu1  ;;  %v6565_v29 = vld [vmem:[%s11974_s15 + $0x308] sm:$0xff] }
0x2080   :  { %8298 = vmatpush3.msra.mxu0 %v6539_v6  ;;  %8336 = vmatpush3.msra.mxu1 %v6571_v11  ;;  %v6049_v25 = vadd.f32 %v6048_v18, %v11217_v52  ;;  %v6126_v30 = vadd.f32 %v6125_v44, %v11222_v9  ;;  %v6532_v11 = vld [vmem:[%s11974_s15 + $0x200] sm:$0xff]  ;;  %v6442_v52 = vmax.f32 %v6118_v24, 0.0  ;;  %v11372_v9 = vrot.slane %v11122_v55, %v9888_v22  ;;  %v6623_v24 = vld [vmem:[%s11974_s15 + $0x4d8] sm:$0xff] }
0x2081   :  { %8299 = vmatprep.subr.mxu0 %v6554_v20  ;;  %8337 = vmatprep.subr.mxu1 %v6586_v23  ;;  %v6564_v20 = vld [vmem:[%s11974_s15 + $0x300] sm:$0xff]  ;;  %v6440_v23 = vmax.f32 %v6041_v21, 0.0  ;;  %v6047_v22 = vadd.f32 %v6046_v48, %v5713_v1  ;;  %v6658_v48 = vld [vmem:[%s11974_s15 + $0x5f0] sm:$0xff] }
0x2082   :  { %8300 = vmatpush3.msra.mxu0 %v6538_v38  ;;  %8338 = vmatpush3.msra.mxu1 %v6570_v34  ;;  %v6627_v38 = vld [vmem:[%s11974_s15 + $0x4f8] sm:$0xff]  ;;  %v6624_v44 = vld [vmem:[%s11974_s15 + $0x4e0] sm:$0xff] }
0x2083   :  { %8301 = vmatprep.subr.mxu0 %v6553_v32  ;;  %8339 = vmatprep.subr.mxu1 %v6585_v13  ;;  %v6659_v34 = vld [vmem:[%s11974_s15 + $0x5f8] sm:$0xff]  ;;  %v11383_v13 = vrot.slane %v11122_v55, %v5708_v57  ;;  %v6626_v57 = vld [vmem:[%s11974_s15 + $0x4f0] sm:$0xff]  ;;  %v6640_v21 = vld [vmem:[%s11974_s15 + $0x560] sm:$0xff] }
0x2084   :  { %8302 = vmatpush3.msra.mxu0 %v6537_v3  ;;  %8340 = vmatpush3.msra.mxu1 %v6569_v51  ;;  %v6124_v3 = vadd.f32 %v6123_v2, %v5721_v47  ;;  %v6457_v51 = vmax.f32 %v6049_v25, 0.0  ;;  %v6456_v47 = vmax.f32 %v6047_v22, 0.0  ;;  %v6654_v25 = vld [vmem:[%s11974_s15 + $0x5d0] sm:$0xff]  ;;  %v6604_v22 = vld [vmem:[%s11974_s15 + $0x440] sm:$0xff] }
0x2085   :  { %8303 = vmatprep.subr.mxu0 %v6552_v5  ;;  %8341 = vmatprep.subr.mxu1 %v6584_v15  ;;  %v6459_v5 = vmax.f32 %v6126_v30, 0.0  ;;  %v6606_v30 = vld [vmem:[%s11974_s15 + $0x450] sm:$0xff] }
0x2086   :  { %8304 = vmatpush3.msra.mxu0 %v6536_v42  ;;  %8342 = vmatpush3.msra.mxu1 %v6568_v36  ;;  %v6611_v42 = vld [vmem:[%s11974_s15 + $0x478] sm:$0xff] }
0x2087   :  { %8305 = vmatprep.subr.mxu0 %v6551_v56  ;;  %8343 = vmatprep.subr.mxu1 %v6583_v10  ;;  %v6643_v36 = vld [vmem:[%s11974_s15 + $0x578] sm:$0xff]  ;;  %v6610_v56 = vld [vmem:[%s11974_s15 + $0x470] sm:$0xff] }
0x2088   :  { %8306 = vmatpush3.msra.mxu0 %v6535_v4  ;;  %8344 = vmatpush3.msra.mxu1 %v6567_v39  ;;  %v6642_v10 = vld [vmem:[%s11974_s15 + $0x570] sm:$0xff]  ;;  %v6458_v4 = vmax.f32 %v6124_v3, 0.0  ;;  %v6625_v39 = vld [vmem:[%s11974_s15 + $0x4e8] sm:$0xff]  ;;  %v6636_v3 = vld [vmem:[%s11974_s15 + $0x540] sm:$0xff] }
0x2089   :  { %8307 = vmatprep.subr.mxu0 %v6550_v19  ;;  %8345 = vmatprep.subr.mxu1 %v6582_v54  ;;  %v6657_v19 = vld [vmem:[%s11974_s15 + $0x5e8] sm:$0xff] }
0x208a   :  { %8308 = vmatpush3.msra.mxu0 %v6534_v63  ;;  %8346 = vmatpush3.msra.mxu1 %v6566_v12  ;;  %v6609_v54 = vld [vmem:[%s11974_s15 + $0x468] sm:$0xff] }
0x208b   :  { %v11360_v33 = vpop.f32.mrf.mxu0  ;;  %v11362_v6 = vpop.f32.mrf.mxu1  ;;  %8309 = vmatprep.subr.mxu0 %v6549_v45  ;;  %8347 = vmatprep.subr.mxu1 %v6581_v41  ;;  %v6641_v12 = vld [vmem:[%s11974_s15 + $0x568] sm:$0xff]  ;;  %v6656_v45 = vld [vmem:[%s11974_s15 + $0x5e0] sm:$0xff] }
0x208c   :  { %8310 = vmatpush3.msra.mxu0 %v6533_v43  ;;  %8348 = vmatpush3.msra.mxu1 %v6565_v29  ;;  %v6608_v41 = vld [vmem:[%s11974_s15 + $0x460] sm:$0xff]  ;;  %v6655_v43 = vld [vmem:[%s11974_s15 + $0x5d8] sm:$0xff] }
0x208d   :  { %8311 = vmatprep.subr.mxu0 %v6548_v0  ;;  %8349 = vmatprep.subr.mxu1 %v6580_v58  ;;  %v6196_v32 = vpop.f32.mrf.mxu0  ;;  %v6273_v15 = vpop.f32.mrf.mxu1  ;;  %v6607_v29 = vld [vmem:[%s11974_s15 + $0x458] sm:$0xff]  ;;  %v6622_v58 = vld [vmem:[%s11974_s15 + $0x4d0] sm:$0xff] }
0x208e   :  { %8312 = vmatpush3.msra.mxu0 %v6532_v11  ;;  %8350 = vmatpush3.msra.mxu1 %v6564_v20  ;;  %v6197_v2 = vadd.f32 %v6196_v32, %v11372_v9  ;;  %v6274_v1 = vadd.f32 %v6273_v15, %v11383_v13  ;;  %v6639_v0 = vld [vmem:[%s11974_s15 + $0x558] sm:$0xff]  ;;  %v6638_v11 = vld [vmem:[%s11974_s15 + $0x550] sm:$0xff]  ;;  %v6621_v20 = vld [vmem:[%s11974_s15 + $0x4c8] sm:$0xff] }
0x208f   :  { %6946 = vmatmul.mubr.f32.vlgmr.msra.gmra.mxu0 %v6440_v23  ;;  %7021 = vmatmul.mubr.f32.vlgmr.msra.gmra.mxu1 %v6442_v52  ;;  %v6653_v23 = vld [vmem:[%s11974_s15 + $0x5c8] sm:$0xff]  ;;  %v6652_v32 = vld [vmem:[%s11974_s15 + $0x5c0] sm:$0xff]  ;;  %v6603_v15 = vld [vmem:[%s11974_s15 + $0x438] sm:$0xff] }
0x2090   :  { %8357 = vmatprep.subr.mxu0 %v6627_v38  ;;  %8395 = vmatprep.subr.mxu1 %v6659_v34  ;;  %v6445_v63 = vmax.f32 %v6197_v2, 0.0  ;;  %v6447_v18 = vmax.f32 %v6274_v1, 0.0  ;;  %v6605_v52 = vld [vmem:[%s11974_s15 + $0x448] sm:$0xff]  ;;  %v6620_v34 = vld [vmem:[%s11974_s15 + $0x4c0] sm:$0xff]  ;;  %v6634_v2 = vld [vmem:[%s11974_s15 + $0x530] sm:$0xff] }
0x2091   :  { %6950 = vmatprep.mubr.f32.mxu0 %v6457_v51  ;;  %7025 = vmatprep.mubr.f32.mxu1 %v6459_v5  ;;  %v6637_v38 = vld [vmem:[%s11974_s15 + $0x548] sm:$0xff]  ;;  %v6619_v51 = vld [vmem:[%s11974_s15 + $0x4b8] sm:$0xff] }
0x2092   :  { %8358 = vmatpush3.msra.mxu0 %v6611_v42  ;;  %8396 = vmatpush3.msra.mxu1 %v6643_v36  ;;  %v6651_v5 = vld [vmem:[%s11974_s15 + $0x5b8] sm:$0xff]  ;;  %v6618_v36 = vld [vmem:[%s11974_s15 + $0x4b0] sm:$0xff]  ;;  %v6601_v1 = vld [vmem:[%s11974_s15 + $0x428] sm:$0xff] }
0x2093   :  { %8359 = vmatprep.subr.mxu0 %v6626_v57  ;;  %8397 = vmatprep.subr.mxu1 %v6658_v48  ;;  %v6635_v42 = vld [vmem:[%s11974_s15 + $0x538] sm:$0xff]  ;;  %v6650_v57 = vld [vmem:[%s11974_s15 + $0x5b0] sm:$0xff] }
0x2094   :  { %8360 = vmatpush3.msra.mxu0 %v6610_v56  ;;  %8398 = vmatpush3.msra.mxu1 %v6642_v10  ;;  %v6602_v48 = vld [vmem:[%s11974_s15 + $0x430] sm:$0xff]  ;;  %v6617_v56 = vld [vmem:[%s11974_s15 + $0x4a8] sm:$0xff] }
0x2095   :  { %6951 = vmatmul.mubr.f32.gmra.mxu0 %v6456_v47  ;;  %7026 = vmatmul.mubr.f32.gmra.mxu1 %v6458_v4  ;;  %v6649_v10 = vld [vmem:[%s11974_s15 + $0x5a8] sm:$0xff]  ;;  %v6616_v4 = vld [vmem:[%s11974_s15 + $0x4a0] sm:$0xff] }
0x2096   :  { %8361 = vmatprep.subr.mxu0 %v6625_v39  ;;  %8399 = vmatprep.subr.mxu1 %v6657_v19  ;;  %v6633_v47 = vld [vmem:[%s11974_s15 + $0x528] sm:$0xff]  ;;  %v6648_v39 = vld [vmem:[%s11974_s15 + $0x5a0] sm:$0xff] }
0x2097   :  { %8362 = vmatpush3.msra.mxu0 %v6609_v54  ;;  %7095 = vmatprep.mubr.f32.mxu0 %v6445_v63  ;;  %v6600_v19 = vld [vmem:[%s11974_s15 + $0x420] sm:$0xff]  ;;  %v6200_v63 = vpop.f32.mrf.mxu0 }
0x2098   :  { %8400 = vmatpush3.msra.mxu1 %v6641_v12  ;;  %7170 = vmatprep.mubr.f32.mxu1 %v6447_v18  ;;  %v6632_v54 = vld [vmem:[%s11974_s15 + $0x520] sm:$0xff]  ;;  %v6277_v12 = vpop.f32.mrf.mxu1  ;;  %v6615_v18 = vld [vmem:[%s11974_s15 + $0x498] sm:$0xff] }
0x2099   :  { %8363 = vmatprep.subr.mxu0 %v6624_v44  ;;  %8401 = vmatprep.subr.mxu1 %v6656_v45  ;;  %v6647_v44 = vld [vmem:[%s11974_s15 + $0x598] sm:$0xff]  ;;  %v5729_v45 = vrot.slane %v11122_v55, %v9831_v50  ;;  %v6614_v50 = vld [vmem:[%s11974_s15 + $0x490] sm:$0xff] }
0x209a   :  { %8364 = vmatpush3.msra.mxu0 %v6608_v41  ;;  %8402 = vmatpush3.msra.mxu1 %v6640_v21  ;;  %v5737_v41 = vrot.slane %v11122_v55, %v5704_v16  ;;  %v6599_v21 = vld [vmem:[%s11974_s15 + $0x418] sm:$0xff]  ;;  %v6646_v16 = vld [vmem:[%s11974_s15 + $0x590] sm:$0xff] }
0x209b   :  { %8365 = vmatprep.subr.mxu0 %v6623_v24  ;;  %8403 = vmatprep.subr.mxu1 %v6655_v43  ;;  %v6631_v24 = vld [vmem:[%s11974_s15 + $0x518] sm:$0xff]  ;;  %v6598_v43 = vld [vmem:[%s11974_s15 + $0x410] sm:$0xff] }
0x209c   :  { %8366 = vmatpush3.msra.mxu0 %v6607_v29  ;;  %8404 = vmatpush3.msra.mxu1 %v6639_v0  ;;  %v6630_v29 = vld [vmem:[%s11974_s15 + $0x510] sm:$0xff]  ;;  %v6202_v0 = vpop.f32.mrf.mxu0 }
0x209d   :  { %8367 = vmatprep.subr.mxu0 %v6622_v58  ;;  %8405 = vmatprep.subr.mxu1 %v6654_v25  ;;  %v6279_v58 = vpop.f32.mrf.mxu1  ;;  %v6613_v25 = vld [vmem:[%s11974_s15 + $0x488] sm:$0xff] }
0x209e   :  { %8368 = vmatpush3.msra.mxu0 %v6606_v30  ;;  %8406 = vmatpush3.msra.mxu1 %v6638_v11  ;;  %v6645_v30 = vld [vmem:[%s11974_s15 + $0x588] sm:$0xff]  ;;  %v6195_v11 = vadd.f32 %v11360_v33, %v5729_v45  ;;  %v6612_v33 = vld [vmem:[%s11974_s15 + $0x480] sm:$0xff] }
0x209f   :  { %8369 = vmatprep.subr.mxu0 %v6621_v20  ;;  %8407 = vmatprep.subr.mxu1 %v6653_v23  ;;  %v6272_v20 = vadd.f32 %v11362_v6, %v5737_v41  ;;  %v6597_v23 = vld [vmem:[%s11974_s15 + $0x408] sm:$0xff]  ;;  %v6644_v6 = vld [vmem:[%s11974_s15 + $0x580] sm:$0xff] }
0x20a0   :  { %8370 = vmatpush3.msra.mxu0 %v6605_v52  ;;  %8408 = vmatpush3.msra.mxu1 %v6637_v38  ;;  %v6629_v52 = vld [vmem:[%s11974_s15 + $0x508] sm:$0xff]  ;;  %v11568_v38 = vpop.f32.mrf.mxu0 }
0x20a1   :  { %8371 = vmatprep.subr.mxu0 %v6620_v34  ;;  %8409 = vmatprep.subr.mxu1 %v6652_v32  ;;  %v6203_v34 = vadd.f32 %v6202_v0, %v11372_v9  ;;  %v6280_v32 = vadd.f32 %v6279_v58, %v11383_v13  ;;  %v11589_v9 = vrot.slane %v11122_v55, %v5716_v40  ;;  %v6691_v13 = vld [vmem:[%s11974_s15 + $0x6f8] sm:$0xff] }
0x20a2   :  { %8372 = vmatpush3.msra.mxu0 %v6604_v22  ;;  %8410 = vmatpush3.msra.mxu1 %v6636_v3  ;;  %v11578_v22 = vpop.f32.mrf.mxu1  ;;  %v6596_v3 = vld [vmem:[%s11974_s15 + $0x400] sm:$0xff]  ;;  %v6201_v40 = vadd.f32 %v6200_v63, %v5729_v45  ;;  %v6719_v0 = vld [vmem:[%s11974_s15 + $0x7d8] sm:$0xff] }
0x20a3   :  { %8373 = vmatprep.subr.mxu0 %v6619_v51  ;;  %8411 = vmatprep.subr.mxu1 %v6651_v5  ;;  %v6628_v51 = vld [vmem:[%s11974_s15 + $0x500] sm:$0xff]  ;;  %v6444_v5 = vmax.f32 %v6195_v11, 0.0  ;;  %v6671_v58 = vld [vmem:[%s11974_s15 + $0x658] sm:$0xff]  ;;  %v6718_v11 = vld [vmem:[%s11974_s15 + $0x7d0] sm:$0xff] }
0x20a4   :  { %8374 = vmatpush3.msra.mxu0 %v6603_v15  ;;  %8412 = vmatpush3.msra.mxu1 %v6635_v42  ;;  %v6446_v15 = vmax.f32 %v6272_v20, 0.0  ;;  %v6723_v42 = vld [vmem:[%s11974_s15 + $0x7f8] sm:$0xff]  ;;  %v6670_v20 = vld [vmem:[%s11974_s15 + $0x650] sm:$0xff] }
0x20a5   :  { %8375 = vmatprep.subr.mxu0 %v6618_v36  ;;  %8413 = vmatprep.subr.mxu1 %v6650_v57  ;;  %v6350_v36 = vpop.f32.mrf.mxu0  ;;  %v11600_v57 = vrot.slane %v11122_v55, %v5724_v8  ;;  %v6690_v55 = vld [vmem:[%s11974_s15 + $0x6f0] sm:$0xff] }
0x20a6   :  { %8376 = vmatpush3.msra.mxu0 %v6602_v48  ;;  %8414 = vmatpush3.msra.mxu1 %v6634_v2  ;;  %v6278_v48 = vadd.f32 %v6277_v12, %v5737_v41  ;;  %v6461_v2 = vmax.f32 %v6203_v34, 0.0  ;;  %v6722_v8 = vld [vmem:[%s11974_s15 + $0x7f0] sm:$0xff]  ;;  %v6689_v12 = vld [vmem:[%s11974_s15 + $0x6e8] sm:$0xff] }
0x20a7   :  { %8377 = vmatprep.subr.mxu0 %v6617_v56  ;;  %8415 = vmatprep.subr.mxu1 %v6649_v10  ;;  %v6463_v56 = vmax.f32 %v6280_v32, 0.0  ;;  %v6427_v10 = vpop.f32.mrf.mxu1  ;;  %v6705_v41 = vld [vmem:[%s11974_s15 + $0x768] sm:$0xff]  ;;  %v6684_v32 = vld [vmem:[%s11974_s15 + $0x6c0] sm:$0xff] }
0x20a8   :  { %8378 = vmatpush3.msra.mxu0 %v6601_v1  ;;  %8416 = vmatpush3.msra.mxu1 %v6633_v47  ;;  %v6675_v1 = vld [vmem:[%s11974_s15 + $0x678] sm:$0xff]  ;;  %v6351_v47 = vadd.f32 %v6350_v36, %v11589_v9  ;;  %v6462_v63 = vmax.f32 %v6278_v48, 0.0  ;;  %v6701_v34 = vld [vmem:[%s11974_s15 + $0x748] sm:$0xff]  ;;  %v6714_v48 = vld [vmem:[%s11974_s15 + $0x7b0] sm:$0xff] }
0x20a9   :  { %8379 = vmatprep.subr.mxu0 %v6616_v4  ;;  %8417 = vmatprep.subr.mxu1 %v6648_v39  ;;  %v6674_v4 = vld [vmem:[%s11974_s15 + $0x670] sm:$0xff]  ;;  %v6699_v36 = vld [vmem:[%s11974_s15 + $0x738] sm:$0xff] }
0x20aa   :  { %8380 = vmatpush3.msra.mxu0 %v6600_v19  ;;  %8418 = vmatpush3.msra.mxu1 %v6632_v54  ;;  %v6706_v39 = vld [vmem:[%s11974_s15 + $0x770] sm:$0xff]  ;;  %v6428_v19 = vadd.f32 %v6427_v10, %v11600_v57  ;;  %v6460_v54 = vmax.f32 %v6201_v40, 0.0  ;;  %v6449_v45 = vmax.f32 %v6351_v47, 0.0  ;;  %v6681_v10 = vld [vmem:[%s11974_s15 + $0x6a8] sm:$0xff]  ;;  %v6712_v47 = vld [vmem:[%s11974_s15 + $0x7a0] sm:$0xff] }
0x20ab   :  { %8381 = vmatprep.subr.mxu0 %v6615_v18  ;;  %8419 = vmatprep.subr.mxu1 %v6647_v44  ;;  %v6721_v18 = vld [vmem:[%s11974_s15 + $0x7e8] sm:$0xff]  ;;  %v6682_v40 = vld [vmem:[%s11974_s15 + $0x6b0] sm:$0xff] }
0x20ac   :  { %8382 = vmatpush3.msra.mxu0 %v6599_v21  ;;  %8420 = vmatpush3.msra.mxu1 %v6631_v24  ;;  %v6673_v44 = vld [vmem:[%s11974_s15 + $0x668] sm:$0xff]  ;;  %v6451_v21 = vmax.f32 %v6428_v19, 0.0  ;;  %v6688_v24 = vld [vmem:[%s11974_s15 + $0x6e0] sm:$0xff] }
0x20ad   :  { %8383 = vmatprep.subr.mxu0 %v6614_v50  ;;  %8421 = vmatprep.subr.mxu1 %v6646_v16  ;;  %v6720_v50 = vld [vmem:[%s11974_s15 + $0x7e0] sm:$0xff] }
0x20ae   :  { %8384 = vmatpush3.msra.mxu0 %v6598_v43  ;;  %8422 = vmatpush3.msra.mxu1 %v6630_v29  ;;  %v6672_v16 = vld [vmem:[%s11974_s15 + $0x660] sm:$0xff]  ;;  %v6687_v29 = vld [vmem:[%s11974_s15 + $0x6d8] sm:$0xff] }
0x20af   :  { %8385 = vmatprep.subr.mxu0 %v6613_v25  ;;  %8423 = vmatprep.subr.mxu1 %v6645_v30  ;;  %v6704_v43 = vld [vmem:[%s11974_s15 + $0x760] sm:$0xff]  ;;  %v6703_v25 = vld [vmem:[%s11974_s15 + $0x758] sm:$0xff]  ;;  %v6686_v30 = vld [vmem:[%s11974_s15 + $0x6d0] sm:$0xff] }
0x20b0   :  { %8386 = vmatpush3.msra.mxu0 %v6597_v23  ;;  %8424 = vmatpush3.msra.mxu1 %v6629_v52  ;;  %v6702_v23 = vld [vmem:[%s11974_s15 + $0x750] sm:$0xff]  ;;  %v6685_v52 = vld [vmem:[%s11974_s15 + $0x6c8] sm:$0xff]  ;;  %v6664_v19 = vld [vmem:[%s11974_s15 + $0x620] sm:$0xff] }
0x20b1   :  { %8387 = vmatprep.subr.mxu0 %v6612_v33  ;;  %8425 = vmatprep.subr.mxu1 %v6644_v6  ;;  %v6717_v33 = vld [vmem:[%s11974_s15 + $0x7c8] sm:$0xff] }
0x20b2   :  { %8388 = vmatpush3.msra.mxu0 %v6596_v3  ;;  %8426 = vmatpush3.msra.mxu1 %v6628_v51  ;;  %v6669_v6 = vld [vmem:[%s11974_s15 + $0x648] sm:$0xff]  ;;  %v6716_v3 = vld [vmem:[%s11974_s15 + $0x7c0] sm:$0xff] }
0x20b3   :  { %7096 = vmatmul.mubr.f32.vlgmr.msra.gmra.mxu0 %v6444_v5  ;;  %7171 = vmatmul.mubr.f32.vlgmr.msra.gmra.mxu1 %v6446_v15  ;;  %v6668_v51 = vld [vmem:[%s11974_s15 + $0x640] sm:$0xff]  ;;  %v6683_v15 = vld [vmem:[%s11974_s15 + $0x6b8] sm:$0xff] }
0x20b4   :  { %8433 = vmatprep.subr.mxu0 %v6691_v13  ;;  %8471 = vmatprep.subr.mxu1 %v6723_v42  ;;  %v6700_v5 = vld [vmem:[%s11974_s15 + $0x740] sm:$0xff]  ;;  %v6715_v13 = vld [vmem:[%s11974_s15 + $0x7b8] sm:$0xff] }
0x20b5   :  { %7100 = vmatprep.mubr.f32.mxu0 %v6461_v2  ;;  %7175 = vmatprep.mubr.f32.mxu1 %v6463_v56  ;;  %v6667_v42 = vld [vmem:[%s11974_s15 + $0x638] sm:$0xff]  ;;  %v6666_v2 = vld [vmem:[%s11974_s15 + $0x630] sm:$0xff] }
0x20b6   :  { %8434 = vmatpush3.msra.mxu0 %v6675_v1  ;;  %8472 = vmatpush3.msra.mxu1 %v6707_v17  ;;  %v6698_v56 = vld [vmem:[%s11974_s15 + $0x730] sm:$0xff]  ;;  %v6713_v1 = vld [vmem:[%s11974_s15 + $0x7a8] sm:$0xff] }
0x20b7   :  { %8435 = vmatprep.subr.mxu0 %v6690_v55  ;;  %8473 = vmatprep.subr.mxu1 %v6722_v8  ;;  %v6665_v17 = vld [vmem:[%s11974_s15 + $0x628] sm:$0xff]  ;;  %v6680_v8 = vld [vmem:[%s11974_s15 + $0x6a0] sm:$0xff] }
0x20b8   :  { %8436 = vmatpush3.msra.mxu0 %v6674_v4  ;;  %8474 = vmatpush3.msra.mxu1 %v6706_v39  ;;  %v6697_v55 = vld [vmem:[%s11974_s15 + $0x728] sm:$0xff]  ;;  %v6354_v4 = vpop.f32.mrf.mxu0  ;;  %v6431_v39 = vpop.f32.mrf.mxu1 }
0x20b9   :  { %7101 = vmatmul.mubr.f32.gmra.mxu0 %v6460_v54  ;;  %7176 = vmatmul.mubr.f32.gmra.mxu1 %v6462_v63  ;;  %v6696_v54 = vld [vmem:[%s11974_s15 + $0x720] sm:$0xff]  ;;  %v6679_v63 = vld [vmem:[%s11974_s15 + $0x698] sm:$0xff] }
0x20ba   :  { %8437 = vmatprep.subr.mxu0 %v6689_v12  ;;  %8475 = vmatprep.subr.mxu1 %v6721_v18  ;;  %v6711_v12 = vld [vmem:[%s11974_s15 + $0x798] sm:$0xff] }
0x20bb   :  { %8438 = vmatpush3.msra.mxu0 %v6673_v44  ;;  %7245 = vmatprep.mubr.f32.mxu0 %v6449_v45  ;;  %v6663_v18 = vld [vmem:[%s11974_s15 + $0x618] sm:$0xff]  ;;  %v6678_v45 = vld [vmem:[%s11974_s15 + $0x690] sm:$0xff] }
0x20bc   :  { %8476 = vmatpush3.msra.mxu1 %v6705_v41  ;;  %7320 = vmatprep.mubr.f32.mxu1 %v6451_v21  ;;  %v6695_v44 = vld [vmem:[%s11974_s15 + $0x718] sm:$0xff]  ;;  %v6710_v41 = vld [vmem:[%s11974_s15 + $0x790] sm:$0xff]  ;;  %v6356_v21 = vpop.f32.mrf.mxu0 }
0x20bd   :  { %8439 = vmatprep.subr.mxu0 %v6688_v24  ;;  %8477 = vmatprep.subr.mxu1 %v6720_v50  ;;  %v6433_v24 = vpop.f32.mrf.mxu1  ;;  %v6662_v50 = vld [vmem:[%s11974_s15 + $0x610] sm:$0xff] }
0x20be   :  { %8440 = vmatpush3.msra.mxu0 %v6672_v16  ;;  %8478 = vmatpush3.msra.mxu1 %v6704_v43  ;;  %v6694_v16 = vld [vmem:[%s11974_s15 + $0x710] sm:$0xff]  ;;  %v6677_v43 = vld [vmem:[%s11974_s15 + $0x688] sm:$0xff] }
0x20bf   :  { %8441 = vmatprep.subr.mxu0 %v6687_v29  ;;  %8479 = vmatprep.subr.mxu1 %v6719_v0  ;;  %v6709_v29 = vld [vmem:[%s11974_s15 + $0x788] sm:$0xff]  ;;  %v6349_v0 = vadd.f32 %v11568_v38, %v11127_v59  ;;  %v6676_v38 = vld [vmem:[%s11974_s15 + $0x680] sm:$0xff] }
0x20c0   :  { %8442 = vmatpush3.msra.mxu0 %v6671_v58  ;;  %8480 = vmatpush3.msra.mxu1 %v6703_v25  ;;  %v6426_v58 = vadd.f32 %v11578_v22, %v11133_v35  ;;  %v6661_v25 = vld [vmem:[%s11974_s15 + $0x608] sm:$0xff]  ;;  %v6708_v22 = vld [vmem:[%s11974_s15 + $0x780] sm:$0xff] }
0x20c1   :  { %8443 = vmatprep.subr.mxu0 %v6686_v30  ;;  %8481 = vmatprep.subr.mxu1 %v6718_v11  ;;  %v6693_v30 = vld [vmem:[%s11974_s15 + $0x708] sm:$0xff]  ;;  %v6357_v11 = vadd.f32 %v6356_v21, %v11589_v9  ;;  %v6692_v9 = vld [vmem:[%s11974_s15 + $0x700] sm:$0xff] }
0x20c2   :  { %8444 = vmatpush3.msra.mxu0 %v6670_v20  ;;  %8482 = vmatpush3.msra.mxu1 %v6702_v23  ;;  %v6434_v20 = vadd.f32 %v6433_v24, %v11600_v57  ;;  %v6660_v23 = vld [vmem:[%s11974_s15 + $0x600] sm:$0xff]  ;;  %v6448_v57 = vmax.f32 %v6349_v0, 0.0 }
0x20c3   :  { %8445 = vmatprep.subr.mxu0 %v6685_v52  ;;  %8483 = vmatprep.subr.mxu1 %v6717_v33  ;;  %v6450_v52 = vmax.f32 %v6426_v58, 0.0  ;;  %v6355_v33 = vadd.f32 %v6354_v4, %v11127_v59 }
0x20c4   :  { %8446 = vmatpush3.msra.mxu0 %v6669_v6  ;;  %8484 = vmatpush3.msra.mxu1 %v6701_v34  ;;  %v6432_v6 = vadd.f32 %v6431_v39, %v11133_v35  ;;  %v6465_v34 = vmax.f32 %v6357_v11, 0.0 }
0x20c5   :  { %8447 = vmatprep.subr.mxu0 %v6684_v32  ;;  %8485 = vmatprep.subr.mxu1 %v6716_v3  ;;  %v6467_v32 = vmax.f32 %v6434_v20, 0.0  ;;  %v6464_v3 = vmax.f32 %v6355_v33, 0.0 }
0x20c6   :  { %8448 = vmatpush3.msra.mxu0 %v6668_v51  ;;  %8486 = vmatpush3.msra.mxu1 %v6700_v5  ;;  %v6466_v51 = vmax.f32 %v6432_v6, 0.0 }
0x20c7   :  { %8449 = vmatprep.subr.mxu0 %v6683_v15  ;;  %8487 = vmatprep.subr.mxu1 %v6715_v13 }
0x20c8   :  { %8450 = vmatpush3.msra.mxu0 %v6667_v42  ;;  %8488 = vmatpush3.msra.mxu1 %v6699_v36 }
0x20c9   :  { %8451 = vmatprep.subr.mxu0 %v6682_v40  ;;  %8489 = vmatprep.subr.mxu1 %v6714_v48 }
0x20ca   :  { %8452 = vmatpush3.msra.mxu0 %v6666_v2  ;;  %8490 = vmatpush3.msra.mxu1 %v6698_v56 }
0x20cb   :  { %8453 = vmatprep.subr.mxu0 %v6681_v10  ;;  %8491 = vmatprep.subr.mxu1 %v6713_v1 }
0x20cc   :  { %8454 = vmatpush3.msra.mxu0 %v6665_v17  ;;  %8492 = vmatpush3.msra.mxu1 %v6697_v55 }
0x20cd   :  { %8455 = vmatprep.subr.mxu0 %v6680_v8  ;;  %8493 = vmatprep.subr.mxu1 %v6712_v47  ;;  %v8043_v47 = vld [vmem:[%s11976_s16] ss:$0 sm:$0xff] }
0x20ce   :  { %8456 = vmatpush3.msra.mxu0 %v6664_v19  ;;  %8494 = vmatpush3.msra.mxu1 %v6696_v54 }
0x20cf   :  { %8457 = vmatprep.subr.mxu0 %v6679_v63  ;;  %8495 = vmatprep.subr.mxu1 %v6711_v12 }
0x20d0   :  { %8458 = vmatpush3.msra.mxu0 %v6663_v18  ;;  %8496 = vmatpush3.msra.mxu1 %v6695_v44 }
0x20d1   :  { %8459 = vmatprep.subr.mxu0 %v6678_v45  ;;  %8497 = vmatprep.subr.mxu1 %v6710_v41 }
0x20d2   :  { %8460 = vmatpush3.msra.mxu0 %v6662_v50  ;;  %8498 = vmatpush3.msra.mxu1 %v6694_v16 }
0x20d3   :  { %8461 = vmatprep.subr.mxu0 %v6677_v43  ;;  %8499 = vmatprep.subr.mxu1 %v6709_v29 }
0x20d4   :  { %8462 = vmatpush3.msra.mxu0 %v6661_v25  ;;  %8500 = vmatpush3.msra.mxu1 %v6693_v30 }
0x20d5   :  { %8463 = vmatprep.subr.mxu0 %v6676_v38  ;;  %8501 = vmatprep.subr.mxu1 %v6708_v22 }
0x20d6   :  { %8464 = vmatpush3.msra.mxu0 %v6660_v23  ;;  %8502 = vmatpush3.msra.mxu1 %v6692_v9 }
0x20d7   :  { %7246 = vmatmul.mubr.f32.vlgmr.msra.gmra.mxu0 %v6448_v57  ;;  %7321 = vmatmul.mubr.f32.vlgmr.msra.gmra.mxu1 %v6450_v52 }
0x20d8   :  { %7250 = vmatprep.mubr.f32.mxu0 %v6465_v34  ;;  %7325 = vmatprep.mubr.f32.mxu1 %v6467_v32 }
0x20db   :  { %7251 = vmatmul.mubr.f32.gmra.mxu0 %v6464_v3  ;;  %7326 = vmatmul.mubr.f32.gmra.mxu1 %v6466_v51 }
0x212c   :  { %v8237_v5 = vpop.f32.mrf.mxu0  ;;  %v8275_v15 = vpop.f32.mrf.mxu1 }
0x212e   :  { %v8238_v13 = vpop.f32.mrf.mxu0  ;;  %v8276_v59 = vpop.f32.mrf.mxu1 }
0x212f   :  { %v8239_v8 = vadd.f32 %v8238_v13, %v8237_v5  ;;  %v8277_v18 = vadd.f32 %v8276_v59, %v8275_v15 }
0x2131   :  { %v6798_v54 = vadd.f32 %v8239_v8, %v8043_v47 }
0x2132   :  { %v8240_v42 = vpop.f32.mrf.mxu0  ;;  %v8278_v35 = vpop.f32.mrf.mxu1 }
0x2133   :  { %v6873_v41 = vadd.f32 %v8277_v18, %v6798_v54 }
0x2134   :  { %v8241_v36 = vpop.f32.mrf.mxu0  ;;  %v8279_v40 = vpop.f32.mrf.mxu1 }
0x2135   :  { %v8242_v63 = vadd.f32 %v8241_v36, %v8240_v42  ;;  %v8280_v50 = vadd.f32 %v8279_v40, %v8278_v35 }
0x2137   :  { %v6803_v21 = vadd.f32 %v8242_v63, %v8043_v47 }
0x2139   :  { %v6878_v0 = vadd.f32 %v8280_v50, %v6803_v21 }
0x214f   :  { %v8313_v48 = vpop.f32.mrf.mxu0  ;;  %v8351_v2 = vpop.f32.mrf.mxu1 }
0x2151   :  { %v8314_v56 = vpop.f32.mrf.mxu0  ;;  %v8352_v10 = vpop.f32.mrf.mxu1 }
0x2152   :  { %v8315_v44 = vadd.f32 %v8314_v56, %v8313_v48  ;;  %v8353_v58 = vadd.f32 %v8352_v10, %v8351_v2 }
0x2154   :  { %v6948_v16 = vadd.f32 %v8315_v44, %v6873_v41 }
0x2155   :  { %v8316_v1 = vpop.f32.mrf.mxu0  ;;  %v8354_v17 = vpop.f32.mrf.mxu1 }
0x2156   :  { %v7023_v11 = vadd.f32 %v8353_v58, %v6948_v16 }
0x2157   :  { %v8317_v55 = vpop.f32.mrf.mxu0  ;;  %v8355_v4 = vpop.f32.mrf.mxu1 }
0x2158   :  { %v8318_v43 = vadd.f32 %v8317_v55, %v8316_v1  ;;  %v8356_v22 = vadd.f32 %v8355_v4, %v8354_v17 }
0x215a   :  { %v6953_v20 = vadd.f32 %v8318_v43, %v6878_v0 }
0x215c   :  { %v7028_v33 = vadd.f32 %v8356_v22, %v6953_v20 }
0x2173   :  { %v8389_v39 = vpop.f32.mrf.mxu0  ;;  %v8427_v19 = vpop.f32.mrf.mxu1 }
0x2175   :  { %v8390_v12 = vpop.f32.mrf.mxu0  ;;  %v8428_v45 = vpop.f32.mrf.mxu1 }
0x2176   :  { %v8391_v25 = vadd.f32 %v8390_v12, %v8389_v39  ;;  %v8429_v6 = vadd.f32 %v8428_v45, %v8427_v19 }
0x2178   :  { %v7098_v23 = vadd.f32 %v8391_v25, %v7023_v11 }
0x2179   :  { %v8392_v24 = vpop.f32.mrf.mxu0  ;;  %v8430_v29 = vpop.f32.mrf.mxu1 }
0x217a   :  { %v7173_v3 = vadd.f32 %v8429_v6, %v7098_v23 }
0x217b   :  { %v8393_v30 = vpop.f32.mrf.mxu0  ;;  %v8431_v38 = vpop.f32.mrf.mxu1 }
0x217c   :  { %v8394_v9 = vadd.f32 %v8393_v30, %v8392_v24  ;;  %v8432_v59 = vadd.f32 %v8431_v38, %v8430_v29 }
0x217e   :  { %v7103_v51 = vadd.f32 %v8394_v9, %v7028_v33 }
0x2180   :  { %v7178_v48 = vadd.f32 %v8432_v59, %v7103_v51 }
0x2197   :  { %v8465_v57 = vpop.f32.mrf.mxu0  ;;  %v8503_v52 = vpop.f32.mrf.mxu1 }
0x2199   :  { %v8466_v34 = vpop.f32.mrf.mxu0  ;;  %v8504_v32 = vpop.f32.mrf.mxu1 }
0x219a   :  { %v8467_v5 = vadd.f32 %v8466_v34, %v8465_v57  ;;  %v8505_v35 = vadd.f32 %v8504_v32, %v8503_v52 }
0x219b   :  { %v8468_v15 = vpop.f32.mrf.mxu0  ;;  %v8506_v13 = vpop.f32.mrf.mxu1 }
0x219c   :  { %v7248_v42 = vadd.f32 %v8467_v5, %v7173_v3 }
0x219d   :  { %v8469_v36 = vpop.f32.mrf.mxu0  ;;  %v8507_v40 = vpop.f32.mrf.mxu1 }
0x219e   :  { %v7323_v2 = vadd.f32 %v8505_v35, %v7248_v42  ;;  %v8470_v56 = vadd.f32 %v8469_v36, %v8468_v15  ;;  %v8508_v55 = vadd.f32 %v8507_v40, %v8506_v13 }
0x21a0   :  { %v7333_v10 = vcombine.high %v7323_v2, %v7323_v2  ;;  %v7340_v1 = vrot.slane %v7323_v2, %v9792_v26  ;;  %v7253_v17 = vadd.f32 %v8470_v56, %v7178_v48 }
0x21a2   :  { %v7347_v8 = vrot.slane %v7333_v10, %v9792_v26  ;;  %v7348_v47 = vcombine.high %v7340_v1, %v7340_v1  ;;  %v7328_v4 = vadd.f32 %v8508_v55, %v7253_v17  ;;  %v7375_v19 = vadd.f32 %v7340_v1, %v10556_v49 }
0x21a4   :  { %v7349_v39 = vcombine.high %v7347_v8, %v7347_v8  ;;  %v7376_v54 = vadd.f32 %v7348_v47, %v10558_v31  ;;  %v7350_v63 = vcombine.high %v7328_v4, %v7328_v4  ;;  %v7357_v12 = vrot.slane %v7328_v4, %v9792_v26 }
0x21a5   :  { %v7377_v18 = vadd.f32 %v7347_v8, %v10560_v14 }
0x21a6   :  { %v7364_v44 = vrot.slane %v7350_v63, %v9792_v26  ;;  %v7378_v45 = vadd.f32 %v7349_v39, %v10562_v53  ;;  %v7393_v41 = vcombine.low %v7375_v19, %v7376_v54  ;;  %v7365_v21 = vcombine.high %v7357_v12, %v7357_v12 }
0x21a7   :  { %v7379_v16 = vadd.f32 %v7357_v12, %v10574_v7 }
0x21a8   :  { %v7366_v24 = vcombine.high %v7364_v44, %v7364_v44  ;;  %v7394_v50 = vcombine.low %v7377_v18, %v7378_v45  ;;  %v7380_v43 = vadd.f32 %v7365_v21, %v10576_v37  ;;  %v7381_v49 = vadd.f32 %v7364_v44, %v10578_v61  ;;  %v7722_v21 = vld [vmem:[%s11977_s19 + $0x28] sm:$0xff] }
0x21a9   :  { %v7401_v31 = vrot.slane %v7393_v41, %v9792_v26  ;;  %v7723_v41 = vld [vmem:[%s11977_s19 + $0x30] sm:$0xff] }
0x21aa   :  { %v7408_v29 = vrot.slane %v7394_v50, %v9792_v26  ;;  %v7382_v14 = vadd.f32 %v7366_v24, %v10580_v28  ;;  %v7410_v0 = vcombine.low %v7379_v16, %v7380_v43  ;;  %v7721_v24 = vld [vmem:[%s11977_s19 + $0x20] sm:$0xff]  ;;  %v7720_v50 = vld [vmem:[%s11977_s19 + $0x18] sm:$0xff] }
0x21ac   :  { %v7409_v58 = vcombine.low %v7401_v31, %v7408_v29  ;;  %v7411_v25 = vcombine.low %v7381_v49, %v7382_v14  ;;  %v7418_v30 = vrot.slane %v7410_v0, %v9792_v26  ;;  %v26_v31 = vstv %s11978_s20 }
0x21ad   :  { %27 = vst [vmem:[#allocation6] sm:$0x1] %v26_v31 }
0x21ae   :  { %v7429_v53 = vsel %vm2026_vm6, %v7409_v58, 0.0  ;;  %v7425_v11 = vrot.slane %v7411_v25, %v9792_v26 }
0x21af   :  { %7430 = vadd.xlane.f32.xlu1 %v7429_v53  ;;  %v8044_v53 = vld [vmem:[%s11979_s17] ss:$0 sm:$0xff] }
0x21b0   :  { %v7426_v7 = vcombine.low %v7418_v30, %v7425_v11  ;;  %v8045_v11 = vld [vmem:[%s11980_s18] ss:$0 sm:$0xff] }
0x21b2   :  { %v7432_v37 = vsel %vm2026_vm6, %v7426_v7, 0.0  ;;  %v7654_v7 = vcombine.high %v8044_v53, %v8044_v53 }
0x21b3   :  { %7433 = vadd.xlane.f32.xlu0 %v7432_v37  ;;  %v7688_v37 = vcombine.high %v8045_v11, %v8045_v11 }
0x21b4   :  { %v8046_v31 = vld [vmem:[#allocation6] ss:$0 sm:$0xff] }
0x2238   :  { %v7431_v61 = vpop.xlane.xlu1 %7430 }
0x2239   :  { %v7435_v20 = vmul.f32 0.015625, %v7431_v61  ;;  %v7661_v61 = vrot.slane %v8044_v53, %v9792_v26 }
0x223b   :  { %v7445_v38 = vrot.slane %v7435_v20, %v10375_v60  ;;  %v7452_v28 = vrot.slane %v7435_v20, %v10378_v62  ;;  %v7459_v22 = vrot.slane %v7435_v20, %v10381_v46  ;;  %v7466_v23 = vrot.slane %v7435_v20, %v10384_v27 }
0x223c   :  { %v7434_v9 = vpop.xlane.xlu0 %7433  ;;  %v7668_v20 = vrot.slane %v7654_v7, %v9792_v26 }
0x223d   :  { %v11823_v57 = vsub.f32 %v7375_v19, %v7445_v38  ;;  %v11825_v52 = vsub.f32 %v7376_v54, %v7452_v28  ;;  %v11827_v33 = vsub.f32 %v7377_v18, %v7459_v22  ;;  %v11829_v6 = vsub.f32 %v7378_v45, %v7466_v23  ;;  %v7724_v45 = vld [vmem:[%s11977_s19 + $0x38] sm:$0xff] }
0x223e   :  { %v7436_v34 = vmul.f32 0.015625, %v7434_v9  ;;  %8874 = vmatprep.subr.mxu0 %v7724_v45  ;;  %v7695_v38 = vrot.slane %v8045_v11, %v9792_v26  ;;  %v7702_v28 = vrot.slane %v7688_v37, %v9792_v26  ;;  %v7669_v23 = vcombine.high %v7661_v61, %v7661_v61 }
0x223f   :  { %v7511_v32 = vmul.f32 %v11823_v57, %v11823_v57  ;;  %v7512_v3 = vmul.f32 %v11825_v52, %v11825_v52  ;;  %v7513_v51 = vmul.f32 %v11827_v33, %v11827_v33  ;;  %v7514_v5 = vmul.f32 %v11829_v6, %v11829_v6  ;;  %8875 = vmatpush3.msra.mxu0 %v7724_v45 }
0x2240   :  { %v7473_v15 = vrot.slane %v7436_v34, %v10375_v60  ;;  %v7480_v13 = vrot.slane %v7436_v34, %v10378_v62  ;;  %v7487_v59 = vrot.slane %v7436_v34, %v10381_v46  ;;  %v7494_v42 = vrot.slane %v7436_v34, %v10384_v27  ;;  %8876 = vmatprep.subr.mxu0 %v7723_v41 }
0x2241   :  { %v7527_v35 = vcombine.low %v7511_v32, %v7512_v3  ;;  %v7528_v36 = vcombine.low %v7513_v51, %v7514_v5  ;;  %8877 = vmatpush3.msra.mxu0 %v7723_v41  ;;  %v7670_v9 = vcombine.high %v7668_v20, %v7668_v20  ;;  %v7703_v5 = vcombine.high %v7695_v38, %v7695_v38 }
0x2242   :  { %v11843_v40 = vsub.f32 %v7379_v16, %v7473_v15  ;;  %v11845_v48 = vsub.f32 %v7380_v43, %v7480_v13  ;;  %v11847_v2 = vsub.f32 %v7381_v49, %v7487_v59  ;;  %v11849_v56 = vsub.f32 %v7382_v14, %v7494_v42  ;;  %8878 = vmatprep.subr.mxu0 %v7722_v21  ;;  %v7719_v16 = vld [vmem:[%s11977_s19 + $0x10] sm:$0xff]  ;;  %v7718_v43 = vld [vmem:[%s11977_s19 + $0x8] sm:$0xff]  ;;  %v7717_v49 = vld [vmem:[%s11977_s19] sm:$0xff] }
0x2243   :  { %v7535_v10 = vrot.slane %v7527_v35, %v9792_v26  ;;  %v7542_v1 = vrot.slane %v7528_v36, %v9792_v26  ;;  %8879 = vmatpush3.msra.mxu0 %v7722_v21  ;;  %v7704_v15 = vcombine.high %v7702_v28, %v7702_v28 }
0x2244   :  { %v7515_v17 = vmul.f32 %v11843_v40, %v11843_v40  ;;  %v7516_v55 = vmul.f32 %v11845_v48, %v11845_v48  ;;  %v7517_v8 = vmul.f32 %v11847_v2, %v11847_v2  ;;  %v7518_v47 = vmul.f32 %v11849_v56, %v11849_v56  ;;  %8880 = vmatprep.subr.mxu0 %v7721_v24 }
0x2245   :  { %v7543_v4 = vcombine.low %v7535_v10, %v7542_v1  ;;  %8881 = vmatpush3.msra.mxu0 %v7721_v24 }
0x2246   :  { %v7544_v39 = vcombine.low %v7515_v17, %v7516_v55  ;;  %v7545_v19 = vcombine.low %v7517_v8, %v7518_v47  ;;  %8882 = vmatprep.subr.mxu0 %v7720_v50 }
0x2247   :  { %v7563_v54 = vsel %vm2026_vm6, %v7543_v4, 0.0  ;;  %8883 = vmatpush3.msra.mxu0 %v7720_v50 }
0x2248   :  { %7564 = vadd.xlane.f32.xlu1 %v7563_v54  ;;  %v7552_v63 = vrot.slane %v7544_v39, %v9792_v26  ;;  %v7559_v12 = vrot.slane %v7545_v19, %v9792_v26  ;;  %8884 = vmatprep.subr.mxu0 %v7719_v16 }
0x2249   :  { %8885 = vmatpush3.msra.mxu0 %v7719_v16 }
0x224a   :  { %v7560_v18 = vcombine.low %v7552_v63, %v7559_v12  ;;  %8886 = vmatprep.subr.mxu0 %v7718_v43 }
0x224b   :  { %8887 = vmatpush3.msra.mxu0 %v7718_v43 }
0x224c   :  { %v7566_v44 = vsel %vm2026_vm6, %v7560_v18, 0.0  ;;  %8888 = vmatprep.subr.mxu0 %v7717_v49 }
0x224d   :  { %7567 = vadd.xlane.f32.xlu0 %v7566_v44  ;;  %8889 = vmatpush3.msra.mxu0 %v7717_v49 }
0x22d1   :  { %v7565_v29 = vpop.xlane.xlu1 %7564 }
0x22d2   :  { %v7569_v14 = vmul.f32 0.015625, %v7565_v29 }
0x22d4   :  { %v7571_v0 = vadd.f32 1e-05, %v7569_v14 }
0x22d6   :  { %9102 = vrsqrt.f32 %v7571_v0  ;;  %v7568_v58 = vpop.xlane.xlu0 %7567 }
0x22d7   :  { %v7570_v25 = vmul.f32 0.015625, %v7568_v58 }
0x22d9   :  { %v7572_v30 = vadd.f32 1e-05, %v7570_v25 }
0x22db   :  { %9104 = vrsqrt.f32 %v7572_v30 }
0x22e3   :  { %v9103_v22 = vpop.eup %9102 }
0x22e4   :  { %v7583_v34 = vrot.slane %v9103_v22, %v10375_v60  ;;  %v7590_v32 = vrot.slane %v9103_v22, %v10378_v62  ;;  %v7597_v3 = vrot.slane %v9103_v22, %v10381_v46  ;;  %v7604_v51 = vrot.slane %v9103_v22, %v10384_v27 }
0x22e6   :  { %v7641_v13 = vmul.f32 %v7583_v34, %v11823_v57  ;;  %v7642_v59 = vmul.f32 %v7590_v32, %v11825_v52  ;;  %v7643_v42 = vmul.f32 %v7597_v3, %v11827_v33  ;;  %v7644_v35 = vmul.f32 %v7604_v51, %v11829_v6 }
0x22e8   :  { %v9105_v36 = vpop.eup %9104  ;;  %v7675_v10 = vmul.f32 %v7661_v61, %v7641_v13  ;;  %v7676_v1 = vmul.f32 %v7669_v23, %v7642_v59  ;;  %v7677_v17 = vmul.f32 %v7668_v20, %v7643_v42  ;;  %v7678_v55 = vmul.f32 %v7670_v9, %v7644_v35 }
0x22e9   :  { %v7611_v8 = vrot.slane %v9105_v36, %v10375_v60  ;;  %v7618_v47 = vrot.slane %v9105_v36, %v10378_v62  ;;  %v7625_v4 = vrot.slane %v9105_v36, %v10381_v46  ;;  %v7632_v39 = vrot.slane %v9105_v36, %v10384_v27 }
0x22ea   :  { %v7709_v57 = vadd.f32 %v7695_v38, %v7675_v10  ;;  %v7710_v19 = vadd.f32 %v7703_v5, %v7676_v1  ;;  %v7711_v52 = vadd.f32 %v7702_v28, %v7677_v17  ;;  %v7712_v54 = vadd.f32 %v7704_v15, %v7678_v55 }
0x22eb   :  { %v7645_v33 = vmul.f32 %v7611_v8, %v11843_v40  ;;  %v7646_v6 = vmul.f32 %v7618_v47, %v11845_v48  ;;  %v7647_v63 = vmul.f32 %v7625_v4, %v11847_v2  ;;  %v7648_v12 = vmul.f32 %v7632_v39, %v11849_v56 }
0x22ec   :  { %v7740_v18 = vcombine.low %v7709_v57, %v7710_v19  ;;  %v7741_v60 = vcombine.low %v7711_v52, %v7712_v54 }
0x22ed   :  { %v7679_v44 = vmul.f32 %v7661_v61, %v7645_v33  ;;  %v7680_v62 = vmul.f32 %v7669_v23, %v7646_v6  ;;  %v7681_v45 = vmul.f32 %v7668_v20, %v7647_v63  ;;  %v7682_v46 = vmul.f32 %v7670_v9, %v7648_v12 }
0x22ee   :  { %v7748_v27 = vrot.slane %v7740_v18, %v9792_v26  ;;  %v7755_v41 = vrot.slane %v7741_v60, %v9792_v26 }
0x22ef   :  { %v7713_v21 = vadd.f32 %v7695_v38, %v7679_v44  ;;  %v7714_v24 = vadd.f32 %v7703_v5, %v7680_v62  ;;  %v7715_v50 = vadd.f32 %v7702_v28, %v7681_v45  ;;  %v7716_v40 = vadd.f32 %v7704_v15, %v7682_v46 }
0x22f0   :  { %v7756_v16 = vcombine.low %v7748_v27, %v7755_v41 }
0x22f1   :  { %v7757_v48 = vcombine.low %v7713_v21, %v7714_v24  ;;  %v7758_v43 = vcombine.low %v7715_v50, %v7716_v40 }
0x22f2   :  { %8890 = vmatprep.mubr.msk.f32.mxu0 %vm2026_vm6, %v7756_v16 }
0x22f3   :  { %v7765_v2 = vrot.slane %v7757_v48, %v9792_v26  ;;  %v7772_v56 = vrot.slane %v7758_v43, %v9792_v26 }
0x22f5   :  { %v7773_v49 = vcombine.low %v7765_v2, %v7772_v56 }
0x22f7   :  { %8891 = vmatmul.mubr.msk.f32.vlgmr.msra.gmra.mxu0 %vm2026_vm6, %v7773_v49 }
0x23b7   :  { %v8892_v29 = vpop.f32.mrf.mxu0 }
0x23b8   :  { %v7850_v14 = vadd.f32 %v8892_v29, %v8046_v31 }
0x23b9   :  { %v7844_v0 = vpop.f32.mrf.mxu0 }
0x23ba   :  { %v8050_v58 = vmul.f32 -1.442695, %v7850_v14  ;;  %v7845_v25 = vadd.f32 %v8046_v31, %v7844_v0 }
0x23bc   :  { %9106 = vpow2.f32 %v8050_v58  ;;  %v8049_v53 = vmul.f32 -1.442695, %v7845_v25 }
0x23be   :  { %9108 = vpow2.f32 %v8049_v53 }
0x23c9   :  { %v9107_v30 = vpop.eup %9106 }
0x23ca   :  { %v7860_v11 = vadd.f32 1.0, %v9107_v30 }
0x23cb   :  { %v9109_v7 = vpop.eup %9108 }
0x23cc   :  { %9110 = vrcp.f32 %v7860_v11  ;;  %v7859_v37 = vadd.f32 1.0, %v9109_v7 }
0x23ce   :  { %9112 = vrcp.f32 %v7859_v37 }
0x23d9   :  { %v9111_v61 = vpop.eup %9110 }
0x23da   :  { %v7884_v20 = vcombine.high %v9111_v61, %v9111_v61  ;;  %v7891_v38 = vrot.slane %v9111_v61, %v9792_v26 }
0x23db   :  { %v9113_v28 = vpop.eup %9112 }
0x23dc   :  { %v7898_v22 = vrot.slane %v7884_v20, %v9792_v26  ;;  %v7899_v23 = vcombine.high %v7891_v38, %v7891_v38  ;;  %7914 = vst.msk [vmem:[%s11981_s21 + $0x8] sm:$0x3] %vm7909_vm10, %v7891_v38  ;;  %v7867_v9 = vcombine.high %v9113_v28, %v9113_v28  ;;  %v7874_v34 = vrot.slane %v9113_v28, %v9792_v26 }
0x23de   :  { %v7900_v32 = vcombine.high %v7898_v22, %v7898_v22  ;;  %7915 = vst.msk [vmem:[%s11981_s21 + $0xa] sm:$0x3] %vm7909_vm10, %v7899_v23  ;;  %7916 = vst.msk [vmem:[%s11981_s21 + $0xc] sm:$0x3] %vm7909_vm10, %v7898_v22  ;;  %v7881_v3 = vrot.slane %v7867_v9, %v9792_v26  ;;  %v7882_v51 = vcombine.high %v7874_v34, %v7874_v34 }
0x23df   :  { %7910 = vst.msk [vmem:[%s11981_s21] sm:$0x3] %vm7909_vm10, %v7874_v34 }
0x23e0   :  { %7917 = vst.msk [vmem:[%s11981_s21 + $0xe] sm:$0x3] %vm7909_vm10, %v7900_v32  ;;  %v7883_v5 = vcombine.high %v7881_v3, %v7881_v3  ;;  %7911 = vst.msk [vmem:[%s11981_s21 + $0x2] sm:$0x3] %vm7909_vm10, %v7882_v51 }
0x23e1   :  { %7912 = vst.msk [vmem:[%s11981_s21 + $0x4] sm:$0x3] %vm7909_vm10, %v7881_v3 }
0x23e2   :  { %7913 = vst.msk [vmem:[%s11981_s21 + $0x6] sm:$0x3] %vm7909_vm10, %v7883_v5 }

</bundles_post_ra>
